<compile_context>
chip_gen: v6e
topology: v6e:2x2x1
jax: 0.10.0
libtpu: 0.0.40
codegen_flags: <defaults>
</compile_context>

<pallas_src>
import jax
import jax.numpy as jnp
from jax.experimental import pallas as pl
from jax.experimental.pallas import tpu as pltpu


def _decoder_ankle_kernel(
    enc_ref,      # (B, S, H)   encoder hidden states
    y_ref,        # (B, S)      y_history (trailing unit dim squeezed)
    w1c_ref,      # (H, H)      attn Linear block acting on dec_c
    w1e_ref,      # (H, H)      attn Linear block acting on enc_hidden
    ab1_ref,      # (1, H)      attn Linear(3H->H) bias
    aw2_ref,      # (1, H)      attn Linear(H->1) weight (PyTorch (out,in))
    wy_ref,       # (1, 4H)     folded: fw_y * W_ih
    whcomb_ref,   # (H, 5H)     [W_hh | W1_h]  (lane-aligned slices of h-proj)
    wcg_ref,      # (H, 4H)     folded: fw_ctx @ W_ih
    beff_ref,     # (1, 4H)     folded: fb * W_ih + (b_ih + b_hh)
    gwh_ref,      # (1, H)      folded final fc, part acting on h
    gwc_ref,      # (1, H)      folded final fc, part acting on ctx
    gb_ref,       # (1, 1)      folded final fc bias
    yhat_ref,     # (B, 1)      output: y_hats
    hall_ref,     # (B, S*H)    output: dec_hidden_all (flattened, lane-dense)
    ctxall_ref,   # (B, S*H)    output: context_all    (flattened, lane-dense)
    attnall_ref,  # (B, S*S)    output: temporal_attn_weights_all (flattened)
):
    B, S, H = enc_ref.shape
    f32 = jnp.float32

    enc = enc_ref[...]                    # (B, S, H)
    y_all = y_ref[...]                    # (B, S)
    w1_c = w1c_ref[...]
    ab1 = ab1_ref[...]
    wy = wy_ref[...]
    wh_comb = whcomb_ref[...]
    wcg = wcg_ref[...]
    b_eff = beff_ref[...]

    # Encoder contribution to the attention MLP is t-invariant: hoist it.
    enc_proj = jnp.dot(enc.reshape(B * S, H), w1e_ref[...],
                       preferred_element_type=f32).reshape(B, S, H)
    # Hoist the (1,1,H) view of the attention output weight (no CSE of
    # broadcast_in_dim inside the unrolled loop).
    aw2_b = aw2_ref[...].reshape(1, 1, H)

    # y / bias contribution to the LSTM gates only depends on inputs: hoist
    # it entirely off the serial recurrence.
    gate_pre = [y_all[:, t:t + 1] * wy + b_eff for t in range(S)]   # S x (B,4H)

    h = jnp.zeros((B, H), f32)
    c = jnp.zeros((B, H), f32)
    ctx = jnp.zeros((B, H), f32)
    # Parts of step t that only need (h_{t-1}, c_{t-1}); for t=0 both are 0.
    base = ab1 + jnp.zeros((B, H), f32)       # h@W1_h + c@W1_c + ab1 at h=c=0
    h_whh = jnp.zeros((B, 4 * H), f32)        # h@W_hh at h=0

    h_list, ctx_list, attn_list = [], [], []

    # Fully unrolled recurrence: S is a small static trip count.
    for t in range(S):
        # Attention MLP: tanh(enc@W1_e + h@W1_h + c@W1_c + b1) · w2
        hid = jnp.tanh(enc_proj + base[:, None, :])                 # (B, S, H)
        # ab2 dropped: softmax over the temporal axis is shift-invariant.
        scores = jnp.sum(hid * aw2_b, axis=-1)                      # (B, S)

        # Stable softmax over the temporal axis.
        scores = scores - jnp.max(scores, axis=1, keepdims=True)
        e = jnp.exp(scores)
        ssum = jnp.sum(e, axis=1, keepdims=True)
        inv = pl.reciprocal(ssum, approx=True)
        inv = inv * (2.0 - ssum * inv)          # one Newton step -> ~f32 exact
        attn = e * inv                                              # (B, S)

        # context_t = bmm(attn, enc)
        ctx = jnp.sum(attn[:, :, None] * enc, axis=1)               # (B, H)

        # LSTM cell (feeder net folded into the input weights); only the
        # ctx-dependent matmul sits behind the attention on the serial path.
        gates = (gate_pre[t] + h_whh
                 + jnp.dot(ctx, wcg, preferred_element_type=f32))   # (B, 4H)
        sig = jax.nn.sigmoid(gates)             # one EUP op on the full vreg
        th = jnp.tanh(gates)                    # one EUP op on the full vreg
        gi = sig[:, 0:H]                        # PyTorch gate order i,f,g,o
        gf = sig[:, H:2 * H]
        go = sig[:, 3 * H:4 * H]
        gg = th[:, 2 * H:3 * H]
        c = gf * c + gi * gg
        h = go * jnp.tanh(c)

        h_list.append(h)
        ctx_list.append(ctx)
        attn_list.append(attn)

        # Eagerly compute the next step's (h, c)-only terms so h@W_hh overlaps
        # the next attention/softmax instead of waiting on ctx.
        if t + 1 < S:
            hproj = jnp.dot(h, wh_comb, preferred_element_type=f32)  # (B, 5H)
            h_whh = hproj[:, 0:4 * H]                                # lanes 0..127
            base = (hproj[:, 4 * H:5 * H]                            # lanes 128..159
                    + jnp.dot(c, w1_c, preferred_element_type=f32) + ab1)

    # y_hats = dec_final_fc(cat(h_final, context_final)) with both linears
    # folded into one vector: VPU multiply + lane reduce, no N=1 matmul.
    yhat_ref[...] = jnp.sum(h * gwh_ref[...] + ctx * gwc_ref[...],
                            axis=1, keepdims=True) + gb_ref[...]

    # Single lane-dense stores for the per-step outputs.
    hall_ref[...] = jnp.concatenate(h_list, axis=1)       # (B, S*H)
    ctxall_ref[...] = jnp.concatenate(ctx_list, axis=1)   # (B, S*H)
    attnall_ref[...] = jnp.concatenate(attn_list, axis=1) # (B, S*S)


def decoder_ankle_forward(enc_hidden_all, y_history, params):
    B, S, H = enc_hidden_all.shape
    f32 = jnp.float32
    enc = enc_hidden_all.astype(f32)
    y2d = y_history.astype(f32).reshape(B, S)     # batch-major, unit dim dropped

    # One-time algebraic folds (outside the serial recurrence).
    aw1 = params["aw1"]
    w1_h = aw1[:H, :]                              # (H, H): acts on h
    w1_c = aw1[H:2 * H, :]                         # (H, H): acts on c
    w1_e = aw1[2 * H:, :]                          # (H, H): acts on enc
    fw, wih = params["fw"], params["wih"]
    wy = fw[0:1, :] * wih                          # (1, 4H)
    wcg = fw[1:, :] @ wih                          # (H, 4H)
    b_eff = params["fb"] * wih + params["lb"]      # (1, 4H)
    # [W_hh | W1_h]: lane-aligned so the (B,5H) h-projection slices cleanly.
    wh_comb = jnp.concatenate([params["whh"], w1_h], axis=1)        # (H, 5H)
    # Fold the two final linears.
    gW = params["gw1"] @ params["gw2"]             # (2H, 1)
    gwh = gW[:H, :].T                              # (1, H)
    gwc = gW[H:, :].T                              # (1, H)
    gb = params["gb1"] @ params["gw2"] + params["gb2"]              # (1, 1)

    vmem = pl.BlockSpec(memory_space=pltpu.MemorySpace.VMEM)
    out_shapes = (
        jax.ShapeDtypeStruct((B, 1), f32),         # y_hats
        jax.ShapeDtypeStruct((B, S * H), f32),     # dec_hidden_all (flat)
        jax.ShapeDtypeStruct((B, S * H), f32),     # context_all (flat)
        jax.ShapeDtypeStruct((B, S * S), f32),     # temporal_attn_weights (flat)
    )
    args = (enc, y2d, w1_c, w1_e, params["ab1"], params["aw2"],
            wy, wh_comb, wcg, b_eff, gwh, gwc, gb)

    yhat, hall_f, ctxall_f, attnall_f = pl.pallas_call(
        _decoder_ankle_kernel,
        out_shape=out_shapes,
        in_specs=[vmem] * len(args),
        out_specs=tuple([vmem] * 4),
    )(*args)

    # Free plumbing back to the module's output shapes.
    return (yhat,
            hall_f.reshape(B, S, H),
            ctxall_f.reshape(B, S, H),
            attnall_f.reshape(B, S, S))


def init_params(key, H):
    ks = jax.random.split(key, 12)
    n = lambda k, s, scale=0.1: (scale * jax.random.normal(k, s)).astype(jnp.float32)
    return {
        "aw1": n(ks[0], (3 * H, H)),       # dec_attn_net[0].weight.T
        "ab1": n(ks[1], (1, H)),           # dec_attn_net[0].bias
        "aw2": n(ks[2], (1, H)),           # dec_attn_net[2].weight
        "ab2": n(ks[3], (1, 1)),           # dec_attn_net[2].bias
        "fw":  n(ks[4], (H + 1, 1)),       # dec_feeder_net.weight.T
        "fb":  n(ks[5], (1, 1)),           # dec_feeder_net.bias
        "wih": n(ks[6], (1, 4 * H)),       # lstm_dec.weight_ih_l0.T
        "whh": n(ks[7], (H, 4 * H)),       # lstm_dec.weight_hh_l0.T
        "lb":  n(ks[8], (1, 4 * H)),       # lstm_dec.bias_ih_l0 + bias_hh_l0
        "gw1": n(ks[9], (2 * H, H)),       # dec_final_fc[0].weight.T
        "gb1": n(ks[10], (1, H)),          # dec_final_fc[0].bias
        "gw2": n(ks[11], (H, 1)),          # dec_final_fc[1].weight.T
        "gb2": jnp.zeros((1, 1), jnp.float32),  # dec_final_fc[1].bias
    }


def decoder_ankle_reference(enc, y_hist, params):
    """Pure-JAX mirror of the PyTorch forward (un-folded), for validation."""
    B, S, H = enc.shape
    h = jnp.zeros((B, H), jnp.float32)
    c = jnp.zeros((B, H), jnp.float32)
    ctx = jnp.zeros((B, H), jnp.float32)
    hall, ctxall, attnall = [], [], []
    for t in range(S):
        aug = jnp.concatenate(
            [jnp.broadcast_to(h[:, None, :], (B, S, H)),
             jnp.broadcast_to(c[:, None, :], (B, S, H)),
             enc], axis=2)                                            # (B, S, 3H)
        hid = jnp.tanh(aug @ params["aw1"] + params["ab1"])
        scores = (hid @ params["aw2"].T + params["ab2"])[..., 0]      # (B, S)
        attn = jax.nn.softmax(scores, axis=1)
        ctx = jnp.einsum("bs,bsh->bh", attn, enc)
        y_tilde = (jnp.concatenate([y_hist[:, t], ctx], axis=1) @ params["fw"]
                   + params["fb"])
        gates = y_tilde @ params["wih"] + h @ params["whh"] + params["lb"]
        gi = jax.nn.sigmoid(gates[:, 0:H]); gf = jax.nn.sigmoid(gates[:, H:2 * H])
        gg = jnp.tanh(gates[:, 2 * H:3 * H]); go = jax.nn.sigmoid(gates[:, 3 * H:4 * H])
        c = gf * c + gi * gg
        h = go * jnp.tanh(c)
        hall.append(h); ctxall.append(ctx); attnall.append(attn)
    yhat = jnp.concatenate([h, ctx], axis=1) @ params["gw1"] + params["gb1"]
    yhat = yhat @ params["gw2"] + params["gb2"]
    return (yhat, jnp.stack(hall, 1), jnp.stack(ctxall, 1), jnp.stack(attnall, 1))


if __name__ == "__main__":
    # model_params equivalent: num_hid_units=32, num_layers=1, seq_length=9,
    # batch_size=2, out_dim=1 -> seq_len = 8
    B, H, seq_length = 2, 32, 9
    S = seq_length - 1

    key = jax.random.PRNGKey(0)
    kp, ke, ky = jax.random.split(key, 3)
    params = init_params(kp, H)
    enc_hidden_all = jax.random.normal(ke, (B, S, H), jnp.float32)
    y_history = jax.random.normal(ky, (B, S, 1), jnp.float32)

    outs = jax.block_until_ready(decoder_ankle_forward(enc_hidden_all, y_history, params))
    refs = jax.block_until_ready(decoder_ankle_reference(enc_hidden_all, y_history, params))

    names = ["y_hats", "dec_hidden_all", "context_all", "temporal_attn_weights_all"]
    for name, o, r in zip(names, outs, refs):
        assert o.shape == r.shape, (name, o.shape, r.shape)
        # Folding the feeder net / final FCs reassociates f32 ops, so allow a
        # hair more slack than strict 1e-4.
        assert jnp.allclose(o, r, atol=2e-4, rtol=2e-4), name

    print("KERNEL_OK")
</pallas_src>

<mosaic_0001>
module attributes {stable_mosaic.version = 11 : i64} {
  func.func @_decoder_ankle_kernel(%arg0: memref<2x8x32xf32, #tpu.memory_space<vmem>>, %arg1: memref<2x8xf32, #tpu.memory_space<vmem>>, %arg2: memref<32x32xf32, #tpu.memory_space<vmem>>, %arg3: memref<32x32xf32, #tpu.memory_space<vmem>>, %arg4: memref<1x32xf32, #tpu.memory_space<vmem>>, %arg5: memref<1x32xf32, #tpu.memory_space<vmem>>, %arg6: memref<1x128xf32, #tpu.memory_space<vmem>>, %arg7: memref<32x160xf32, #tpu.memory_space<vmem>>, %arg8: memref<32x128xf32, #tpu.memory_space<vmem>>, %arg9: memref<1x128xf32, #tpu.memory_space<vmem>>, %arg10: memref<1x32xf32, #tpu.memory_space<vmem>>, %arg11: memref<1x32xf32, #tpu.memory_space<vmem>>, %arg12: memref<1x1xf32, #tpu.memory_space<vmem>>, %arg13: memref<2x1xf32, #tpu.memory_space<vmem>>, %arg14: memref<2x256xf32, #tpu.memory_space<vmem>>, %arg15: memref<2x256xf32, #tpu.memory_space<vmem>>, %arg16: memref<2x64xf32, #tpu.memory_space<vmem>>) attributes {dimension_semantics = [], scalar_prefetch = 0 : i64, scratch_operands = 0 : i64, tpu.core_type = #tpu.core_type<tc>} {
    %c0 = arith.constant 0 : index
    %c0_0 = arith.constant 0 : index
    %c0_1 = arith.constant 0 : index
    %0 = vector.load %arg0[%c0, %c0_0, %c0_1] : memref<2x8x32xf32, #tpu.memory_space<vmem>>, vector<2x8x32xf32>
    %c0_2 = arith.constant 0 : index
    %c0_3 = arith.constant 0 : index
    %1 = vector.load %arg1[%c0_2, %c0_3] : memref<2x8xf32, #tpu.memory_space<vmem>>, vector<2x8xf32>
    %c0_4 = arith.constant 0 : index
    %c0_5 = arith.constant 0 : index
    %2 = vector.load %arg2[%c0_4, %c0_5] : memref<32x32xf32, #tpu.memory_space<vmem>>, vector<32x32xf32>
    %c0_6 = arith.constant 0 : index
    %c0_7 = arith.constant 0 : index
    %3 = vector.load %arg4[%c0_6, %c0_7] : memref<1x32xf32, #tpu.memory_space<vmem>>, vector<1x32xf32>
    %c0_8 = arith.constant 0 : index
    %c0_9 = arith.constant 0 : index
    %4 = vector.load %arg6[%c0_8, %c0_9] : memref<1x128xf32, #tpu.memory_space<vmem>>, vector<1x128xf32>
    %c0_10 = arith.constant 0 : index
    %c0_11 = arith.constant 0 : index
    %5 = vector.load %arg7[%c0_10, %c0_11] : memref<32x160xf32, #tpu.memory_space<vmem>>, vector<32x160xf32>
    %c0_12 = arith.constant 0 : index
    %c0_13 = arith.constant 0 : index
    %6 = vector.load %arg8[%c0_12, %c0_13] : memref<32x128xf32, #tpu.memory_space<vmem>>, vector<32x128xf32>
    %c0_14 = arith.constant 0 : index
    %c0_15 = arith.constant 0 : index
    %7 = vector.load %arg9[%c0_14, %c0_15] : memref<1x128xf32, #tpu.memory_space<vmem>>, vector<1x128xf32>
    %8 = vector.shape_cast %0 : vector<2x8x32xf32> to vector<16x32xf32>
    %c0_16 = arith.constant 0 : index
    %c0_17 = arith.constant 0 : index
    %9 = vector.load %arg3[%c0_16, %c0_17] : memref<32x32xf32, #tpu.memory_space<vmem>>, vector<32x32xf32>
    %cst = arith.constant dense<0.000000e+00> : vector<16x32xf32>
    %10 = tpu.matmul %8, %9, %cst {dimension_numbers = #tpu.dot_dimension_numbers<[1], [0], [0], [1], [0, 0, 1, 1], [], []>} : vector<16x32xf32>, vector<32x32xf32>, vector<16x32xf32> -> vector<16x32xf32>
    %11 = vector.shape_cast %10 : vector<16x32xf32> to vector<2x8x32xf32>
    %c0_18 = arith.constant 0 : index
    %c0_19 = arith.constant 0 : index
    %12 = vector.load %arg5[%c0_18, %c0_19] : memref<1x32xf32, #tpu.memory_space<vmem>>, vector<1x32xf32>
    %13 = vector.shape_cast %12 : vector<1x32xf32> to vector<1x1x32xf32>
    %14 = vector.extract_strided_slice %1 {offsets = [0, 0], sizes = [2, 1], strides = [1, 1]} : vector<2x8xf32> to vector<2x1xf32>
    %15 = vector.broadcast %14 : vector<2x1xf32> to vector<2x128xf32>
    %16 = vector.broadcast %4 : vector<1x128xf32> to vector<2x128xf32>
    %17 = arith.mulf %15, %16 : vector<2x128xf32>
    %18 = vector.broadcast %7 : vector<1x128xf32> to vector<2x128xf32>
    %19 = arith.addf %17, %18 : vector<2x128xf32>
    %20 = vector.extract_strided_slice %1 {offsets = [0, 1], sizes = [2, 1], strides = [1, 1]} : vector<2x8xf32> to vector<2x1xf32>
    %21 = vector.broadcast %20 : vector<2x1xf32> to vector<2x128xf32>
    %22 = vector.broadcast %4 : vector<1x128xf32> to vector<2x128xf32>
    %23 = arith.mulf %21, %22 : vector<2x128xf32>
    %24 = vector.broadcast %7 : vector<1x128xf32> to vector<2x128xf32>
    %25 = arith.addf %23, %24 : vector<2x128xf32>
    %26 = vector.extract_strided_slice %1 {offsets = [0, 2], sizes = [2, 1], strides = [1, 1]} : vector<2x8xf32> to vector<2x1xf32>
    %27 = vector.broadcast %26 : vector<2x1xf32> to vector<2x128xf32>
    %28 = vector.broadcast %4 : vector<1x128xf32> to vector<2x128xf32>
    %29 = arith.mulf %27, %28 : vector<2x128xf32>
    %30 = vector.broadcast %7 : vector<1x128xf32> to vector<2x128xf32>
    %31 = arith.addf %29, %30 : vector<2x128xf32>
    %32 = vector.extract_strided_slice %1 {offsets = [0, 3], sizes = [2, 1], strides = [1, 1]} : vector<2x8xf32> to vector<2x1xf32>
    %33 = vector.broadcast %32 : vector<2x1xf32> to vector<2x128xf32>
    %34 = vector.broadcast %4 : vector<1x128xf32> to vector<2x128xf32>
    %35 = arith.mulf %33, %34 : vector<2x128xf32>
    %36 = vector.broadcast %7 : vector<1x128xf32> to vector<2x128xf32>
    %37 = arith.addf %35, %36 : vector<2x128xf32>
    %38 = vector.extract_strided_slice %1 {offsets = [0, 4], sizes = [2, 1], strides = [1, 1]} : vector<2x8xf32> to vector<2x1xf32>
    %39 = vector.broadcast %38 : vector<2x1xf32> to vector<2x128xf32>
    %40 = vector.broadcast %4 : vector<1x128xf32> to vector<2x128xf32>
    %41 = arith.mulf %39, %40 : vector<2x128xf32>
    %42 = vector.broadcast %7 : vector<1x128xf32> to vector<2x128xf32>
    %43 = arith.addf %41, %42 : vector<2x128xf32>
    %44 = vector.extract_strided_slice %1 {offsets = [0, 5], sizes = [2, 1], strides = [1, 1]} : vector<2x8xf32> to vector<2x1xf32>
    %45 = vector.broadcast %44 : vector<2x1xf32> to vector<2x128xf32>
    %46 = vector.broadcast %4 : vector<1x128xf32> to vector<2x128xf32>
    %47 = arith.mulf %45, %46 : vector<2x128xf32>
    %48 = vector.broadcast %7 : vector<1x128xf32> to vector<2x128xf32>
    %49 = arith.addf %47, %48 : vector<2x128xf32>
    %50 = vector.extract_strided_slice %1 {offsets = [0, 6], sizes = [2, 1], strides = [1, 1]} : vector<2x8xf32> to vector<2x1xf32>
    %51 = vector.broadcast %50 : vector<2x1xf32> to vector<2x128xf32>
    %52 = vector.broadcast %4 : vector<1x128xf32> to vector<2x128xf32>
    %53 = arith.mulf %51, %52 : vector<2x128xf32>
    %54 = vector.broadcast %7 : vector<1x128xf32> to vector<2x128xf32>
    %55 = arith.addf %53, %54 : vector<2x128xf32>
    %56 = vector.extract_strided_slice %1 {offsets = [0, 7], sizes = [2, 1], strides = [1, 1]} : vector<2x8xf32> to vector<2x1xf32>
    %57 = vector.broadcast %56 : vector<2x1xf32> to vector<2x128xf32>
    %58 = vector.broadcast %4 : vector<1x128xf32> to vector<2x128xf32>
    %59 = arith.mulf %57, %58 : vector<2x128xf32>
    %60 = vector.broadcast %7 : vector<1x128xf32> to vector<2x128xf32>
    %61 = arith.addf %59, %60 : vector<2x128xf32>
    %cst_20 = arith.constant 0.000000e+00 : f32
    %62 = vector.broadcast %cst_20 : f32 to vector<2x32xf32>
    %cst_21 = arith.constant 0.000000e+00 : f32
    %63 = vector.broadcast %cst_21 : f32 to vector<2x32xf32>
    %64 = vector.broadcast %3 : vector<1x32xf32> to vector<2x32xf32>
    %65 = arith.addf %64, %63 : vector<2x32xf32>
    %cst_22 = arith.constant 0.000000e+00 : f32
    %66 = vector.broadcast %cst_22 : f32 to vector<2x128xf32>
    %67 = vector.shape_cast %65 : vector<2x32xf32> to vector<2x1x32xf32>
    %68 = vector.broadcast %67 : vector<2x1x32xf32> to vector<2x8x32xf32>
    %69 = arith.addf %11, %68 : vector<2x8x32xf32>
    %70 = math.tanh %69 : vector<2x8x32xf32>
    %71 = vector.broadcast %13 : vector<1x1x32xf32> to vector<2x8x32xf32>
    %72 = arith.mulf %70, %71 : vector<2x8x32xf32>
    %cst_23 = arith.constant dense<0.000000e+00> : vector<2x8xf32>
    %73 = vector.multi_reduction <add>, %72, %cst_23 [2] : vector<2x8x32xf32> to vector<2x8xf32>
    %cst_24 = arith.constant dense<0xFF800000> : vector<2xf32>
    %74 = vector.multi_reduction <maximumf>, %73, %cst_24 [1] : vector<2x8xf32> to vector<2xf32>
    %75 = vector.shape_cast %74 : vector<2xf32> to vector<2x1xf32>
    %76 = vector.broadcast %75 : vector<2x1xf32> to vector<2x8xf32>
    %77 = arith.subf %73, %76 : vector<2x8xf32>
    %78 = math.exp %77 : vector<2x8xf32>
    %cst_25 = arith.constant dense<0.000000e+00> : vector<2xf32>
    %79 = vector.multi_reduction <add>, %78, %cst_25 [1] : vector<2x8xf32> to vector<2xf32>
    %80 = vector.shape_cast %79 : vector<2xf32> to vector<2x1xf32>
    %81 = tpu.reciprocal %80 {approx = true} : vector<2x1xf32> -> vector<2x1xf32>
    %82 = arith.mulf %80, %81 : vector<2x1xf32>
    %cst_26 = arith.constant 2.000000e+00 : f32
    %83 = vector.broadcast %cst_26 : f32 to vector<2x1xf32>
    %84 = arith.subf %83, %82 : vector<2x1xf32>
    %85 = arith.mulf %81, %84 : vector<2x1xf32>
    %86 = vector.broadcast %85 : vector<2x1xf32> to vector<2x8xf32>
    %87 = arith.mulf %78, %86 : vector<2x8xf32>
    %88 = vector.shape_cast %87 : vector<2x8xf32> to vector<2x8x1xf32>
    %89 = vector.broadcast %88 : vector<2x8x1xf32> to vector<2x8x32xf32>
    %90 = arith.mulf %89, %0 : vector<2x8x32xf32>
    %cst_27 = arith.constant dense<0.000000e+00> : vector<2x32xf32>
    %91 = vector.multi_reduction <add>, %90, %cst_27 [1] : vector<2x8x32xf32> to vector<2x32xf32>
    %92 = arith.addf %19, %66 : vector<2x128xf32>
    %cst_28 = arith.constant dense<0.000000e+00> : vector<2x128xf32>
    %93 = tpu.matmul %91, %6, %cst_28 {dimension_numbers = #tpu.dot_dimension_numbers<[1], [0], [0], [1], [0, 0, 1, 1], [], []>} : vector<2x32xf32>, vector<32x128xf32>, vector<2x128xf32> -> vector<2x128xf32>
    %94 = arith.addf %92, %93 : vector<2x128xf32>
    %95 = arith.negf %94 : vector<2x128xf32>
    %96 = math.exp %95 : vector<2x128xf32>
    %cst_29 = arith.constant 1.000000e+00 : f32
    %97 = vector.broadcast %cst_29 : f32 to vector<2x128xf32>
    %98 = arith.addf %97, %96 : vector<2x128xf32>
    %99 = arith.divf %97, %98 : vector<2x128xf32>
    %100 = math.tanh %94 : vector<2x128xf32>
    %101 = vector.extract_strided_slice %99 {offsets = [0, 0], sizes = [2, 32], strides = [1, 1]} : vector<2x128xf32> to vector<2x32xf32>
    %102 = vector.extract_strided_slice %99 {offsets = [0, 32], sizes = [2, 32], strides = [1, 1]} : vector<2x128xf32> to vector<2x32xf32>
    %103 = vector.extract_strided_slice %99 {offsets = [0, 96], sizes = [2, 32], strides = [1, 1]} : vector<2x128xf32> to vector<2x32xf32>
    %104 = vector.extract_strided_slice %100 {offsets = [0, 64], sizes = [2, 32], strides = [1, 1]} : vector<2x128xf32> to vector<2x32xf32>
    %105 = arith.mulf %102, %62 : vector<2x32xf32>
    %106 = arith.mulf %101, %104 : vector<2x32xf32>
    %107 = arith.addf %105, %106 : vector<2x32xf32>
    %108 = math.tanh %107 : vector<2x32xf32>
    %109 = arith.mulf %103, %108 : vector<2x32xf32>
    %cst_30 = arith.constant dense<0.000000e+00> : vector<2x160xf32>
    %110 = tpu.matmul %109, %5, %cst_30 {dimension_numbers = #tpu.dot_dimension_numbers<[1], [0], [0], [1], [0, 0, 1, 1], [], []>} : vector<2x32xf32>, vector<32x160xf32>, vector<2x160xf32> -> vector<2x160xf32>
    %111 = vector.extract_strided_slice %110 {offsets = [0, 0], sizes = [2, 128], strides = [1, 1]} : vector<2x160xf32> to vector<2x128xf32>
    %112 = vector.extract_strided_slice %110 {offsets = [0, 128], sizes = [2, 32], strides = [1, 1]} : vector<2x160xf32> to vector<2x32xf32>
    %cst_31 = arith.constant dense<0.000000e+00> : vector<2x32xf32>
    %113 = tpu.matmul %107, %2, %cst_31 {dimension_numbers = #tpu.dot_dimension_numbers<[1], [0], [0], [1], [0, 0, 1, 1], [], []>} : vector<2x32xf32>, vector<32x32xf32>, vector<2x32xf32> -> vector<2x32xf32>
    %114 = arith.addf %112, %113 : vector<2x32xf32>
    %115 = vector.broadcast %3 : vector<1x32xf32> to vector<2x32xf32>
    %116 = arith.addf %114, %115 : vector<2x32xf32>
    %117 = vector.shape_cast %116 : vector<2x32xf32> to vector<2x1x32xf32>
    %118 = vector.broadcast %117 : vector<2x1x32xf32> to vector<2x8x32xf32>
    %119 = arith.addf %11, %118 : vector<2x8x32xf32>
    %120 = math.tanh %119 : vector<2x8x32xf32>
    %121 = vector.broadcast %13 : vector<1x1x32xf32> to vector<2x8x32xf32>
    %122 = arith.mulf %120, %121 : vector<2x8x32xf32>
    %cst_32 = arith.constant dense<0.000000e+00> : vector<2x8xf32>
    %123 = vector.multi_reduction <add>, %122, %cst_32 [2] : vector<2x8x32xf32> to vector<2x8xf32>
    %cst_33 = arith.constant dense<0xFF800000> : vector<2xf32>
    %124 = vector.multi_reduction <maximumf>, %123, %cst_33 [1] : vector<2x8xf32> to vector<2xf32>
    %125 = vector.shape_cast %124 : vector<2xf32> to vector<2x1xf32>
    %126 = vector.broadcast %125 : vector<2x1xf32> to vector<2x8xf32>
    %127 = arith.subf %123, %126 : vector<2x8xf32>
    %128 = math.exp %127 : vector<2x8xf32>
    %cst_34 = arith.constant dense<0.000000e+00> : vector<2xf32>
    %129 = vector.multi_reduction <add>, %128, %cst_34 [1] : vector<2x8xf32> to vector<2xf32>
    %130 = vector.shape_cast %129 : vector<2xf32> to vector<2x1xf32>
    %131 = tpu.reciprocal %130 {approx = true} : vector<2x1xf32> -> vector<2x1xf32>
    %132 = arith.mulf %130, %131 : vector<2x1xf32>
    %cst_35 = arith.constant 2.000000e+00 : f32
    %133 = vector.broadcast %cst_35 : f32 to vector<2x1xf32>
    %134 = arith.subf %133, %132 : vector<2x1xf32>
    %135 = arith.mulf %131, %134 : vector<2x1xf32>
    %136 = vector.broadcast %135 : vector<2x1xf32> to vector<2x8xf32>
    %137 = arith.mulf %128, %136 : vector<2x8xf32>
    %138 = vector.shape_cast %137 : vector<2x8xf32> to vector<2x8x1xf32>
    %139 = vector.broadcast %138 : vector<2x8x1xf32> to vector<2x8x32xf32>
    %140 = arith.mulf %139, %0 : vector<2x8x32xf32>
    %cst_36 = arith.constant dense<0.000000e+00> : vector<2x32xf32>
    %141 = vector.multi_reduction <add>, %140, %cst_36 [1] : vector<2x8x32xf32> to vector<2x32xf32>
    %142 = arith.addf %25, %111 : vector<2x128xf32>
    %cst_37 = arith.constant dense<0.000000e+00> : vector<2x128xf32>
    %143 = tpu.matmul %141, %6, %cst_37 {dimension_numbers = #tpu.dot_dimension_numbers<[1], [0], [0], [1], [0, 0, 1, 1], [], []>} : vector<2x32xf32>, vector<32x128xf32>, vector<2x128xf32> -> vector<2x128xf32>
    %144 = arith.addf %142, %143 : vector<2x128xf32>
    %145 = arith.negf %144 : vector<2x128xf32>
    %146 = math.exp %145 : vector<2x128xf32>
    %cst_38 = arith.constant 1.000000e+00 : f32
    %147 = vector.broadcast %cst_38 : f32 to vector<2x128xf32>
    %148 = arith.addf %147, %146 : vector<2x128xf32>
    %149 = arith.divf %147, %148 : vector<2x128xf32>
    %150 = math.tanh %144 : vector<2x128xf32>
    %151 = vector.extract_strided_slice %149 {offsets = [0, 0], sizes = [2, 32], strides = [1, 1]} : vector<2x128xf32> to vector<2x32xf32>
    %152 = vector.extract_strided_slice %149 {offsets = [0, 32], sizes = [2, 32], strides = [1, 1]} : vector<2x128xf32> to vector<2x32xf32>
    %153 = vector.extract_strided_slice %149 {offsets = [0, 96], sizes = [2, 32], strides = [1, 1]} : vector<2x128xf32> to vector<2x32xf32>
    %154 = vector.extract_strided_slice %150 {offsets = [0, 64], sizes = [2, 32], strides = [1, 1]} : vector<2x128xf32> to vector<2x32xf32>
    %155 = arith.mulf %152, %107 : vector<2x32xf32>
    %156 = arith.mulf %151, %154 : vector<2x32xf32>
    %157 = arith.addf %155, %156 : vector<2x32xf32>
    %158 = math.tanh %157 : vector<2x32xf32>
    %159 = arith.mulf %153, %158 : vector<2x32xf32>
    %cst_39 = arith.constant dense<0.000000e+00> : vector<2x160xf32>
    %160 = tpu.matmul %159, %5, %cst_39 {dimension_numbers = #tpu.dot_dimension_numbers<[1], [0], [0], [1], [0, 0, 1, 1], [], []>} : vector<2x32xf32>, vector<32x160xf32>, vector<2x160xf32> -> vector<2x160xf32>
    %161 = vector.extract_strided_slice %160 {offsets = [0, 0], sizes = [2, 128], strides = [1, 1]} : vector<2x160xf32> to vector<2x128xf32>
    %162 = vector.extract_strided_slice %160 {offsets = [0, 128], sizes = [2, 32], strides = [1, 1]} : vector<2x160xf32> to vector<2x32xf32>
    %cst_40 = arith.constant dense<0.000000e+00> : vector<2x32xf32>
    %163 = tpu.matmul %157, %2, %cst_40 {dimension_numbers = #tpu.dot_dimension_numbers<[1], [0], [0], [1], [0, 0, 1, 1], [], []>} : vector<2x32xf32>, vector<32x32xf32>, vector<2x32xf32> -> vector<2x32xf32>
    %164 = arith.addf %162, %163 : vector<2x32xf32>
    %165 = vector.broadcast %3 : vector<1x32xf32> to vector<2x32xf32>
    %166 = arith.addf %164, %165 : vector<2x32xf32>
    %167 = vector.shape_cast %166 : vector<2x32xf32> to vector<2x1x32xf32>
    %168 = vector.broadcast %167 : vector<2x1x32xf32> to vector<2x8x32xf32>
    %169 = arith.addf %11, %168 : vector<2x8x32xf32>
    %170 = math.tanh %169 : vector<2x8x32xf32>
    %171 = vector.broadcast %13 : vector<1x1x32xf32> to vector<2x8x32xf32>
    %172 = arith.mulf %170, %171 : vector<2x8x32xf32>
    %cst_41 = arith.constant dense<0.000000e+00> : vector<2x8xf32>
    %173 = vector.multi_reduction <add>, %172, %cst_41 [2] : vector<2x8x32xf32> to vector<2x8xf32>
    %cst_42 = arith.constant dense<0xFF800000> : vector<2xf32>
    %174 = vector.multi_reduction <maximumf>, %173, %cst_42 [1] : vector<2x8xf32> to vector<2xf32>
    %175 = vector.shape_cast %174 : vector<2xf32> to vector<2x1xf32>
    %176 = vector.broadcast %175 : vector<2x1xf32> to vector<2x8xf32>
    %177 = arith.subf %173, %176 : vector<2x8xf32>
    %178 = math.exp %177 : vector<2x8xf32>
    %cst_43 = arith.constant dense<0.000000e+00> : vector<2xf32>
    %179 = vector.multi_reduction <add>, %178, %cst_43 [1] : vector<2x8xf32> to vector<2xf32>
    %180 = vector.shape_cast %179 : vector<2xf32> to vector<2x1xf32>
    %181 = tpu.reciprocal %180 {approx = true} : vector<2x1xf32> -> vector<2x1xf32>
    %182 = arith.mulf %180, %181 : vector<2x1xf32>
    %cst_44 = arith.constant 2.000000e+00 : f32
    %183 = vector.broadcast %cst_44 : f32 to vector<2x1xf32>
    %184 = arith.subf %183, %182 : vector<2x1xf32>
    %185 = arith.mulf %181, %184 : vector<2x1xf32>
    %186 = vector.broadcast %185 : vector<2x1xf32> to vector<2x8xf32>
    %187 = arith.mulf %178, %186 : vector<2x8xf32>
    %188 = vector.shape_cast %187 : vector<2x8xf32> to vector<2x8x1xf32>
    %189 = vector.broadcast %188 : vector<2x8x1xf32> to vector<2x8x32xf32>
    %190 = arith.mulf %189, %0 : vector<2x8x32xf32>
    %cst_45 = arith.constant dense<0.000000e+00> : vector<2x32xf32>
    %191 = vector.multi_reduction <add>, %190, %cst_45 [1] : vector<2x8x32xf32> to vector<2x32xf32>
    %192 = arith.addf %31, %161 : vector<2x128xf32>
    %cst_46 = arith.constant dense<0.000000e+00> : vector<2x128xf32>
    %193 = tpu.matmul %191, %6, %cst_46 {dimension_numbers = #tpu.dot_dimension_numbers<[1], [0], [0], [1], [0, 0, 1, 1], [], []>} : vector<2x32xf32>, vector<32x128xf32>, vector<2x128xf32> -> vector<2x128xf32>
    %194 = arith.addf %192, %193 : vector<2x128xf32>
    %195 = arith.negf %194 : vector<2x128xf32>
    %196 = math.exp %195 : vector<2x128xf32>
    %cst_47 = arith.constant 1.000000e+00 : f32
    %197 = vector.broadcast %cst_47 : f32 to vector<2x128xf32>
    %198 = arith.addf %197, %196 : vector<2x128xf32>
    %199 = arith.divf %197, %198 : vector<2x128xf32>
    %200 = math.tanh %194 : vector<2x128xf32>
    %201 = vector.extract_strided_slice %199 {offsets = [0, 0], sizes = [2, 32], strides = [1, 1]} : vector<2x128xf32> to vector<2x32xf32>
    %202 = vector.extract_strided_slice %199 {offsets = [0, 32], sizes = [2, 32], strides = [1, 1]} : vector<2x128xf32> to vector<2x32xf32>
    %203 = vector.extract_strided_slice %199 {offsets = [0, 96], sizes = [2, 32], strides = [1, 1]} : vector<2x128xf32> to vector<2x32xf32>
    %204 = vector.extract_strided_slice %200 {offsets = [0, 64], sizes = [2, 32], strides = [1, 1]} : vector<2x128xf32> to vector<2x32xf32>
    %205 = arith.mulf %202, %157 : vector<2x32xf32>
    %206 = arith.mulf %201, %204 : vector<2x32xf32>
    %207 = arith.addf %205, %206 : vector<2x32xf32>
    %208 = math.tanh %207 : vector<2x32xf32>
    %209 = arith.mulf %203, %208 : vector<2x32xf32>
    %cst_48 = arith.constant dense<0.000000e+00> : vector<2x160xf32>
    %210 = tpu.matmul %209, %5, %cst_48 {dimension_numbers = #tpu.dot_dimension_numbers<[1], [0], [0], [1], [0, 0, 1, 1], [], []>} : vector<2x32xf32>, vector<32x160xf32>, vector<2x160xf32> -> vector<2x160xf32>
    %211 = vector.extract_strided_slice %210 {offsets = [0, 0], sizes = [2, 128], strides = [1, 1]} : vector<2x160xf32> to vector<2x128xf32>
    %212 = vector.extract_strided_slice %210 {offsets = [0, 128], sizes = [2, 32], strides = [1, 1]} : vector<2x160xf32> to vector<2x32xf32>
    %cst_49 = arith.constant dense<0.000000e+00> : vector<2x32xf32>
    %213 = tpu.matmul %207, %2, %cst_49 {dimension_numbers = #tpu.dot_dimension_numbers<[1], [0], [0], [1], [0, 0, 1, 1], [], []>} : vector<2x32xf32>, vector<32x32xf32>, vector<2x32xf32> -> vector<2x32xf32>
    %214 = arith.addf %212, %213 : vector<2x32xf32>
    %215 = vector.broadcast %3 : vector<1x32xf32> to vector<2x32xf32>
    %216 = arith.addf %214, %215 : vector<2x32xf32>
    %217 = vector.shape_cast %216 : vector<2x32xf32> to vector<2x1x32xf32>
    %218 = vector.broadcast %217 : vector<2x1x32xf32> to vector<2x8x32xf32>
    %219 = arith.addf %11, %218 : vector<2x8x32xf32>
    %220 = math.tanh %219 : vector<2x8x32xf32>
    %221 = vector.broadcast %13 : vector<1x1x32xf32> to vector<2x8x32xf32>
    %222 = arith.mulf %220, %221 : vector<2x8x32xf32>
    %cst_50 = arith.constant dense<0.000000e+00> : vector<2x8xf32>
    %223 = vector.multi_reduction <add>, %222, %cst_50 [2] : vector<2x8x32xf32> to vector<2x8xf32>
    %cst_51 = arith.constant dense<0xFF800000> : vector<2xf32>
    %224 = vector.multi_reduction <maximumf>, %223, %cst_51 [1] : vector<2x8xf32> to vector<2xf32>
    %225 = vector.shape_cast %224 : vector<2xf32> to vector<2x1xf32>
    %226 = vector.broadcast %225 : vector<2x1xf32> to vector<2x8xf32>
    %227 = arith.subf %223, %226 : vector<2x8xf32>
    %228 = math.exp %227 : vector<2x8xf32>
    %cst_52 = arith.constant dense<0.000000e+00> : vector<2xf32>
    %229 = vector.multi_reduction <add>, %228, %cst_52 [1] : vector<2x8xf32> to vector<2xf32>
    %230 = vector.shape_cast %229 : vector<2xf32> to vector<2x1xf32>
    %231 = tpu.reciprocal %230 {approx = true} : vector<2x1xf32> -> vector<2x1xf32>
    %232 = arith.mulf %230, %231 : vector<2x1xf32>
    %cst_53 = arith.constant 2.000000e+00 : f32
    %233 = vector.broadcast %cst_53 : f32 to vector<2x1xf32>
    %234 = arith.subf %233, %232 : vector<2x1xf32>
    %235 = arith.mulf %231, %234 : vector<2x1xf32>
    %236 = vector.broadcast %235 : vector<2x1xf32> to vector<2x8xf32>
    %237 = arith.mulf %228, %236 : vector<2x8xf32>
    %238 = vector.shape_cast %237 : vector<2x8xf32> to vector<2x8x1xf32>
    %239 = vector.broadcast %238 : vector<2x8x1xf32> to vector<2x8x32xf32>
    %240 = arith.mulf %239, %0 : vector<2x8x32xf32>
    %cst_54 = arith.constant dense<0.000000e+00> : vector<2x32xf32>
    %241 = vector.multi_reduction <add>, %240, %cst_54 [1] : vector<2x8x32xf32> to vector<2x32xf32>
    %242 = arith.addf %37, %211 : vector<2x128xf32>
    %cst_55 = arith.constant dense<0.000000e+00> : vector<2x128xf32>
    %243 = tpu.matmul %241, %6, %cst_55 {dimension_numbers = #tpu.dot_dimension_numbers<[1], [0], [0], [1], [0, 0, 1, 1], [], []>} : vector<2x32xf32>, vector<32x128xf32>, vector<2x128xf32> -> vector<2x128xf32>
    %244 = arith.addf %242, %243 : vector<2x128xf32>
    %245 = arith.negf %244 : vector<2x128xf32>
    %246 = math.exp %245 : vector<2x128xf32>
    %cst_56 = arith.constant 1.000000e+00 : f32
    %247 = vector.broadcast %cst_56 : f32 to vector<2x128xf32>
    %248 = arith.addf %247, %246 : vector<2x128xf32>
    %249 = arith.divf %247, %248 : vector<2x128xf32>
    %250 = math.tanh %244 : vector<2x128xf32>
    %251 = vector.extract_strided_slice %249 {offsets = [0, 0], sizes = [2, 32], strides = [1, 1]} : vector<2x128xf32> to vector<2x32xf32>
    %252 = vector.extract_strided_slice %249 {offsets = [0, 32], sizes = [2, 32], strides = [1, 1]} : vector<2x128xf32> to vector<2x32xf32>
    %253 = vector.extract_strided_slice %249 {offsets = [0, 96], sizes = [2, 32], strides = [1, 1]} : vector<2x128xf32> to vector<2x32xf32>
    %254 = vector.extract_strided_slice %250 {offsets = [0, 64], sizes = [2, 32], strides = [1, 1]} : vector<2x128xf32> to vector<2x32xf32>
    %255 = arith.mulf %252, %207 : vector<2x32xf32>
    %256 = arith.mulf %251, %254 : vector<2x32xf32>
    %257 = arith.addf %255, %256 : vector<2x32xf32>
    %258 = math.tanh %257 : vector<2x32xf32>
    %259 = arith.mulf %253, %258 : vector<2x32xf32>
    %cst_57 = arith.constant dense<0.000000e+00> : vector<2x160xf32>
    %260 = tpu.matmul %259, %5, %cst_57 {dimension_numbers = #tpu.dot_dimension_numbers<[1], [0], [0], [1], [0, 0, 1, 1], [], []>} : vector<2x32xf32>, vector<32x160xf32>, vector<2x160xf32> -> vector<2x160xf32>
    %261 = vector.extract_strided_slice %260 {offsets = [0, 0], sizes = [2, 128], strides = [1, 1]} : vector<2x160xf32> to vector<2x128xf32>
    %262 = vector.extract_strided_slice %260 {offsets = [0, 128], sizes = [2, 32], strides = [1, 1]} : vector<2x160xf32> to vector<2x32xf32>
    %cst_58 = arith.constant dense<0.000000e+00> : vector<2x32xf32>
    %263 = tpu.matmul %257, %2, %cst_58 {dimension_numbers = #tpu.dot_dimension_numbers<[1], [0], [0], [1], [0, 0, 1, 1], [], []>} : vector<2x32xf32>, vector<32x32xf32>, vector<2x32xf32> -> vector<2x32xf32>
    %264 = arith.addf %262, %263 : vector<2x32xf32>
    %265 = vector.broadcast %3 : vector<1x32xf32> to vector<2x32xf32>
    %266 = arith.addf %264, %265 : vector<2x32xf32>
    %267 = vector.shape_cast %266 : vector<2x32xf32> to vector<2x1x32xf32>
    %268 = vector.broadcast %267 : vector<2x1x32xf32> to vector<2x8x32xf32>
    %269 = arith.addf %11, %268 : vector<2x8x32xf32>
    %270 = math.tanh %269 : vector<2x8x32xf32>
    %271 = vector.broadcast %13 : vector<1x1x32xf32> to vector<2x8x32xf32>
    %272 = arith.mulf %270, %271 : vector<2x8x32xf32>
    %cst_59 = arith.constant dense<0.000000e+00> : vector<2x8xf32>
    %273 = vector.multi_reduction <add>, %272, %cst_59 [2] : vector<2x8x32xf32> to vector<2x8xf32>
    %cst_60 = arith.constant dense<0xFF800000> : vector<2xf32>
    %274 = vector.multi_reduction <maximumf>, %273, %cst_60 [1] : vector<2x8xf32> to vector<2xf32>
    %275 = vector.shape_cast %274 : vector<2xf32> to vector<2x1xf32>
    %276 = vector.broadcast %275 : vector<2x1xf32> to vector<2x8xf32>
    %277 = arith.subf %273, %276 : vector<2x8xf32>
    %278 = math.exp %277 : vector<2x8xf32>
    %cst_61 = arith.constant dense<0.000000e+00> : vector<2xf32>
    %279 = vector.multi_reduction <add>, %278, %cst_61 [1] : vector<2x8xf32> to vector<2xf32>
    %280 = vector.shape_cast %279 : vector<2xf32> to vector<2x1xf32>
    %281 = tpu.reciprocal %280 {approx = true} : vector<2x1xf32> -> vector<2x1xf32>
    %282 = arith.mulf %280, %281 : vector<2x1xf32>
    %cst_62 = arith.constant 2.000000e+00 : f32
    %283 = vector.broadcast %cst_62 : f32 to vector<2x1xf32>
    %284 = arith.subf %283, %282 : vector<2x1xf32>
    %285 = arith.mulf %281, %284 : vector<2x1xf32>
    %286 = vector.broadcast %285 : vector<2x1xf32> to vector<2x8xf32>
    %287 = arith.mulf %278, %286 : vector<2x8xf32>
    %288 = vector.shape_cast %287 : vector<2x8xf32> to vector<2x8x1xf32>
    %289 = vector.broadcast %288 : vector<2x8x1xf32> to vector<2x8x32xf32>
    %290 = arith.mulf %289, %0 : vector<2x8x32xf32>
    %cst_63 = arith.constant dense<0.000000e+00> : vector<2x32xf32>
    %291 = vector.multi_reduction <add>, %290, %cst_63 [1] : vector<2x8x32xf32> to vector<2x32xf32>
    %292 = arith.addf %43, %261 : vector<2x128xf32>
    %cst_64 = arith.constant dense<0.000000e+00> : vector<2x128xf32>
    %293 = tpu.matmul %291, %6, %cst_64 {dimension_numbers = #tpu.dot_dimension_numbers<[1], [0], [0], [1], [0, 0, 1, 1], [], []>} : vector<2x32xf32>, vector<32x128xf32>, vector<2x128xf32> -> vector<2x128xf32>
    %294 = arith.addf %292, %293 : vector<2x128xf32>
    %295 = arith.negf %294 : vector<2x128xf32>
    %296 = math.exp %295 : vector<2x128xf32>
    %cst_65 = arith.constant 1.000000e+00 : f32
    %297 = vector.broadcast %cst_65 : f32 to vector<2x128xf32>
    %298 = arith.addf %297, %296 : vector<2x128xf32>
    %299 = arith.divf %297, %298 : vector<2x128xf32>
    %300 = math.tanh %294 : vector<2x128xf32>
    %301 = vector.extract_strided_slice %299 {offsets = [0, 0], sizes = [2, 32], strides = [1, 1]} : vector<2x128xf32> to vector<2x32xf32>
    %302 = vector.extract_strided_slice %299 {offsets = [0, 32], sizes = [2, 32], strides = [1, 1]} : vector<2x128xf32> to vector<2x32xf32>
    %303 = vector.extract_strided_slice %299 {offsets = [0, 96], sizes = [2, 32], strides = [1, 1]} : vector<2x128xf32> to vector<2x32xf32>
    %304 = vector.extract_strided_slice %300 {offsets = [0, 64], sizes = [2, 32], strides = [1, 1]} : vector<2x128xf32> to vector<2x32xf32>
    %305 = arith.mulf %302, %257 : vector<2x32xf32>
    %306 = arith.mulf %301, %304 : vector<2x32xf32>
    %307 = arith.addf %305, %306 : vector<2x32xf32>
    %308 = math.tanh %307 : vector<2x32xf32>
    %309 = arith.mulf %303, %308 : vector<2x32xf32>
    %cst_66 = arith.constant dense<0.000000e+00> : vector<2x160xf32>
    %310 = tpu.matmul %309, %5, %cst_66 {dimension_numbers = #tpu.dot_dimension_numbers<[1], [0], [0], [1], [0, 0, 1, 1], [], []>} : vector<2x32xf32>, vector<32x160xf32>, vector<2x160xf32> -> vector<2x160xf32>
    %311 = vector.extract_strided_slice %310 {offsets = [0, 0], sizes = [2, 128], strides = [1, 1]} : vector<2x160xf32> to vector<2x128xf32>
    %312 = vector.extract_strided_slice %310 {offsets = [0, 128], sizes = [2, 32], strides = [1, 1]} : vector<2x160xf32> to vector<2x32xf32>
    %cst_67 = arith.constant dense<0.000000e+00> : vector<2x32xf32>
    %313 = tpu.matmul %307, %2, %cst_67 {dimension_numbers = #tpu.dot_dimension_numbers<[1], [0], [0], [1], [0, 0, 1, 1], [], []>} : vector<2x32xf32>, vector<32x32xf32>, vector<2x32xf32> -> vector<2x32xf32>
    %314 = arith.addf %312, %313 : vector<2x32xf32>
    %315 = vector.broadcast %3 : vector<1x32xf32> to vector<2x32xf32>
    %316 = arith.addf %314, %315 : vector<2x32xf32>
    %317 = vector.shape_cast %316 : vector<2x32xf32> to vector<2x1x32xf32>
    %318 = vector.broadcast %317 : vector<2x1x32xf32> to vector<2x8x32xf32>
    %319 = arith.addf %11, %318 : vector<2x8x32xf32>
    %320 = math.tanh %319 : vector<2x8x32xf32>
    %321 = vector.broadcast %13 : vector<1x1x32xf32> to vector<2x8x32xf32>
    %322 = arith.mulf %320, %321 : vector<2x8x32xf32>
    %cst_68 = arith.constant dense<0.000000e+00> : vector<2x8xf32>
    %323 = vector.multi_reduction <add>, %322, %cst_68 [2] : vector<2x8x32xf32> to vector<2x8xf32>
    %cst_69 = arith.constant dense<0xFF800000> : vector<2xf32>
    %324 = vector.multi_reduction <maximumf>, %323, %cst_69 [1] : vector<2x8xf32> to vector<2xf32>
    %325 = vector.shape_cast %324 : vector<2xf32> to vector<2x1xf32>
    %326 = vector.broadcast %325 : vector<2x1xf32> to vector<2x8xf32>
    %327 = arith.subf %323, %326 : vector<2x8xf32>
    %328 = math.exp %327 : vector<2x8xf32>
    %cst_70 = arith.constant dense<0.000000e+00> : vector<2xf32>
    %329 = vector.multi_reduction <add>, %328, %cst_70 [1] : vector<2x8xf32> to vector<2xf32>
    %330 = vector.shape_cast %329 : vector<2xf32> to vector<2x1xf32>
    %331 = tpu.reciprocal %330 {approx = true} : vector<2x1xf32> -> vector<2x1xf32>
    %332 = arith.mulf %330, %331 : vector<2x1xf32>
    %cst_71 = arith.constant 2.000000e+00 : f32
    %333 = vector.broadcast %cst_71 : f32 to vector<2x1xf32>
    %334 = arith.subf %333, %332 : vector<2x1xf32>
    %335 = arith.mulf %331, %334 : vector<2x1xf32>
    %336 = vector.broadcast %335 : vector<2x1xf32> to vector<2x8xf32>
    %337 = arith.mulf %328, %336 : vector<2x8xf32>
    %338 = vector.shape_cast %337 : vector<2x8xf32> to vector<2x8x1xf32>
    %339 = vector.broadcast %338 : vector<2x8x1xf32> to vector<2x8x32xf32>
    %340 = arith.mulf %339, %0 : vector<2x8x32xf32>
    %cst_72 = arith.constant dense<0.000000e+00> : vector<2x32xf32>
    %341 = vector.multi_reduction <add>, %340, %cst_72 [1] : vector<2x8x32xf32> to vector<2x32xf32>
    %342 = arith.addf %49, %311 : vector<2x128xf32>
    %cst_73 = arith.constant dense<0.000000e+00> : vector<2x128xf32>
    %343 = tpu.matmul %341, %6, %cst_73 {dimension_numbers = #tpu.dot_dimension_numbers<[1], [0], [0], [1], [0, 0, 1, 1], [], []>} : vector<2x32xf32>, vector<32x128xf32>, vector<2x128xf32> -> vector<2x128xf32>
    %344 = arith.addf %342, %343 : vector<2x128xf32>
    %345 = arith.negf %344 : vector<2x128xf32>
    %346 = math.exp %345 : vector<2x128xf32>
    %cst_74 = arith.constant 1.000000e+00 : f32
    %347 = vector.broadcast %cst_74 : f32 to vector<2x128xf32>
    %348 = arith.addf %347, %346 : vector<2x128xf32>
    %349 = arith.divf %347, %348 : vector<2x128xf32>
    %350 = math.tanh %344 : vector<2x128xf32>
    %351 = vector.extract_strided_slice %349 {offsets = [0, 0], sizes = [2, 32], strides = [1, 1]} : vector<2x128xf32> to vector<2x32xf32>
    %352 = vector.extract_strided_slice %349 {offsets = [0, 32], sizes = [2, 32], strides = [1, 1]} : vector<2x128xf32> to vector<2x32xf32>
    %353 = vector.extract_strided_slice %349 {offsets = [0, 96], sizes = [2, 32], strides = [1, 1]} : vector<2x128xf32> to vector<2x32xf32>
    %354 = vector.extract_strided_slice %350 {offsets = [0, 64], sizes = [2, 32], strides = [1, 1]} : vector<2x128xf32> to vector<2x32xf32>
    %355 = arith.mulf %352, %307 : vector<2x32xf32>
    %356 = arith.mulf %351, %354 : vector<2x32xf32>
    %357 = arith.addf %355, %356 : vector<2x32xf32>
    %358 = math.tanh %357 : vector<2x32xf32>
    %359 = arith.mulf %353, %358 : vector<2x32xf32>
    %cst_75 = arith.constant dense<0.000000e+00> : vector<2x160xf32>
    %360 = tpu.matmul %359, %5, %cst_75 {dimension_numbers = #tpu.dot_dimension_numbers<[1], [0], [0], [1], [0, 0, 1, 1], [], []>} : vector<2x32xf32>, vector<32x160xf32>, vector<2x160xf32> -> vector<2x160xf32>
    %361 = vector.extract_strided_slice %360 {offsets = [0, 0], sizes = [2, 128], strides = [1, 1]} : vector<2x160xf32> to vector<2x128xf32>
    %362 = vector.extract_strided_slice %360 {offsets = [0, 128], sizes = [2, 32], strides = [1, 1]} : vector<2x160xf32> to vector<2x32xf32>
    %cst_76 = arith.constant dense<0.000000e+00> : vector<2x32xf32>
    %363 = tpu.matmul %357, %2, %cst_76 {dimension_numbers = #tpu.dot_dimension_numbers<[1], [0], [0], [1], [0, 0, 1, 1], [], []>} : vector<2x32xf32>, vector<32x32xf32>, vector<2x32xf32> -> vector<2x32xf32>
    %364 = arith.addf %362, %363 : vector<2x32xf32>
    %365 = vector.broadcast %3 : vector<1x32xf32> to vector<2x32xf32>
    %366 = arith.addf %364, %365 : vector<2x32xf32>
    %367 = vector.shape_cast %366 : vector<2x32xf32> to vector<2x1x32xf32>
    %368 = vector.broadcast %367 : vector<2x1x32xf32> to vector<2x8x32xf32>
    %369 = arith.addf %11, %368 : vector<2x8x32xf32>
    %370 = math.tanh %369 : vector<2x8x32xf32>
    %371 = vector.broadcast %13 : vector<1x1x32xf32> to vector<2x8x32xf32>
    %372 = arith.mulf %370, %371 : vector<2x8x32xf32>
    %cst_77 = arith.constant dense<0.000000e+00> : vector<2x8xf32>
    %373 = vector.multi_reduction <add>, %372, %cst_77 [2] : vector<2x8x32xf32> to vector<2x8xf32>
    %cst_78 = arith.constant dense<0xFF800000> : vector<2xf32>
    %374 = vector.multi_reduction <maximumf>, %373, %cst_78 [1] : vector<2x8xf32> to vector<2xf32>
    %375 = vector.shape_cast %374 : vector<2xf32> to vector<2x1xf32>
    %376 = vector.broadcast %375 : vector<2x1xf32> to vector<2x8xf32>
    %377 = arith.subf %373, %376 : vector<2x8xf32>
    %378 = math.exp %377 : vector<2x8xf32>
    %cst_79 = arith.constant dense<0.000000e+00> : vector<2xf32>
    %379 = vector.multi_reduction <add>, %378, %cst_79 [1] : vector<2x8xf32> to vector<2xf32>
    %380 = vector.shape_cast %379 : vector<2xf32> to vector<2x1xf32>
    %381 = tpu.reciprocal %380 {approx = true} : vector<2x1xf32> -> vector<2x1xf32>
    %382 = arith.mulf %380, %381 : vector<2x1xf32>
    %cst_80 = arith.constant 2.000000e+00 : f32
    %383 = vector.broadcast %cst_80 : f32 to vector<2x1xf32>
    %384 = arith.subf %383, %382 : vector<2x1xf32>
    %385 = arith.mulf %381, %384 : vector<2x1xf32>
    %386 = vector.broadcast %385 : vector<2x1xf32> to vector<2x8xf32>
    %387 = arith.mulf %378, %386 : vector<2x8xf32>
    %388 = vector.shape_cast %387 : vector<2x8xf32> to vector<2x8x1xf32>
    %389 = vector.broadcast %388 : vector<2x8x1xf32> to vector<2x8x32xf32>
    %390 = arith.mulf %389, %0 : vector<2x8x32xf32>
    %cst_81 = arith.constant dense<0.000000e+00> : vector<2x32xf32>
    %391 = vector.multi_reduction <add>, %390, %cst_81 [1] : vector<2x8x32xf32> to vector<2x32xf32>
    %392 = arith.addf %55, %361 : vector<2x128xf32>
    %cst_82 = arith.constant dense<0.000000e+00> : vector<2x128xf32>
    %393 = tpu.matmul %391, %6, %cst_82 {dimension_numbers = #tpu.dot_dimension_numbers<[1], [0], [0], [1], [0, 0, 1, 1], [], []>} : vector<2x32xf32>, vector<32x128xf32>, vector<2x128xf32> -> vector<2x128xf32>
    %394 = arith.addf %392, %393 : vector<2x128xf32>
    %395 = arith.negf %394 : vector<2x128xf32>
    %396 = math.exp %395 : vector<2x128xf32>
    %cst_83 = arith.constant 1.000000e+00 : f32
    %397 = vector.broadcast %cst_83 : f32 to vector<2x128xf32>
    %398 = arith.addf %397, %396 : vector<2x128xf32>
    %399 = arith.divf %397, %398 : vector<2x128xf32>
    %400 = math.tanh %394 : vector<2x128xf32>
    %401 = vector.extract_strided_slice %399 {offsets = [0, 0], sizes = [2, 32], strides = [1, 1]} : vector<2x128xf32> to vector<2x32xf32>
    %402 = vector.extract_strided_slice %399 {offsets = [0, 32], sizes = [2, 32], strides = [1, 1]} : vector<2x128xf32> to vector<2x32xf32>
    %403 = vector.extract_strided_slice %399 {offsets = [0, 96], sizes = [2, 32], strides = [1, 1]} : vector<2x128xf32> to vector<2x32xf32>
    %404 = vector.extract_strided_slice %400 {offsets = [0, 64], sizes = [2, 32], strides = [1, 1]} : vector<2x128xf32> to vector<2x32xf32>
    %405 = arith.mulf %402, %357 : vector<2x32xf32>
    %406 = arith.mulf %401, %404 : vector<2x32xf32>
    %407 = arith.addf %405, %406 : vector<2x32xf32>
    %408 = math.tanh %407 : vector<2x32xf32>
    %409 = arith.mulf %403, %408 : vector<2x32xf32>
    %cst_84 = arith.constant dense<0.000000e+00> : vector<2x160xf32>
    %410 = tpu.matmul %409, %5, %cst_84 {dimension_numbers = #tpu.dot_dimension_numbers<[1], [0], [0], [1], [0, 0, 1, 1], [], []>} : vector<2x32xf32>, vector<32x160xf32>, vector<2x160xf32> -> vector<2x160xf32>
    %411 = vector.extract_strided_slice %410 {offsets = [0, 0], sizes = [2, 128], strides = [1, 1]} : vector<2x160xf32> to vector<2x128xf32>
    %412 = vector.extract_strided_slice %410 {offsets = [0, 128], sizes = [2, 32], strides = [1, 1]} : vector<2x160xf32> to vector<2x32xf32>
    %cst_85 = arith.constant dense<0.000000e+00> : vector<2x32xf32>
    %413 = tpu.matmul %407, %2, %cst_85 {dimension_numbers = #tpu.dot_dimension_numbers<[1], [0], [0], [1], [0, 0, 1, 1], [], []>} : vector<2x32xf32>, vector<32x32xf32>, vector<2x32xf32> -> vector<2x32xf32>
    %414 = arith.addf %412, %413 : vector<2x32xf32>
    %415 = vector.broadcast %3 : vector<1x32xf32> to vector<2x32xf32>
    %416 = arith.addf %414, %415 : vector<2x32xf32>
    %417 = vector.shape_cast %416 : vector<2x32xf32> to vector<2x1x32xf32>
    %418 = vector.broadcast %417 : vector<2x1x32xf32> to vector<2x8x32xf32>
    %419 = arith.addf %11, %418 : vector<2x8x32xf32>
    %420 = math.tanh %419 : vector<2x8x32xf32>
    %421 = vector.broadcast %13 : vector<1x1x32xf32> to vector<2x8x32xf32>
    %422 = arith.mulf %420, %421 : vector<2x8x32xf32>
    %cst_86 = arith.constant dense<0.000000e+00> : vector<2x8xf32>
    %423 = vector.multi_reduction <add>, %422, %cst_86 [2] : vector<2x8x32xf32> to vector<2x8xf32>
    %cst_87 = arith.constant dense<0xFF800000> : vector<2xf32>
    %424 = vector.multi_reduction <maximumf>, %423, %cst_87 [1] : vector<2x8xf32> to vector<2xf32>
    %425 = vector.shape_cast %424 : vector<2xf32> to vector<2x1xf32>
    %426 = vector.broadcast %425 : vector<2x1xf32> to vector<2x8xf32>
    %427 = arith.subf %423, %426 : vector<2x8xf32>
    %428 = math.exp %427 : vector<2x8xf32>
    %cst_88 = arith.constant dense<0.000000e+00> : vector<2xf32>
    %429 = vector.multi_reduction <add>, %428, %cst_88 [1] : vector<2x8xf32> to vector<2xf32>
    %430 = vector.shape_cast %429 : vector<2xf32> to vector<2x1xf32>
    %431 = tpu.reciprocal %430 {approx = true} : vector<2x1xf32> -> vector<2x1xf32>
    %432 = arith.mulf %430, %431 : vector<2x1xf32>
    %cst_89 = arith.constant 2.000000e+00 : f32
    %433 = vector.broadcast %cst_89 : f32 to vector<2x1xf32>
    %434 = arith.subf %433, %432 : vector<2x1xf32>
    %435 = arith.mulf %431, %434 : vector<2x1xf32>
    %436 = vector.broadcast %435 : vector<2x1xf32> to vector<2x8xf32>
    %437 = arith.mulf %428, %436 : vector<2x8xf32>
    %438 = vector.shape_cast %437 : vector<2x8xf32> to vector<2x8x1xf32>
    %439 = vector.broadcast %438 : vector<2x8x1xf32> to vector<2x8x32xf32>
    %440 = arith.mulf %439, %0 : vector<2x8x32xf32>
    %cst_90 = arith.constant dense<0.000000e+00> : vector<2x32xf32>
    %441 = vector.multi_reduction <add>, %440, %cst_90 [1] : vector<2x8x32xf32> to vector<2x32xf32>
    %442 = arith.addf %61, %411 : vector<2x128xf32>
    %cst_91 = arith.constant dense<0.000000e+00> : vector<2x128xf32>
    %443 = tpu.matmul %441, %6, %cst_91 {dimension_numbers = #tpu.dot_dimension_numbers<[1], [0], [0], [1], [0, 0, 1, 1], [], []>} : vector<2x32xf32>, vector<32x128xf32>, vector<2x128xf32> -> vector<2x128xf32>
    %444 = arith.addf %442, %443 : vector<2x128xf32>
    %445 = arith.negf %444 : vector<2x128xf32>
    %446 = math.exp %445 : vector<2x128xf32>
    %cst_92 = arith.constant 1.000000e+00 : f32
    %447 = vector.broadcast %cst_92 : f32 to vector<2x128xf32>
    %448 = arith.addf %447, %446 : vector<2x128xf32>
    %449 = arith.divf %447, %448 : vector<2x128xf32>
    %450 = math.tanh %444 : vector<2x128xf32>
    %451 = vector.extract_strided_slice %449 {offsets = [0, 0], sizes = [2, 32], strides = [1, 1]} : vector<2x128xf32> to vector<2x32xf32>
    %452 = vector.extract_strided_slice %449 {offsets = [0, 32], sizes = [2, 32], strides = [1, 1]} : vector<2x128xf32> to vector<2x32xf32>
    %453 = vector.extract_strided_slice %449 {offsets = [0, 96], sizes = [2, 32], strides = [1, 1]} : vector<2x128xf32> to vector<2x32xf32>
    %454 = vector.extract_strided_slice %450 {offsets = [0, 64], sizes = [2, 32], strides = [1, 1]} : vector<2x128xf32> to vector<2x32xf32>
    %455 = arith.mulf %452, %407 : vector<2x32xf32>
    %456 = arith.mulf %451, %454 : vector<2x32xf32>
    %457 = arith.addf %455, %456 : vector<2x32xf32>
    %458 = math.tanh %457 : vector<2x32xf32>
    %459 = arith.mulf %453, %458 : vector<2x32xf32>
    %c0_93 = arith.constant 0 : index
    %c0_94 = arith.constant 0 : index
    %460 = vector.load %arg10[%c0_93, %c0_94] : memref<1x32xf32, #tpu.memory_space<vmem>>, vector<1x32xf32>
    %461 = vector.broadcast %460 : vector<1x32xf32> to vector<2x32xf32>
    %462 = arith.mulf %459, %461 : vector<2x32xf32>
    %c0_95 = arith.constant 0 : index
    %c0_96 = arith.constant 0 : index
    %463 = vector.load %arg11[%c0_95, %c0_96] : memref<1x32xf32, #tpu.memory_space<vmem>>, vector<1x32xf32>
    %464 = vector.broadcast %463 : vector<1x32xf32> to vector<2x32xf32>
    %465 = arith.mulf %441, %464 : vector<2x32xf32>
    %466 = arith.addf %462, %465 : vector<2x32xf32>
    %cst_97 = arith.constant dense<0.000000e+00> : vector<2xf32>
    %467 = vector.multi_reduction <add>, %466, %cst_97 [1] : vector<2x32xf32> to vector<2xf32>
    %468 = vector.shape_cast %467 : vector<2xf32> to vector<2x1xf32>
    %c0_98 = arith.constant 0 : index
    %c0_99 = arith.constant 0 : index
    %469 = vector.load %arg12[%c0_98, %c0_99] : memref<1x1xf32, #tpu.memory_space<vmem>>, vector<1x1xf32>
    %470 = vector.broadcast %469 : vector<1x1xf32> to vector<2x1xf32>
    %471 = arith.addf %468, %470 : vector<2x1xf32>
    %c0_100 = arith.constant 0 : index
    %c0_101 = arith.constant 0 : index
    %472 = vector.load %arg13[%c0_100, %c0_101] : memref<2x1xf32, #tpu.memory_space<vmem>>, vector<2x1xf32>
    tpu.vector_store %arg13[%c0_100, %c0_101], %471 {strides = array<i32>} : memref<2x1xf32, #tpu.memory_space<vmem>>, vector<2x1xf32>,
    %473 = tpu.concatenate %109, %159, %209, %259, %309, %359, %409, %459 in 1 : vector<2x32xf32>, vector<2x32xf32>, vector<2x32xf32>, vector<2x32xf32>, vector<2x32xf32>, vector<2x32xf32>, vector<2x32xf32>, vector<2x32xf32> -> vector<2x256xf32>
    %c0_102 = arith.constant 0 : index
    %c0_103 = arith.constant 0 : index
    %474 = vector.load %arg14[%c0_102, %c0_103] : memref<2x256xf32, #tpu.memory_space<vmem>>, vector<2x256xf32>
    tpu.vector_store %arg14[%c0_102, %c0_103], %473 {strides = array<i32>} : memref<2x256xf32, #tpu.memory_space<vmem>>, vector<2x256xf32>,
    %475 = tpu.concatenate %91, %141, %191, %241, %291, %341, %391, %441 in 1 : vector<2x32xf32>, vector<2x32xf32>, vector<2x32xf32>, vector<2x32xf32>, vector<2x32xf32>, vector<2x32xf32>, vector<2x32xf32>, vector<2x32xf32> -> vector<2x256xf32>
    %c0_104 = arith.constant 0 : index
    %c0_105 = arith.constant 0 : index
    %476 = vector.load %arg15[%c0_104, %c0_105] : memref<2x256xf32, #tpu.memory_space<vmem>>, vector<2x256xf32>
    tpu.vector_store %arg15[%c0_104, %c0_105], %475 {strides = array<i32>} : memref<2x256xf32, #tpu.memory_space<vmem>>, vector<2x256xf32>,
    %477 = tpu.concatenate %87, %137, %187, %237, %287, %337, %387, %437 in 1 : vector<2x8xf32>, vector<2x8xf32>, vector<2x8xf32>, vector<2x8xf32>, vector<2x8xf32>, vector<2x8xf32>, vector<2x8xf32>, vector<2x8xf32> -> vector<2x64xf32>
    %c0_106 = arith.constant 0 : index
    %c0_107 = arith.constant 0 : index
    %478 = vector.load %arg16[%c0_106, %c0_107] : memref<2x64xf32, #tpu.memory_space<vmem>>, vector<2x64xf32>
    tpu.vector_store %arg16[%c0_106, %c0_107], %477 {strides = array<i32>} : memref<2x64xf32, #tpu.memory_space<vmem>>, vector<2x64xf32>,
    return
  }
}

</mosaic_0001>

<bundles_post_ra>
// kernel: tpu_custom_call.1
= control target key start
LH: loop header
LB: loop body
LE: loop exit
PB: predicated region body
PF: predicated region fallthrough
CT: control target
= control target key end

     0   :  { %s5301_s0 = inlined_call_operand.hbm [shape: f32[2,8,32], index: 0, kind: input, shape index: {}]   ;;  %s5302_s1 = inlined_call_operand.vmem [shape: f32[2,8], index: 1, kind: input, shape index: {}]   ;;  %s5303_s2 = inlined_call_operand.hbm [shape: f32[32,32], index: 2, kind: input, shape index: {}]   ;;  %s5304_s3 = inlined_call_operand.hbm [shape: f32[32,32], index: 3, kind: input, shape index: {}]   ;;  %s5305_s4 = inlined_call_operand.vmem [shape: f32[1,32], index: 4, kind: input, shape index: {}]   ;;  %s5306_s5 = inlined_call_operand.vmem [shape: f32[1,32], index: 5, kind: input, shape index: {}]   ;;  %s5307_s6 = inlined_call_operand.vmem [shape: f32[1,128], index: 6, kind: input, shape index: {}]   ;;  %s5308_s7 = inlined_call_operand.hbm [shape: f32[32,160], index: 7, kind: input, shape index: {}]   ;;  %s5309_s8 = inlined_call_operand.hbm [shape: f32[32,128], index: 8, kind: input, shape index: {}]   ;;  %s5310_s9 = inlined_call_operand.vmem [shape: f32[1,128], index: 9, kind: input, shape index: {}]   ;;  %s5311_s10 = inlined_call_operand.vmem [shape: f32[1,32], index: 10, kind: input, shape index: {}]   ;;  %s5312_s11 = inlined_call_operand.vmem [shape: f32[1,32], index: 11, kind: input, shape index: {}]   ;;  %s5313_s12 = inlined_call_operand.<no memory space> [shape: f32[1,1], index: 12, kind: input, shape index: {}]   ;;  %s5314_s13 = inlined_call_operand.vmem [shape: f32[2,1], index: 13, kind: output, shape index: {0}]   ;;  %s5315_s14 = inlined_call_operand.hbm [shape: f32[2,256], index: 14, kind: output, shape index: {1}]   ;;  %s5316_s15 = inlined_call_operand.hbm [shape: f32[2,256], index: 15, kind: output, shape index: {2}]   ;;  %s5317_s16 = inlined_call_operand.hbm [shape: f32[2,64], index: 16, kind: output, shape index: {3}]  }
   0x1   :  { %5323 = sst [smem:[#allocation22_spill]] %s5301_s0  ;;  %v22_v0 = vstv %s5313_s12 }
   0x2   :  { %23 = vst [vmem:[#allocation2] sm:$0x1] %v22_v0 }
   0x3   :  { %24 = vsyncpa [#allocation4], 0 }
   0x4   :  { %25 = vsyncpa [#allocation7], 0 }
   0x5   :  { %26 = vsyncpa [#allocation10], 0 }
   0x6   :  { %27 = vsyncpa [#allocation5], 0 }
   0x7   :  { %28 = vsyncpa [#allocation14], 0  ;;  %s4260_s23 = smov [#allocation6]   ;;  %s4261_s25 = smov [#allocation9]  }
   0x8   :  { %s48_s24 = sshll.u32 %s4260_s23, 4  ;;  %s78_s26 = sshll.u32 %s4261_s25, 4  ;;  %s49_s24 = int_to_ptr.vmem [resolvable:$true] %s48_s24  ;;  %s79_s26 = int_to_ptr.vmem [resolvable:$true] %s78_s26 }
   0x9   :  { %s4098_s27 = scalar_lea.vmem %s49_s24, 512  ;;  %p4103_p1 = scmp.lt.s32.totalorder %s49_s24, %s49_s24 }
   0xa   :  { %p4099_p0 = scmp.ne.s32.totalorder %s49_s24, %s4098_s27  ;;  %p4104_p2 = scmp.lt.s32.totalorder %s4098_s27, %s4098_s27 }
   0xc   :  { %p4105_p3 = por %p4104_p2, %p4103_p1 }
   0xe   :  { %p4106_p4 = pnand %p4105_p3, %p4099_p0 }
  0x10   :  { %4109 = shalt.err (!%p4106_p4)
}
  0x11   :  { %s4262_s12 = smov 128   ;;  %s4263_s28 = smov 8  }
  0x12   :  { %54 = dma.hbm_to_vmem [thread:$0]  %s5303_s2, 512, %s49_s24, [#allocation7], %s4262_s12, %s4262_s12, %s4263_s28  }
  0x13   :  { %s4118_s0 = scalar_lea.vmem %s79_s26, 1024  ;;  %p4123_p6 = scmp.lt.s32.totalorder %s79_s26, %s79_s26 }
  0x14   :  { %p4119_p5 = scmp.ne.s32.totalorder %s79_s26, %s4118_s0  ;;  %p4124_p7 = scmp.lt.s32.totalorder %s4118_s0, %s4118_s0 }
  0x16   :  { %p4125_p8 = por %p4124_p7, %p4123_p6 }
  0x18   :  { %p4126_p9 = pnand %p4125_p8, %p4119_p5 }
  0x1a   :  { %4129 = shalt.err (!%p4126_p9)
}
  0x1b   :  { %s4264_s17 = smov 256   ;;  %s4265_s18 = smov 16  }
  0x1c   :  { %84 = dma.hbm_to_vmem [thread:$0]  %s5308_s7, 1024, %s79_s26, [#allocation10], %s4264_s17, %s4264_s17, %s4265_s18  }
  0x1d   :  { %s4266_s21 = smov [#allocation3]   ;;  %s4267_s23 = smov [#allocation8]  }
  0x1e   :  { %s34_s22 = sshll.u32 %s4266_s21, 4  ;;  %s60_s25 = sshll.u32 %s4267_s23, 4  ;;  %s35_s22 = int_to_ptr.vmem [resolvable:$true] %s34_s22  ;;  %s61_s25 = int_to_ptr.vmem [resolvable:$true] %s60_s25 }
  0x1f   :  { %s4138_s2 = scalar_lea.vmem %s35_s22, 256  ;;  %p4143_p11 = scmp.lt.s32.totalorder %s35_s22, %s35_s22 }
  0x20   :  { %p4139_p10 = scmp.ne.s32.totalorder %s35_s22, %s4138_s2  ;;  %p4144_p12 = scmp.lt.s32.totalorder %s4138_s2, %s4138_s2 }
  0x22   :  { %p4145_p13 = por %p4144_p12, %p4143_p11 }
  0x24   :  { %p4146_p0 = pnand %p4145_p13, %p4139_p10 }
  0x26   :  { %4149 = shalt.err (!%p4146_p0)
}
  0x27   :  { %s5324_s29 = sld [smem:[#allocation22_spill]]  ;;  %s4158_s7 = scalar_lea.vmem %s61_s25, 512 }
  0x28   :  { %p4159_p1 = scmp.ne.s32.totalorder %s61_s25, %s4158_s7  ;;  %p4163_p2 = scmp.lt.s32.totalorder %s61_s25, %s61_s25 }
  0x29   :  { %p4164_p3 = scmp.lt.s32.totalorder %s4158_s7, %s4158_s7 }
  0x2b   :  { %p4165_p4 = por %p4164_p3, %p4163_p2 }
  0x2d   :  { %40 = dma.hbm_to_vmem [thread:$0]  %s5324_s29, 256, %s35_s22, [#allocation4], %s4262_s12, %s4262_s12, %s4263_s28  }
  0x2e   :  { %p4166_p5 = pnand %p4165_p4, %p4159_p1 }
  0x30   :  { %4169 = shalt.err (!%p4166_p5)
}
  0x31   :  { %66 = dma.hbm_to_vmem [thread:$0]  %s5304_s3, 512, %s61_s25, [#allocation7], %s4262_s12, %s4262_s12, %s4263_s28  }
  0x32   :  { %s4268_s0 = smov [#allocation11]  }
  0x33   :  { %s90_s17 = sshll.u32 %s4268_s0, 4  ;;  %s91_s17 = int_to_ptr.vmem [resolvable:$true] %s90_s17 }
  0x34   :  { %s4178_s18 = scalar_lea.vmem %s91_s17, 512  ;;  %p4183_p7 = scmp.lt.s32.totalorder %s91_s17, %s91_s17 }
  0x35   :  { %p4179_p6 = scmp.ne.s32.totalorder %s91_s17, %s4178_s18  ;;  %p4184_p8 = scmp.lt.s32.totalorder %s4178_s18, %s4178_s18 }
  0x37   :  { %p4185_p9 = por %p4184_p8, %p4183_p7 }
  0x39   :  { %p4186_p10 = pnand %p4185_p9, %p4179_p6 }
  0x3b   :  { %4189 = shalt.err (!%p4186_p10)
}
  0x3c   :  { %96 = dma.hbm_to_vmem [thread:$0]  %s5309_s8, 512, %s91_s17, [#allocation10], %s4262_s12, %s4262_s12, %s4263_s28  }
  0x3d   :  { %4250 = dma.done.wait [#allocation4], 256  }
  0x3e   :  { %4251 = vsyncadd [#allocation4], 4294967040 }
  0x3f   :  { %4252 = dma.done.wait [#allocation7], 1024  }
  0x40   :  { %4253 = vsyncadd [#allocation7], 4294966272 }
  0x41   :  { %4254 = dma.done.wait [#allocation10], 1536  }
  0x42   :  { %4255 = vsyncadd [#allocation10], 4294965760  ;;  %vm146_vm0 = vcmask 261120   ;;  %v145_v1 = vld [vmem:[#allocation8 + $0x18] sm:$0xff]  ;;  %v144_v2 = vld [vmem:[#allocation8 + $0x10] sm:$0xff]  ;;  %v301_v9 = vlaneseq  ;;  %vm360_vm1 = vcmask 1041409  }
  0x43   :  { %3703 = vmatprep.subr.mxu0 %v145_v1  ;;  %v4401_v3 = vld [vmem:[#allocation3] sm:$0xff]  ;;  %v143_v4 = vld [vmem:[#allocation8 + $0x8] sm:$0xff]  ;;  %v142_v5 = vld [vmem:[#allocation8] sm:$0xff]  ;;  %v4269_v7 = vmov 1966171168   ;;  %vm363_vm2 = vcmask 58368  }
  0x44   :  { %3704 = vmatpush3.msra.mxu0 %v145_v1  ;;  %3711 = vmatprep.mubr.msk.f32.mxu0 %vm146_vm0, %v4401_v3  ;;  %v4405_v6 = vld [vmem:[#allocation3 + $0x8] sm:$0xff]  ;;  %v299_v8 = vunpack.c.l.s4 %v4269_v7  ;;  %v4409_v11 = vshrl.u32 %v301_v9, 7  ;;  %v4417_v13 = vld [vmem:[%s5305_s4] ss:$0 sm:$0xff]  ;;  %v4443_v32 = vand.u32 127, %v301_v9  ;;  %v5318_v40 = vmov 0  }
  0x45   :  { %3705 = vmatprep.subr.mxu0 %v144_v2  ;;  %v4437_v27 = vld [vmem:[%s5306_s5] ss:$0 sm:$0xff]  ;;  %3906 = vset.pattern.permute.xlu0 %v5318_v40  ;;  %v4477_v7 = vld [vmem:[#allocation11 + $0x10] sm:$0xff]  ;;  %vm4272_vm3 = vmmov 0   ;;  %v4486_v9 = vld [vmem:[#allocation11] sm:$0xff]  ;;  %s4273_s27 = smov 64  }
  0x46   :  { %3706 = vmatpush3.msra.mxu0 %v144_v2  ;;  %v300_v10 = vunpack.c.0.s8 %v299_v8  ;;  %v4422_v16 = vsub.s32 0, %v4409_v11  ;;  %v4447_v34 = vsub.s32 %v4443_v32, %v4409_v11  ;;  %3905 = vset.pattern.permute.xlu1 %v5318_v40  ;;  %v4456_v41 = vsub.s32 1, %v4409_v11  ;;  %v4467_v57 = vld [vmem:[%s5302_s1] sm:$0x3]  ;;  %s4274_s29 = smov 32   ;;  %s4275_s7 = smov 96  }
  0x47   :  { %3707 = vmatprep.subr.mxu0 %v143_v4  ;;  %v4480_v8 = vld [vmem:[#allocation11 + $0x8] sm:$0xff]  ;;  %vm3518_vm4 = vcmask 64512   ;;  %vm3520_vm5 = vcmask 130048   ;;  %vm3522_vm6 = vcmask 195584   ;;  %vm3525_vm7 = vcmask 326656  }
  0x48   :  { %3708 = vmatpush3.msra.mxu0 %v143_v4  ;;  %v4412_v12 = vsub.s32 %v300_v10, %v4409_v11  ;;  %v5320_v4 = vmov 0.0   ;;  %vm3527_vm8 = vcmask 392192   ;;  %vm3529_vm9 = vcmask 457728  }
  0x49   :  { %3709 = vmatprep.subr.mxu0 %v142_v5  ;;  %3714 = vmatprep.subr.mxu1 %v5320_v4  ;;  %vm3531_vm10 = vcmask 517120   ;;  %vm3345_vm11 = vcmask 254976   ;;  %vm3374_vm12 = vcmask 523264   ;;  %vm3376_vm13 = vcmask 785408  }
  0x4a   :  { %3710 = vmatpush3.msra.mxu0 %v142_v5  ;;  %v304_v14 = vrot.slane %v4417_v13, %v4412_v12  ;;  %v4473_v5 = vld [vmem:[#allocation11 + $0x18] sm:$0xff]  ;;  %3722 = vmatprep.mubr.msk.f32.mxu1 %vm4272_vm3, %v5320_v4 }
  0x4b   :  { %3712 = vmatmul.mubr.msk.f32.vlgmr.msra.gmra.mxu0 %vm146_vm0, %v4405_v6  ;;  %3715 = vmatpush3.msra.mxu1 %v4473_v5 }
  0x4c   :  { %v305_v15 = vcombine.high %v304_v14, %v304_v14  ;;  %v312_v18 = vrot.slane %v304_v14, %v4412_v12  ;;  %618 = vmatprep.mubr.f32.mxu0 %v5320_v4  ;;  %3716 = vmatprep.subr.mxu1 %v5320_v4 }
  0x4d   :  { %3717 = vmatpush3.msra.mxu1 %v4477_v7 }
  0x4e   :  { %v319_v17 = vrot.slane %v305_v15, %v4412_v12  ;;  %v323_v20 = vrot.slane %v312_v18, %v4422_v16  ;;  %3718 = vmatprep.subr.mxu1 %v5320_v4 }
  0x4f   :  { %3719 = vmatpush3.msra.mxu1 %v4480_v8 }
  0x50   :  { %v327_v19 = vrot.slane %v319_v17, %v4422_v16  ;;  %3720 = vmatprep.subr.mxu1 %v5320_v4 }
  0x51   :  { %3721 = vmatpush3.msra.mxu1 %v4486_v9 }
  0x52   :  { %3725 = vmatprep.subr.mxu1 %v5320_v4 }
 0x10b   :  { %v4428_v21 = vpop.f32.mrf.mxu0 }
 0x10c   :  { %v331_v22 = vadd.f32 %v4428_v21, %v327_v19 }
 0x10d   :  { %v4431_v23 = vpop.f32.mrf.mxu0 }
 0x10e   :  { %v330_v24 = vadd.f32 %v323_v20, %v4431_v23  ;;  %3921 = vtanh.f32 %v331_v22 }
 0x110   :  { %3923 = vtanh.f32 %v330_v24 }
 0x11b   :  { %v3922_v25 = vpop.eup %3921 }
 0x11c   :  { %v341_v30 = vmul.f32 %v3922_v25, %v4437_v27 }
 0x11d   :  { %v3924_v26 = vpop.eup %3923 }
 0x11e   :  { %v340_v28 = vmul.f32 %v3924_v26, %v4437_v27  ;;  %v345_v31 = vsel %vm146_vm0, %v341_v30, 0.0 }
 0x120   :  { %v342_v29 = vsel %vm146_vm0, %v340_v28, 0.0 }
 0x121   :  { %343 = vadd.xlane.f32.xlu0 %v342_v29 }
 0x125   :  { %346 = vadd.xlane.f32.xlu0 %v345_v31 }
 0x1aa   :  { %v344_v33 = vpop.xlane.xlu0 %343 }
 0x1ab   :  { %v355_v36 = vrot.slane %v344_v33, %v4447_v34 }
 0x1ae   :  { %v347_v35 = vpop.xlane.xlu0 %346 }
 0x1af   :  { %v359_v37 = vrot.slane %v347_v35, %v4447_v34 }
 0x1b1   :  { %v361_v38 = vsel %vm360_vm1, %v359_v37, %v355_v36 }
 0x1b2   :  { %v364_v39 = vsel %vm363_vm2, %v361_v38, -inf  ;;  %v4512_v38 = vld [vmem:[%s5307_s6] ss:$0 sm:$0xff] }
 0x1b3   :  { %365 = vmax.xlane.f32.xlu1 %v364_v39 }
 0x23c   :  { %v366_v42 = vpop.xlane.xlu1 %365 }
 0x23d   :  { %v371_v43 = vrot.slane %v366_v42, %v4422_v16  ;;  %v375_v44 = vrot.slane %v366_v42, %v4456_v41 }
 0x23f   :  { %v378_v45 = vsub.f32 %v344_v33, %v371_v43  ;;  %v379_v46 = vsub.f32 %v347_v35, %v375_v44  ;;  %v4518_v43 = vld [vmem:[%s5310_s9] ss:$0 sm:$0xff] }
 0x241   :  { %v380_v47 = vmul.f32 1.442695, %v378_v45  ;;  %v382_v48 = vmul.f32 1.442695, %v379_v46 }
 0x243   :  { %3925 = vpow2.f32 %v380_v47 }
 0x244   :  { %3927 = vpow2.f32 %v382_v48 }
 0x250   :  { %v3926_v49 = vpop.eup %3925 }
 0x251   :  { %v3928_v50 = vpop.eup %3927  ;;  %387 = vperm.xlu1 %3905, %v3926_v49  }
 0x252   :  { %390 = vperm.xlu0 %3906, %v3928_v50  }
 0x2cc   :  { %v388_v51 = vpop.permute.xlu1 %387 }
 0x2cd   :  { %v391_v52 = vpop.permute.xlu0 %390  ;;  %v395_v53 = vrot.slane %v388_v51, %v4447_v34 }
 0x2ce   :  { %v399_v54 = vrot.slane %v391_v52, %v4447_v34 }
 0x2d0   :  { %v400_v55 = vsel %vm360_vm1, %v399_v54, %v395_v53 }
 0x2d1   :  { %v402_v56 = vsel %vm363_vm2, %v400_v55, 0.0  ;;  %v4523_v55 = vld [vmem:[#allocation6 + $0x18] sm:$0xff] }
 0x2d2   :  { %403 = vadd.xlane.f32.xlu1 %v402_v56  ;;  %v4525_v56 = vld [vmem:[#allocation6 + $0x10] sm:$0xff] }
 0x2e3   :  { %231 = vperm.xlu1 %3905, %v4467_v57  }
 0x35b   :  { %v404_v58 = vpop.xlane.xlu1 %403 }
 0x35c   :  { %3929 = vrcp.f32 %v404_v58 }
 0x35f   :  { %v232_v39 = vpop.permute.xlu1 %231 }
 0x360   :  { %v240_v42 = vmul.f32 %v4512_v38, %v232_v39 }
 0x362   :  { %v247_v44 = vadd.f32 %v4518_v43, %v240_v42 }
 0x369   :  { %v3930_v59 = vpop.eup %3929 }
 0x36a   :  { %v406_v60 = vmul.f32 %v3930_v59, %v404_v58  ;;  %v4529_v58 = vld [vmem:[#allocation6 + $0x8] sm:$0xff] }
 0x36c   :  { %v407_v61 = vsub.f32 2.0, %v406_v60 }
 0x36e   :  { %v408_v62 = vmul.f32 %v3930_v59, %v407_v61  ;;  %v4533_v59 = vld [vmem:[#allocation6] sm:$0xff] }
 0x370   :  { %v413_v63 = vrot.slane %v408_v62, %v4422_v16  ;;  %v417_v1 = vrot.slane %v408_v62, %v4456_v41 }
 0x372   :  { %v420_v0 = vmul.f32 %v3926_v49, %v413_v63  ;;  %v421_v2 = vmul.f32 %v3928_v50, %v417_v1  ;;  %v4543_v63 = vld [vmem:[#allocation9 + $0x38] sm:$0xff]  ;;  %v4547_v1 = vld [vmem:[#allocation9 + $0x28] sm:$0xff] }
 0x373   :  { %578 = vmatprep.subr.mxu0 %v4543_v63 }
 0x374   :  { %424 = vperm.xlu0 %3906, %v420_v0   ;;  %v4545_v0 = vld [vmem:[#allocation9 + $0x30] sm:$0xff] }
 0x375   :  { %579 = vmatpush1.msra.mxu0 %v4545_v0 }
 0x376   :  { %580 = vmatprep.subr.mxu0 %v4547_v1 }
 0x378   :  { %429 = vperm.xlu0 %3906, %v421_v2   ;;  %v4550_v2 = vld [vmem:[#allocation9 + $0x20] sm:$0xff] }
 0x379   :  { %581 = vmatpush1.msra.mxu0 %v4550_v2 }
 0x3ef   :  { %v4492_v10 = vpop.permute.xlu0 %424 }
 0x3f0   :  { %v432_v14 = vmul.f32 %v4492_v10, %v4401_v3 }
 0x3f2   :  { %v434_v15 = vsel %vm146_vm0, %v432_v14, 0.0  ;;  %v4554_v14 = vld [vmem:[#allocation9 + $0x18] sm:$0xff] }
 0x3f3   :  { %v435_v17 = vrot.slane %v434_v15, 4  ;;  %v4497_v18 = vpop.permute.xlu0 %429  ;;  %582 = vmatprep.subr.mxu0 %v4554_v14 }
 0x3f4   :  { %v433_v19 = vmul.f32 %v4497_v18, %v4405_v6 }
 0x3f5   :  { %v436_v20 = vadd.f32 %v435_v17, %v434_v15  ;;  %v4557_v15 = vld [vmem:[#allocation9 + $0x10] sm:$0xff]  ;;  %v4560_v17 = vld [vmem:[#allocation9 + $0x8] sm:$0xff] }
 0x3f6   :  { %v441_v22 = vsel %vm146_vm0, %v433_v19, 0.0  ;;  %v4563_v19 = vld [vmem:[#allocation9] sm:$0xff]  ;;  %583 = vmatpush1.msra.mxu0 %v4557_v15 }
 0x3f7   :  { %v437_v24 = vrot.slane %v436_v20, 2  ;;  %v442_v25 = vrot.slane %v441_v22, 4  ;;  %584 = vmatprep.subr.mxu0 %v4560_v17 }
 0x3f8   :  { %585 = vmatpush1.msra.mxu0 %v4563_v19 }
 0x3f9   :  { %v438_v26 = vadd.f32 %v437_v24, %v436_v20  ;;  %v443_v28 = vadd.f32 %v442_v25, %v441_v22  ;;  %3736 = vmatprep.subr.mxu0 %v5320_v4 }
 0x3fb   :  { %v444_v29 = vrot.slane %v443_v28, 2  ;;  %v439_v31 = vrot.slane %v438_v26, 1 }
 0x3fd   :  { %v445_v30 = vadd.f32 %v444_v29, %v443_v28  ;;  %v440_v35 = vadd.f32 %v439_v31, %v438_v26 }
 0x3ff   :  { %v446_v33 = vrot.slane %v445_v30, 1 }
 0x401   :  { %v447_v36 = vadd.f32 %v446_v33, %v445_v30 }
 0x403   :  { %v4503_v37 = vsel %vm360_vm1, %v447_v36, %v440_v35 }
 0x404   :  { %3723 = vmatmul.mubr.msk.f32.vlgmr.msra.gmra.mxu1 %vm146_vm0, %v4503_v37 }
 0x405   :  { %3733 = vmatprep.mubr.msk.f32.mxu1 %vm4272_vm3, %v5320_v4  ;;  %3726 = vmatpush3.msra.mxu1 %v4523_v55 }
 0x406   :  { %3727 = vmatprep.subr.mxu1 %v5320_v4 }
 0x407   :  { %3728 = vmatpush3.msra.mxu1 %v4525_v56 }
 0x408   :  { %3729 = vmatprep.subr.mxu1 %v5320_v4 }
 0x409   :  { %3730 = vmatpush3.msra.mxu1 %v4529_v58 }
 0x40a   :  { %3731 = vmatprep.subr.mxu1 %v5320_v4 }
 0x40b   :  { %3732 = vmatpush3.msra.mxu1 %v4533_v59 }
 0x40c   :  { %973 = vmatprep.subr.mxu1 %v4543_v63 }
 0x4c4   :  { %v520_v45 = vpop.f32.mrf.mxu1 }
 0x4c5   :  { %v524_v46 = vadd.f32 %v520_v45, %v247_v44 }
 0x4c6   :  { %v3724_v47 = vpop.f32.mrf.mxu1 }
 0x4c7   :  { %3931 = vtanh.f32 %v524_v46  ;;  %v3588_v49 = vmul.f32 -1.442695, %v524_v46 }
 0x4c9   :  { %3933 = vpow2.f32 %v3588_v49 }
 0x4d4   :  { %v3932_v48 = vpop.eup %3931 }
 0x4d5   :  { %534 = vrot.lane.b32.xlu0 %v3932_v48, %s4273_s27 }
 0x4d6   :  { %v3934_v50 = vpop.eup %3933 }
 0x4d7   :  { %v528_v51 = vadd.f32 1.0, %v3934_v50 }
 0x4d9   :  { %3935 = vrcp.f32 %v528_v51 }
 0x4e6   :  { %v3936_v52 = vpop.eup %3935 }
 0x4e7   :  { %v532_v60 = vmul.f32 0.0, %v3936_v52 }
 0x547   :  { %v535_v53 = vpop.permute.xlu0 %534 }
 0x548   :  { %v537_v54 = vmul.f32 %v3936_v52, %v535_v53 }
 0x54a   :  { %539 = vrot.lane.b32.xlu0 %v537_v54, %s4274_s29 }
 0x5bc   :  { %v540_v61 = vpop.permute.xlu0 %539 }
 0x5bd   :  { %v4538_v62 = vadd.f32 %v540_v61, %v532_v60 }
 0x5bf   :  { %3937 = vtanh.f32 %v4538_v62  ;;  %626 = vrot.lane.b32.xlu1 %v4538_v62, %s4275_s7 }
 0x5cc   :  { %v3938_v20 = vpop.eup %3937 }
 0x5cd   :  { %545 = vrot.lane.b32.xlu0 %v3938_v20, %s4273_s27 }
 0x631   :  { %v627_v22 = vpop.permute.xlu1 %626 }
 0x632   :  { %3734 = vmatmul.mubr.msk.f32.vlgmr.msra.gmra.mxu1 %vm146_vm0, %v627_v22 }
 0x633   :  { %974 = vmatpush1.msra.mxu1 %v4545_v0  ;;  %1013 = vmatprep.mubr.f32.mxu1 %v5320_v4 }
 0x634   :  { %975 = vmatprep.subr.mxu1 %v4547_v1 }
 0x635   :  { %976 = vmatpush1.msra.mxu1 %v4550_v2 }
 0x636   :  { %977 = vmatprep.subr.mxu1 %v4554_v14 }
 0x637   :  { %978 = vmatpush1.msra.mxu1 %v4557_v15 }
 0x638   :  { %979 = vmatprep.subr.mxu1 %v4560_v17 }
 0x639   :  { %980 = vmatpush1.msra.mxu1 %v4563_v19 }
 0x63a   :  { %3758 = vmatprep.subr.mxu1 %v5320_v4 }
 0x63f   :  { %v546_v24 = vpop.permute.xlu0 %545 }
 0x640   :  { %v548_v25 = vmul.f32 %v3936_v52, %v546_v24 }
 0x642   :  { %550 = vrot.lane.b32.xlu0 %v548_v25, %s4274_s29 }
 0x6b4   :  { %v4581_v26 = vpop.permute.xlu0 %550 }
 0x6b5   :  { %3589 = vmatmul.mubr.msk.f32.vlgmr.msra.gmra.mxu0 %vm146_vm0, %v4581_v26 }
 0x6b6   :  { %3737 = vmatpush3.msra.mxu0 %v4473_v5  ;;  %3744 = vmatprep.mubr.msk.f32.mxu0 %vm4272_vm3, %v5320_v4 }
 0x6b7   :  { %3738 = vmatprep.subr.mxu0 %v5320_v4 }
 0x6b8   :  { %3739 = vmatpush3.msra.mxu0 %v4477_v7 }
 0x6b9   :  { %3740 = vmatprep.subr.mxu0 %v5320_v4 }
 0x6ba   :  { %3741 = vmatpush3.msra.mxu0 %v4480_v8 }
 0x6bb   :  { %3742 = vmatprep.subr.mxu0 %v5320_v4 }
 0x6bc   :  { %3743 = vmatpush3.msra.mxu0 %v4486_v9 }
 0x6bd   :  { %3747 = vmatprep.subr.mxu0 %v5320_v4 }
 0x6f2   :  { %v696_v28 = vpop.f32.mrf.mxu1 }
 0x6f4   :  { %v3735_v29 = vpop.f32.mrf.mxu1 }
 0x775   :  { %v4595_v30 = vpop.f32.mrf.mxu0 }
 0x777   :  { %v622_v31 = vpop.f32.mrf.mxu0 }
 0x778   :  { %v700_v33 = vadd.f32 %v696_v28, %v622_v31 }
 0x77a   :  { %v701_v35 = vadd.f32 %v4417_v13, %v700_v33 }
 0x77c   :  { %v709_v36 = vrot.slane %v701_v35, %v4412_v12 }
 0x77e   :  { %v710_v39 = vcombine.high %v709_v36, %v709_v36  ;;  %v717_v42 = vrot.slane %v709_v36, %v4412_v12 }
 0x780   :  { %v724_v44 = vrot.slane %v710_v39, %v4412_v12  ;;  %v728_v45 = vrot.slane %v717_v42, %v4422_v16 }
 0x782   :  { %v732_v46 = vrot.slane %v724_v44, %v4422_v16  ;;  %v735_v47 = vadd.f32 %v728_v45, %v4431_v23 }
 0x784   :  { %v736_v48 = vadd.f32 %v4428_v21, %v732_v46  ;;  %3939 = vtanh.f32 %v735_v47 }
 0x786   :  { %3941 = vtanh.f32 %v736_v48 }
 0x791   :  { %v3940_v49 = vpop.eup %3939 }
 0x792   :  { %v739_v50 = vmul.f32 %v3940_v49, %v4437_v27 }
 0x793   :  { %v3942_v51 = vpop.eup %3941 }
 0x794   :  { %v741_v52 = vsel %vm146_vm0, %v739_v50, 0.0  ;;  %v740_v53 = vmul.f32 %v3942_v51, %v4437_v27 }
 0x795   :  { %742 = vadd.xlane.f32.xlu0 %v741_v52 }
 0x796   :  { %v744_v54 = vsel %vm146_vm0, %v740_v53, 0.0 }
 0x797   :  { %745 = vadd.xlane.f32.xlu1 %v744_v54 }
 0x81e   :  { %v743_v60 = vpop.xlane.xlu0 %742 }
 0x81f   :  { %v752_v20 = vrot.slane %v743_v60, %v4447_v34 }
 0x820   :  { %v746_v61 = vpop.xlane.xlu1 %745 }
 0x821   :  { %v756_v22 = vrot.slane %v746_v61, %v4447_v34 }
 0x823   :  { %v757_v24 = vsel %vm360_vm1, %v756_v22, %v752_v20 }
 0x824   :  { %v759_v25 = vsel %vm363_vm2, %v757_v24, -inf }
 0x825   :  { %760 = vmax.xlane.f32.xlu0 %v759_v25  ;;  %v4276_v25 = vmov 1  }
 0x8ae   :  { %v761_v28 = vpop.xlane.xlu0 %760 }
 0x8af   :  { %v766_v29 = vrot.slane %v761_v28, %v4422_v16  ;;  %v770_v31 = vrot.slane %v761_v28, %v4456_v41 }
 0x8b1   :  { %v773_v33 = vsub.f32 %v743_v60, %v766_v29  ;;  %v774_v35 = vsub.f32 %v746_v61, %v770_v31 }
 0x8b3   :  { %v775_v36 = vmul.f32 1.442695, %v773_v33  ;;  %v777_v39 = vmul.f32 1.442695, %v774_v35 }
 0x8b5   :  { %3943 = vpow2.f32 %v775_v36 }
 0x8b6   :  { %3945 = vpow2.f32 %v777_v39 }
 0x8c2   :  { %v3944_v42 = vpop.eup %3943 }
 0x8c3   :  { %v3946_v44 = vpop.eup %3945  ;;  %782 = vperm.xlu0 %3906, %v3944_v42  }
 0x8c4   :  { %785 = vperm.xlu1 %3905, %v3946_v44  }
 0x93e   :  { %v783_v45 = vpop.permute.xlu0 %782 }
 0x93f   :  { %v786_v46 = vpop.permute.xlu1 %785  ;;  %v790_v47 = vrot.slane %v783_v45, %v4447_v34 }
 0x940   :  { %v794_v48 = vrot.slane %v786_v46, %v4447_v34 }
 0x942   :  { %v795_v49 = vsel %vm360_vm1, %v794_v48, %v790_v47 }
 0x943   :  { %v797_v50 = vsel %vm363_vm2, %v795_v49, 0.0 }
 0x944   :  { %798 = vadd.xlane.f32.xlu1 %v797_v50 }
 0x9cd   :  { %v799_v51 = vpop.xlane.xlu1 %798 }
 0x9ce   :  { %3947 = vrcp.f32 %v799_v51 }
 0x9db   :  { %v3948_v52 = vpop.eup %3947 }
 0x9dc   :  { %v801_v53 = vmul.f32 %v3948_v52, %v799_v51 }
 0x9de   :  { %v802_v54 = vsub.f32 2.0, %v801_v53 }
 0x9e0   :  { %v803_v60 = vmul.f32 %v3948_v52, %v802_v54 }
 0x9e2   :  { %v808_v61 = vrot.slane %v803_v60, %v4422_v16  ;;  %v812_v22 = vrot.slane %v803_v60, %v4456_v41 }
 0x9e4   :  { %v815_v20 = vmul.f32 %v3944_v42, %v808_v61  ;;  %v816_v24 = vmul.f32 %v3946_v44, %v812_v22 }
 0x9e6   :  { %819 = vperm.xlu0 %3906, %v815_v20  }
 0x9ea   :  { %824 = vperm.xlu0 %3906, %v816_v24  }
 0x9ee   :  { %3907 = vset.pattern.permute.xlu0 %v4276_v25 }
 0x9ef   :  { %249 = vperm.xlu0 %3907, %v4467_v57  }
 0x9f3   :  { %3908 = vset.pattern.permute.xlu0 %v5318_v40 }
 0xa61   :  { %v4623_v28 = vpop.permute.xlu0 %819 }
 0xa62   :  { %v827_v29 = vmul.f32 %v4623_v28, %v4401_v3 }
 0xa64   :  { %v829_v31 = vsel %vm146_vm0, %v827_v29, 0.0 }
 0xa65   :  { %v830_v33 = vrot.slane %v829_v31, 4  ;;  %v4628_v35 = vpop.permute.xlu0 %824 }
 0xa66   :  { %v828_v36 = vmul.f32 %v4628_v35, %v4405_v6 }
 0xa67   :  { %v831_v39 = vadd.f32 %v830_v33, %v829_v31 }
 0xa68   :  { %v836_v42 = vsel %vm146_vm0, %v828_v36, 0.0 }
 0xa69   :  { %v832_v44 = vrot.slane %v831_v39, 2  ;;  %v837_v45 = vrot.slane %v836_v42, 4 }
 0xa6a   :  { %v250_v60 = vpop.permute.xlu0 %249 }
 0xa6b   :  { %v833_v46 = vadd.f32 %v832_v44, %v831_v39  ;;  %v838_v47 = vadd.f32 %v837_v45, %v836_v42  ;;  %v252_v61 = vmul.f32 %v4512_v38, %v250_v60 }
 0xa6d   :  { %v839_v48 = vrot.slane %v838_v47, 2  ;;  %v834_v49 = vrot.slane %v833_v46, 1  ;;  %v253_v20 = vadd.f32 %v4518_v43, %v252_v61 }
 0xa6f   :  { %v840_v50 = vadd.f32 %v839_v48, %v838_v47  ;;  %v835_v52 = vadd.f32 %v834_v49, %v833_v46  ;;  %v843_v22 = vadd.f32 %v4595_v30, %v253_v20 }
 0xa71   :  { %v841_v51 = vrot.slane %v840_v50, 1 }
 0xa73   :  { %v842_v53 = vadd.f32 %v841_v51, %v840_v50 }
 0xa75   :  { %v4634_v54 = vsel %vm360_vm1, %v842_v53, %v835_v52 }
 0xa76   :  { %3745 = vmatmul.mubr.msk.f32.vlgmr.msra.gmra.mxu0 %vm146_vm0, %v4634_v54 }
 0xa77   :  { %3748 = vmatpush3.msra.mxu0 %v4523_v55  ;;  %3755 = vmatprep.mubr.msk.f32.mxu0 %vm4272_vm3, %v5320_v4 }
 0xa78   :  { %3749 = vmatprep.subr.mxu0 %v5320_v4 }
 0xa79   :  { %3750 = vmatpush3.msra.mxu0 %v4525_v56 }
 0xa7a   :  { %3751 = vmatprep.subr.mxu0 %v5320_v4 }
 0xa7b   :  { %3752 = vmatpush3.msra.mxu0 %v4529_v58 }
 0xa7c   :  { %3753 = vmatprep.subr.mxu0 %v5320_v4 }
 0xa7d   :  { %3754 = vmatpush3.msra.mxu0 %v4533_v59 }
 0xa7e   :  { %1368 = vmatprep.subr.mxu0 %v4543_v63 }
 0xb36   :  { %v915_v24 = vpop.f32.mrf.mxu0 }
 0xb37   :  { %v919_v25 = vadd.f32 %v915_v24, %v843_v22 }
 0xb38   :  { %v3746_v29 = vpop.f32.mrf.mxu0 }
 0xb39   :  { %3949 = vtanh.f32 %v919_v25  ;;  %v3592_v33 = vmul.f32 -1.442695, %v919_v25 }
 0xb3b   :  { %3951 = vpow2.f32 %v3592_v33 }
 0xb46   :  { %v3950_v31 = vpop.eup %3949 }
 0xb47   :  { %929 = vrot.lane.b32.xlu0 %v3950_v31, %s4273_s27 }
 0xb48   :  { %v3952_v36 = vpop.eup %3951 }
 0xb49   :  { %v923_v39 = vadd.f32 1.0, %v3952_v36 }
 0xb4b   :  { %3953 = vrcp.f32 %v923_v39 }
 0xb58   :  { %v3954_v42 = vpop.eup %3953 }
 0xb59   :  { %v927_v46 = vmul.f32 %v3954_v42, %v4538_v62 }
 0xbb9   :  { %v930_v44 = vpop.permute.xlu0 %929 }
 0xbba   :  { %v932_v45 = vmul.f32 %v3954_v42, %v930_v44 }
 0xbbc   :  { %934 = vrot.lane.b32.xlu0 %v932_v45, %s4274_s29 }
 0xc2e   :  { %v935_v30 = vpop.permute.xlu0 %934 }
 0xc2f   :  { %v4654_v47 = vadd.f32 %v935_v30, %v927_v46 }
 0xc31   :  { %3955 = vtanh.f32 %v4654_v47 }
 0xc3e   :  { %v3956_v48 = vpop.eup %3955 }
 0xc3f   :  { %940 = vrot.lane.b32.xlu0 %v3956_v48, %s4273_s27 }
 0xcb1   :  { %v941_v49 = vpop.permute.xlu0 %940 }
 0xcb2   :  { %v4658_v50 = vmul.f32 %v3954_v42, %v941_v49 }
 0xcb4   :  { %945 = vrot.lane.b32.xlu0 %v4658_v50, %s4274_s29 }
 0xcb8   :  { %1021 = vrot.lane.b32.xlu0 %v4654_v47, %s4275_s7 }
 0xd26   :  { %v946_v51 = vpop.permute.xlu0 %945 }
 0xd27   :  { %3593 = vmatmul.mubr.msk.f32.vlgmr.msra.gmra.mxu1 %vm146_vm0, %v946_v51 }
 0xd28   :  { %3759 = vmatpush3.msra.mxu1 %v4473_v5  ;;  %3766 = vmatprep.mubr.msk.f32.mxu1 %vm4272_vm3, %v5320_v4 }
 0xd29   :  { %3760 = vmatprep.subr.mxu1 %v5320_v4 }
 0xd2a   :  { %v1022_v62 = vpop.permute.xlu0 %1021  ;;  %3761 = vmatpush3.msra.mxu1 %v4477_v7 }
 0xd2b   :  { %3756 = vmatmul.mubr.msk.f32.vlgmr.msra.gmra.mxu0 %vm146_vm0, %v1022_v62  ;;  %3762 = vmatprep.subr.mxu1 %v5320_v4 }
 0xd2c   :  { %3763 = vmatpush3.msra.mxu1 %v4480_v8  ;;  %1369 = vmatpush1.msra.mxu0 %v4545_v0 }
 0xd2d   :  { %3764 = vmatprep.subr.mxu1 %v5320_v4  ;;  %1370 = vmatprep.subr.mxu0 %v4547_v1 }
 0xd2e   :  { %3765 = vmatpush3.msra.mxu1 %v4486_v9  ;;  %1371 = vmatpush1.msra.mxu0 %v4550_v2 }
 0xd2f   :  { %3769 = vmatprep.subr.mxu1 %v5320_v4  ;;  %1372 = vmatprep.subr.mxu0 %v4554_v14 }
 0xd30   :  { %1373 = vmatpush1.msra.mxu0 %v4557_v15  ;;  %1408 = vmatprep.mubr.f32.mxu0 %v5320_v4 }
 0xd31   :  { %1374 = vmatprep.subr.mxu0 %v4560_v17 }
 0xd32   :  { %1375 = vmatpush1.msra.mxu0 %v4563_v19 }
 0xd33   :  { %3780 = vmatprep.subr.mxu0 %v5320_v4 }
 0xde7   :  { %v4685_v52 = vpop.f32.mrf.mxu1 }
 0xde9   :  { %v1017_v53 = vpop.f32.mrf.mxu1 }
 0xdeb   :  { %v1091_v60 = vpop.f32.mrf.mxu0 }
 0xdec   :  { %v1095_v61 = vadd.f32 %v1091_v60, %v1017_v53 }
 0xded   :  { %v3757_v20 = vpop.f32.mrf.mxu0 }
 0xdee   :  { %v1096_v22 = vadd.f32 %v4417_v13, %v1095_v61 }
 0xdf0   :  { %v1104_v24 = vrot.slane %v1096_v22, %v4412_v12 }
 0xdf2   :  { %v1105_v25 = vcombine.high %v1104_v24, %v1104_v24  ;;  %v1112_v29 = vrot.slane %v1104_v24, %v4412_v12 }
 0xdf4   :  { %v1119_v31 = vrot.slane %v1105_v25, %v4412_v12  ;;  %v1123_v33 = vrot.slane %v1112_v29, %v4422_v16 }
 0xdf6   :  { %v1127_v36 = vrot.slane %v1119_v31, %v4422_v16  ;;  %v1130_v39 = vadd.f32 %v1123_v33, %v4431_v23 }
 0xdf8   :  { %v1131_v42 = vadd.f32 %v4428_v21, %v1127_v36  ;;  %3957 = vtanh.f32 %v1130_v39 }
 0xdfa   :  { %3959 = vtanh.f32 %v1131_v42 }
 0xe05   :  { %v3958_v44 = vpop.eup %3957 }
 0xe06   :  { %v1134_v45 = vmul.f32 %v3958_v44, %v4437_v27 }
 0xe07   :  { %v3960_v46 = vpop.eup %3959 }
 0xe08   :  { %v1136_v30 = vsel %vm146_vm0, %v1134_v45, 0.0  ;;  %v1135_v48 = vmul.f32 %v3960_v46, %v4437_v27 }
 0xe09   :  { %1137 = vadd.xlane.f32.xlu1 %v1136_v30 }
 0xe0a   :  { %v1139_v49 = vsel %vm146_vm0, %v1135_v48, 0.0 }
 0xe0b   :  { %1140 = vadd.xlane.f32.xlu0 %v1139_v49 }
 0xe92   :  { %v1138_v51 = vpop.xlane.xlu1 %1137 }
 0xe93   :  { %v1147_v53 = vrot.slane %v1138_v51, %v4447_v34 }
 0xe94   :  { %v1141_v62 = vpop.xlane.xlu0 %1140 }
 0xe95   :  { %v1151_v60 = vrot.slane %v1141_v62, %v4447_v34 }
 0xe97   :  { %v1152_v61 = vsel %vm360_vm1, %v1151_v60, %v1147_v53 }
 0xe98   :  { %v1154_v20 = vsel %vm363_vm2, %v1152_v61, -inf }
 0xe99   :  { %1155 = vmax.xlane.f32.xlu1 %v1154_v20 }
 0xf22   :  { %v1156_v22 = vpop.xlane.xlu1 %1155 }
 0xf23   :  { %v1161_v24 = vrot.slane %v1156_v22, %v4422_v16  ;;  %v1165_v25 = vrot.slane %v1156_v22, %v4456_v41 }
 0xf25   :  { %v1168_v29 = vsub.f32 %v1138_v51, %v1161_v24  ;;  %v1169_v31 = vsub.f32 %v1141_v62, %v1165_v25 }
 0xf27   :  { %v1170_v33 = vmul.f32 1.442695, %v1168_v29  ;;  %v1172_v36 = vmul.f32 1.442695, %v1169_v31  ;;  %v4277_v29 = vmov 2  }
 0xf29   :  { %3961 = vpow2.f32 %v1170_v33 }
 0xf2a   :  { %3963 = vpow2.f32 %v1172_v36 }
 0xf36   :  { %v3962_v39 = vpop.eup %3961 }
 0xf37   :  { %1177 = vperm.xlu1 %3905, %v3962_v39   ;;  %v3964_v42 = vpop.eup %3963 }
 0xf3b   :  { %1180 = vperm.xlu1 %3905, %v3964_v42  }
 0xfb2   :  { %v1178_v44 = vpop.permute.xlu1 %1177 }
 0xfb3   :  { %v1185_v46 = vrot.slane %v1178_v44, %v4447_v34 }
 0xfb6   :  { %v1181_v45 = vpop.permute.xlu1 %1180 }
 0xfb7   :  { %v1189_v30 = vrot.slane %v1181_v45, %v4447_v34 }
 0xfb9   :  { %v1190_v48 = vsel %vm360_vm1, %v1189_v30, %v1185_v46 }
 0xfba   :  { %v1192_v49 = vsel %vm363_vm2, %v1190_v48, 0.0 }
 0xfbb   :  { %1193 = vadd.xlane.f32.xlu1 %v1192_v49 }
0x1044   :  { %v1194_v51 = vpop.xlane.xlu1 %1193 }
0x1045   :  { %3965 = vrcp.f32 %v1194_v51 }
0x1052   :  { %v3966_v62 = vpop.eup %3965 }
0x1053   :  { %v1196_v53 = vmul.f32 %v3966_v62, %v1194_v51 }
0x1055   :  { %v1197_v60 = vsub.f32 2.0, %v1196_v53 }
0x1057   :  { %v1198_v61 = vmul.f32 %v3966_v62, %v1197_v60 }
0x1059   :  { %v1207_v20 = vrot.slane %v1198_v61, %v4456_v41  ;;  %v1203_v22 = vrot.slane %v1198_v61, %v4422_v16 }
0x105b   :  { %v1211_v24 = vmul.f32 %v3964_v42, %v1207_v20  ;;  %v1210_v25 = vmul.f32 %v3962_v39, %v1203_v22 }
0x105d   :  { %1219 = vperm.xlu1 %3905, %v1211_v24   ;;  %1214 = vperm.xlu0 %3908, %v1210_v25  }
0x1061   :  { %3909 = vset.pattern.permute.xlu0 %v4277_v29 }
0x1062   :  { %255 = vperm.xlu0 %3909, %v4467_v57  }
0x1066   :  { %3910 = vset.pattern.permute.xlu0 %v5318_v40 }
0x10d8   :  { %v4713_v31 = vpop.permute.xlu1 %1219  ;;  %v4715_v33 = vpop.permute.xlu0 %1214 }
0x10d9   :  { %v1223_v36 = vmul.f32 %v4713_v31, %v4405_v6  ;;  %v1222_v44 = vmul.f32 %v4715_v33, %v4401_v3 }
0x10db   :  { %v1231_v39 = vsel %vm146_vm0, %v1223_v36, 0.0  ;;  %v1224_v42 = vsel %vm146_vm0, %v1222_v44, 0.0 }
0x10dc   :  { %v1232_v45 = vrot.slane %v1231_v39, 4  ;;  %v1225_v46 = vrot.slane %v1224_v42, 4 }
0x10dd   :  { %v256_v3 = vpop.permute.xlu0 %255 }
0x10de   :  { %v1233_v30 = vadd.f32 %v1232_v45, %v1231_v39  ;;  %v1226_v48 = vadd.f32 %v1225_v46, %v1224_v42  ;;  %v258_v24 = vmul.f32 %v4512_v38, %v256_v3 }
0x10e0   :  { %v1234_v49 = vrot.slane %v1233_v30, 2  ;;  %v1227_v51 = vrot.slane %v1226_v48, 2  ;;  %v259_v25 = vadd.f32 %v4518_v43, %v258_v24 }
0x10e2   :  { %v1235_v62 = vadd.f32 %v1234_v49, %v1233_v30  ;;  %v1228_v53 = vadd.f32 %v1227_v51, %v1226_v48  ;;  %v1238_v29 = vadd.f32 %v4685_v52, %v259_v25 }
0x10e4   :  { %v1236_v60 = vrot.slane %v1235_v62, 1  ;;  %v1229_v61 = vrot.slane %v1228_v53, 1 }
0x10e6   :  { %v1237_v20 = vadd.f32 %v1236_v60, %v1235_v62  ;;  %v1230_v22 = vadd.f32 %v1229_v61, %v1228_v53 }
0x10e8   :  { %v4724_v6 = vsel %vm360_vm1, %v1237_v20, %v1230_v22 }
0x10e9   :  { %3767 = vmatmul.mubr.msk.f32.vlgmr.msra.gmra.mxu1 %vm146_vm0, %v4724_v6 }
0x10ea   :  { %3770 = vmatpush3.msra.mxu1 %v4523_v55  ;;  %3777 = vmatprep.mubr.msk.f32.mxu1 %vm4272_vm3, %v5320_v4 }
0x10eb   :  { %3771 = vmatprep.subr.mxu1 %v5320_v4 }
0x10ec   :  { %3772 = vmatpush3.msra.mxu1 %v4525_v56 }
0x10ed   :  { %3773 = vmatprep.subr.mxu1 %v5320_v4 }
0x10ee   :  { %3774 = vmatpush3.msra.mxu1 %v4529_v58 }
0x10ef   :  { %3775 = vmatprep.subr.mxu1 %v5320_v4 }
0x10f0   :  { %3776 = vmatpush3.msra.mxu1 %v4533_v59 }
0x10f1   :  { %1763 = vmatprep.subr.mxu1 %v4543_v63 }
0x11a9   :  { %v1310_v36 = vpop.f32.mrf.mxu1 }
0x11aa   :  { %v1314_v44 = vadd.f32 %v1310_v36, %v1238_v29 }
0x11ab   :  { %v3768_v39 = vpop.f32.mrf.mxu1 }
0x11ac   :  { %3967 = vtanh.f32 %v1314_v44  ;;  %v3596_v45 = vmul.f32 -1.442695, %v1314_v44 }
0x11ae   :  { %3969 = vpow2.f32 %v3596_v45 }
0x11b9   :  { %v3968_v42 = vpop.eup %3967 }
0x11ba   :  { %1324 = vrot.lane.b32.xlu1 %v3968_v42, %s4273_s27 }
0x11bb   :  { %v3970_v46 = vpop.eup %3969 }
0x11bc   :  { %v1318_v30 = vadd.f32 1.0, %v3970_v46 }
0x11be   :  { %3971 = vrcp.f32 %v1318_v30 }
0x11cb   :  { %v3972_v48 = vpop.eup %3971 }
0x11cc   :  { %v1322_v62 = vmul.f32 %v3972_v48, %v4654_v47 }
0x122c   :  { %v1325_v49 = vpop.permute.xlu1 %1324 }
0x122d   :  { %v1327_v51 = vmul.f32 %v3972_v48, %v1325_v49 }
0x122f   :  { %1329 = vrot.lane.b32.xlu0 %v1327_v51, %s4274_s29 }
0x12a1   :  { %v1330_v52 = vpop.permute.xlu0 %1329 }
0x12a2   :  { %v4744_v53 = vadd.f32 %v1330_v52, %v1322_v62 }
0x12a4   :  { %3973 = vtanh.f32 %v4744_v53 }
0x12b1   :  { %v3974_v60 = vpop.eup %3973 }
0x12b2   :  { %1335 = vrot.lane.b32.xlu1 %v3974_v60, %s4273_s27 }
0x12b6   :  { %1416 = vrot.lane.b32.xlu1 %v4744_v53, %s4275_s7 }
0x1324   :  { %v1336_v61 = vpop.permute.xlu1 %1335 }
0x1325   :  { %v4750_v20 = vmul.f32 %v3972_v48, %v1336_v61 }
0x1327   :  { %1340 = vrot.lane.b32.xlu0 %v4750_v20, %s4274_s29 }
0x1328   :  { %v1417_v22 = vpop.permute.xlu1 %1416 }
0x1329   :  { %3778 = vmatmul.mubr.msk.f32.vlgmr.msra.gmra.mxu1 %vm146_vm0, %v1417_v22 }
0x132a   :  { %1764 = vmatpush1.msra.mxu1 %v4545_v0  ;;  %1803 = vmatprep.mubr.f32.mxu1 %v5320_v4 }
0x132b   :  { %1765 = vmatprep.subr.mxu1 %v4547_v1 }
0x132c   :  { %1766 = vmatpush1.msra.mxu1 %v4550_v2 }
0x132d   :  { %1767 = vmatprep.subr.mxu1 %v4554_v14 }
0x132e   :  { %1768 = vmatpush1.msra.mxu1 %v4557_v15 }
0x132f   :  { %1769 = vmatprep.subr.mxu1 %v4560_v17 }
0x1330   :  { %1770 = vmatpush1.msra.mxu1 %v4563_v19 }
0x1331   :  { %3802 = vmatprep.subr.mxu1 %v5320_v4 }
0x1399   :  { %v1341_v47 = vpop.permute.xlu0 %1340 }
0x139a   :  { %3597 = vmatmul.mubr.msk.f32.vlgmr.msra.gmra.mxu0 %vm146_vm0, %v1341_v47 }
0x139b   :  { %3781 = vmatpush3.msra.mxu0 %v4473_v5  ;;  %3788 = vmatprep.mubr.msk.f32.mxu0 %vm4272_vm3, %v5320_v4 }
0x139c   :  { %3782 = vmatprep.subr.mxu0 %v5320_v4 }
0x139d   :  { %3783 = vmatpush3.msra.mxu0 %v4477_v7 }
0x139e   :  { %3784 = vmatprep.subr.mxu0 %v5320_v4 }
0x139f   :  { %3785 = vmatpush3.msra.mxu0 %v4480_v8 }
0x13a0   :  { %3786 = vmatprep.subr.mxu0 %v5320_v4 }
0x13a1   :  { %3787 = vmatpush3.msra.mxu0 %v4486_v9 }
0x13a2   :  { %3791 = vmatprep.subr.mxu0 %v5320_v4 }
0x13e9   :  { %v1486_v3 = vpop.f32.mrf.mxu1 }
0x13eb   :  { %v3779_v24 = vpop.f32.mrf.mxu1 }
0x145a   :  { %v4775_v5 = vpop.f32.mrf.mxu0 }
0x145c   :  { %v1412_v25 = vpop.f32.mrf.mxu0 }
0x145d   :  { %v1490_v29 = vadd.f32 %v1486_v3, %v1412_v25 }
0x145f   :  { %v1491_v36 = vadd.f32 %v4417_v13, %v1490_v29 }
0x1461   :  { %v1499_v7 = vrot.slane %v1491_v36, %v4412_v12 }
0x1463   :  { %v1500_v44 = vcombine.high %v1499_v7, %v1499_v7  ;;  %v1507_v39 = vrot.slane %v1499_v7, %v4412_v12 }
0x1465   :  { %v1514_v8 = vrot.slane %v1500_v44, %v4412_v12  ;;  %v1518_v42 = vrot.slane %v1507_v39, %v4422_v16 }
0x1467   :  { %v1522_v9 = vrot.slane %v1514_v8, %v4422_v16  ;;  %v1525_v45 = vadd.f32 %v1518_v42, %v4431_v23 }
0x1469   :  { %v1526_v46 = vadd.f32 %v4428_v21, %v1522_v9  ;;  %3975 = vtanh.f32 %v1525_v45 }
0x146b   :  { %3977 = vtanh.f32 %v1526_v46 }
0x1476   :  { %v3976_v30 = vpop.eup %3975 }
0x1477   :  { %v1529_v13 = vmul.f32 %v3976_v30, %v4437_v27 }
0x1478   :  { %v3978_v48 = vpop.eup %3977 }
0x1479   :  { %v1531_v49 = vsel %vm146_vm0, %v1529_v13, 0.0  ;;  %v1530_v51 = vmul.f32 %v3978_v48, %v4437_v27 }
0x147a   :  { %1532 = vadd.xlane.f32.xlu0 %v1531_v49 }
0x147b   :  { %v1534_v62 = vsel %vm146_vm0, %v1530_v51, 0.0 }
0x147c   :  { %1535 = vadd.xlane.f32.xlu1 %v1534_v62 }
0x1503   :  { %v1533_v52 = vpop.xlane.xlu0 %1532 }
0x1504   :  { %v1542_v61 = vrot.slane %v1533_v52, %v4447_v34 }
0x1505   :  { %v1536_v60 = vpop.xlane.xlu1 %1535 }
0x1506   :  { %v1546_v22 = vrot.slane %v1536_v60, %v4447_v34 }
0x1508   :  { %v1547_v47 = vsel %vm360_vm1, %v1546_v22, %v1542_v61 }
0x1509   :  { %v1549_v3 = vsel %vm363_vm2, %v1547_v47, -inf }
0x150a   :  { %1550 = vmax.xlane.f32.xlu0 %v1549_v3  ;;  %v4278_v3 = vmov 3  }
0x1593   :  { %v1551_v24 = vpop.xlane.xlu0 %1550 }
0x1594   :  { %v1556_v25 = vrot.slane %v1551_v24, %v4422_v16  ;;  %v1560_v27 = vrot.slane %v1551_v24, %v4456_v41  ;;  %v3463_v24 = vadd.s32 4294967272, %v4443_v32 }
0x1596   :  { %v1563_v29 = vsub.f32 %v1533_v52, %v1556_v25  ;;  %v1564_v36 = vsub.f32 %v1536_v60, %v1560_v27  ;;  %v3466_v27 = vsub.s32 %v3463_v24, %v4409_v11 }
0x1598   :  { %v1565_v7 = vmul.f32 1.442695, %v1563_v29  ;;  %v1567_v44 = vmul.f32 1.442695, %v1564_v36  ;;  %v4805_v29 = vld [vmem:[#allocation3] sm:$0xff] }
0x159a   :  { %3979 = vpow2.f32 %v1565_v7 }
0x159b   :  { %3981 = vpow2.f32 %v1567_v44 }
0x15a7   :  { %v3980_v39 = vpop.eup %3979 }
0x15a8   :  { %v3982_v8 = vpop.eup %3981  ;;  %1572 = vperm.xlu0 %3910, %v3980_v39  }
0x15a9   :  { %1575 = vperm.xlu1 %3905, %v3982_v8  }
0x1623   :  { %v1573_v42 = vpop.permute.xlu0 %1572 }
0x1624   :  { %v1576_v9 = vpop.permute.xlu1 %1575  ;;  %v1580_v45 = vrot.slane %v1573_v42, %v4447_v34  ;;  %v4809_v42 = vld [vmem:[#allocation3 + $0x8] sm:$0xff] }
0x1625   :  { %v1584_v46 = vrot.slane %v1576_v9, %v4447_v34 }
0x1627   :  { %v1585_v30 = vsel %vm360_vm1, %v1584_v46, %v1580_v45 }
0x1628   :  { %v1587_v13 = vsel %vm363_vm2, %v1585_v30, 0.0 }
0x1629   :  { %1588 = vadd.xlane.f32.xlu1 %v1587_v13 }
0x16b2   :  { %v1589_v48 = vpop.xlane.xlu1 %1588 }
0x16b3   :  { %3983 = vrcp.f32 %v1589_v48 }
0x16c0   :  { %v3984_v49 = vpop.eup %3983 }
0x16c1   :  { %v1591_v51 = vmul.f32 %v3984_v49, %v1589_v48 }
0x16c3   :  { %v1592_v62 = vsub.f32 2.0, %v1591_v51 }
0x16c5   :  { %v1593_v52 = vmul.f32 %v3984_v49, %v1592_v62 }
0x16c7   :  { %v1598_v60 = vrot.slane %v1593_v52, %v4422_v16  ;;  %v1602_v22 = vrot.slane %v1593_v52, %v4456_v41 }
0x16c9   :  { %v1605_v61 = vmul.f32 %v3980_v39, %v1598_v60  ;;  %v1606_v47 = vmul.f32 %v3982_v8, %v1602_v22 }
0x16cb   :  { %1609 = vperm.xlu0 %3910, %v1605_v61  }
0x16cf   :  { %1614 = vperm.xlu0 %3910, %v1606_v47  }
0x16d3   :  { %3911 = vset.pattern.permute.xlu0 %v4278_v3 }
0x16d4   :  { %261 = vperm.xlu0 %3911, %v4467_v57  }
0x16d8   :  { %3912 = vset.pattern.permute.xlu0 %v5318_v40 }
0x1746   :  { %v1610_v25 = vpop.permute.xlu0 %1609 }
0x1747   :  { %v1617_v36 = vmul.f32 %v4805_v29, %v1610_v25  ;;  %v3467_v8 = vrot.slane %v1610_v25, %v3466_v27 }
0x1749   :  { %v1619_v7 = vsel %vm146_vm0, %v1617_v36, 0.0 }
0x174a   :  { %v1620_v44 = vrot.slane %v1619_v7, 4  ;;  %v1615_v39 = vpop.permute.xlu0 %1614 }
0x174b   :  { %v1618_v57 = vmul.f32 %v4809_v42, %v1615_v39  ;;  %v3471_v9 = vrot.slane %v1615_v39, %v3466_v27 }
0x174c   :  { %v1621_v45 = vadd.f32 %v1620_v44, %v1619_v7 }
0x174d   :  { %v1626_v46 = vsel %vm146_vm0, %v1618_v57, 0.0  ;;  %v4814_v30 = vsel %vm360_vm1, %v3471_v9, %v3467_v8 }
0x174e   :  { %v1622_v13 = vrot.slane %v1621_v45, 2  ;;  %v1627_v48 = vrot.slane %v1626_v46, 4 }
0x174f   :  { %v262_v24 = vpop.permute.xlu0 %261 }
0x1750   :  { %v1623_v49 = vadd.f32 %v1622_v13, %v1621_v45  ;;  %v1628_v51 = vadd.f32 %v1627_v48, %v1626_v46 }
0x1752   :  { %v1629_v62 = vrot.slane %v1628_v51, 2  ;;  %v1624_v52 = vrot.slane %v1623_v49, 1 }
0x1754   :  { %v1630_v60 = vadd.f32 %v1629_v62, %v1628_v51  ;;  %v1625_v22 = vadd.f32 %v1624_v52, %v1623_v49  ;;  %v4854_v49 = vld [vmem:[#allocation11 + $0x10] sm:$0xff]  ;;  %v4859_v51 = vld [vmem:[#allocation11 + $0x8] sm:$0xff]  ;;  %v4865_v62 = vld [vmem:[#allocation11] sm:$0xff] }
0x1756   :  { %v1631_v61 = vrot.slane %v1630_v60, 1 }
0x1758   :  { %v1632_v47 = vadd.f32 %v1631_v61, %v1630_v60 }
0x175a   :  { %v4817_v3 = vsel %vm360_vm1, %v1632_v47, %v1625_v22 }
0x175b   :  { %3789 = vmatmul.mubr.msk.f32.vlgmr.msra.gmra.mxu0 %vm146_vm0, %v4817_v3 }
0x175c   :  { %3792 = vmatpush3.msra.mxu0 %v4523_v55  ;;  %3799 = vmatprep.mubr.msk.f32.mxu0 %vm4272_vm3, %v5320_v4  ;;  %v264_v55 = vmul.f32 %v4512_v38, %v262_v24 }
0x175d   :  { %3793 = vmatprep.subr.mxu0 %v5320_v4 }
0x175e   :  { %3794 = vmatpush3.msra.mxu0 %v4525_v56  ;;  %v265_v25 = vadd.f32 %v4518_v43, %v264_v55 }
0x175f   :  { %3795 = vmatprep.subr.mxu0 %v5320_v4 }
0x1760   :  { %3796 = vmatpush3.msra.mxu0 %v4529_v58  ;;  %v1633_v27 = vadd.f32 %v4775_v5, %v265_v25 }
0x1761   :  { %3797 = vmatprep.subr.mxu0 %v5320_v4 }
0x1762   :  { %3798 = vmatpush3.msra.mxu0 %v4533_v59 }
0x1763   :  { %2158 = vmatprep.subr.mxu0 %v4543_v63 }
0x181b   :  { %v1705_v36 = vpop.f32.mrf.mxu0 }
0x181c   :  { %v1709_v7 = vadd.f32 %v1705_v36, %v1633_v27  ;;  %v4894_v36 = vld [vmem:[%s5306_s5] ss:$0 sm:$0xff] }
0x181d   :  { %v3790_v56 = vpop.f32.mrf.mxu0 }
0x181e   :  { %3985 = vtanh.f32 %v1709_v7  ;;  %v3600_v58 = vmul.f32 -1.442695, %v1709_v7 }
0x1820   :  { %3987 = vpow2.f32 %v3600_v58 }
0x182b   :  { %v3986_v44 = vpop.eup %3985 }
0x182c   :  { %1719 = vrot.lane.b32.xlu1 %v3986_v44, %s4273_s27 }
0x182d   :  { %v3988_v39 = vpop.eup %3987 }
0x182e   :  { %v1713_v59 = vadd.f32 1.0, %v3988_v39 }
0x1830   :  { %3989 = vrcp.f32 %v1713_v59 }
0x183d   :  { %v3990_v63 = vpop.eup %3989 }
0x183e   :  { %v1717_v38 = vmul.f32 %v3990_v63, %v4744_v53  ;;  %v4848_v53 = vld [vmem:[#allocation11 + $0x18] sm:$0xff] }
0x189e   :  { %v1720_v8 = vpop.permute.xlu1 %1719 }
0x189f   :  { %v1722_v57 = vmul.f32 %v3990_v63, %v1720_v8 }
0x18a1   :  { %1724 = vrot.lane.b32.xlu0 %v1722_v57, %s4274_s29 }
0x1913   :  { %v1725_v43 = vpop.permute.xlu0 %1724 }
0x1914   :  { %v4837_v5 = vadd.f32 %v1725_v43, %v1717_v38 }
0x1916   :  { %3991 = vtanh.f32 %v4837_v5 }
0x1923   :  { %v3992_v9 = vpop.eup %3991 }
0x1924   :  { %1730 = vrot.lane.b32.xlu0 %v3992_v9, %s4273_s27 }
0x1996   :  { %v1731_v45 = vpop.permute.xlu0 %1730 }
0x1997   :  { %v4841_v46 = vmul.f32 %v3990_v63, %v1731_v45 }
0x1999   :  { %5325 = vst [vmem:[#allocation21_spill] sm:$0xff] %v4841_v46  ;;  %1735 = vrot.lane.b32.xlu0 %v4841_v46, %s4274_s29 }
0x199d   :  { %1811 = vrot.lane.b32.xlu0 %v4837_v5, %s4275_s7 }
0x1a0b   :  { %v1736_v13 = vpop.permute.xlu0 %1735 }
0x1a0c   :  { %3601 = vmatmul.mubr.msk.f32.vlgmr.msra.gmra.mxu1 %vm146_vm0, %v1736_v13 }
0x1a0d   :  { %3803 = vmatpush3.msra.mxu1 %v4848_v53  ;;  %3810 = vmatprep.mubr.msk.f32.mxu1 %vm4272_vm3, %v5320_v4 }
0x1a0e   :  { %3804 = vmatprep.subr.mxu1 %v5320_v4 }
0x1a0f   :  { %v1812_v48 = vpop.permute.xlu0 %1811  ;;  %3805 = vmatpush3.msra.mxu1 %v4854_v49 }
0x1a10   :  { %3800 = vmatmul.mubr.msk.f32.vlgmr.msra.gmra.mxu0 %vm146_vm0, %v1812_v48  ;;  %3806 = vmatprep.subr.mxu1 %v5320_v4 }
0x1a11   :  { %3807 = vmatpush3.msra.mxu1 %v4859_v51  ;;  %2159 = vmatpush1.msra.mxu0 %v4545_v0 }
0x1a12   :  { %3808 = vmatprep.subr.mxu1 %v5320_v4  ;;  %2160 = vmatprep.subr.mxu0 %v4547_v1 }
0x1a13   :  { %3809 = vmatpush3.msra.mxu1 %v4865_v62  ;;  %2161 = vmatpush1.msra.mxu0 %v4550_v2 }
0x1a14   :  { %3813 = vmatprep.subr.mxu1 %v5320_v4  ;;  %2162 = vmatprep.subr.mxu0 %v4554_v14  ;;  %v4881_v14 = vld [vmem:[%s5305_s4] ss:$0 sm:$0xff] }
0x1a15   :  { %2163 = vmatpush1.msra.mxu0 %v4557_v15  ;;  %2198 = vmatprep.mubr.f32.mxu0 %v5320_v4 }
0x1a16   :  { %2164 = vmatprep.subr.mxu0 %v4560_v17 }
0x1a17   :  { %2165 = vmatpush1.msra.mxu0 %v4563_v19 }
0x1a18   :  { %3824 = vmatprep.subr.mxu0 %v5320_v4 }
0x1acc   :  { %v4876_v0 = vpop.f32.mrf.mxu1 }
0x1ace   :  { %v1807_v1 = vpop.f32.mrf.mxu1 }
0x1ad0   :  { %v1881_v52 = vpop.f32.mrf.mxu0 }
0x1ad1   :  { %v1885_v60 = vadd.f32 %v1881_v52, %v1807_v1 }
0x1ad2   :  { %v3801_v2 = vpop.f32.mrf.mxu0 }
0x1ad3   :  { %v1886_v15 = vadd.f32 %v4881_v14, %v1885_v60 }
0x1ad5   :  { %v1894_v61 = vrot.slane %v1886_v15, %v4412_v12 }
0x1ad7   :  { %v1895_v17 = vcombine.high %v1894_v61, %v1894_v61  ;;  %v1902_v19 = vrot.slane %v1894_v61, %v4412_v12  ;;  %v4279_v61 = vmov 4  }
0x1ad9   :  { %v1909_v22 = vrot.slane %v1895_v17, %v4412_v12  ;;  %v1913_v47 = vrot.slane %v1902_v19, %v4422_v16 }
0x1adb   :  { %v1917_v24 = vrot.slane %v1909_v22, %v4422_v16  ;;  %v1920_v55 = vadd.f32 %v1913_v47, %v4431_v23 }
0x1add   :  { %v1921_v25 = vadd.f32 %v4428_v21, %v1917_v24  ;;  %3993 = vtanh.f32 %v1920_v55 }
0x1adf   :  { %3995 = vtanh.f32 %v1921_v25  ;;  %v4913_v25 = vld [vmem:[%s5302_s1] sm:$0x3] }
0x1aea   :  { %v3994_v27 = vpop.eup %3993 }
0x1aeb   :  { %v1924_v7 = vmul.f32 %v4894_v36, %v3994_v27 }
0x1aec   :  { %v3996_v56 = vpop.eup %3995 }
0x1aed   :  { %v1926_v44 = vsel %vm146_vm0, %v1924_v7, 0.0  ;;  %v1925_v58 = vmul.f32 %v4894_v36, %v3996_v56 }
0x1aee   :  { %1927 = vadd.xlane.f32.xlu1 %v1926_v44 }
0x1aef   :  { %v1929_v39 = vsel %vm146_vm0, %v1925_v58, 0.0 }
0x1af0   :  { %1930 = vadd.xlane.f32.xlu0 %v1929_v39 }
0x1b77   :  { %v1928_v59 = vpop.xlane.xlu1 %1927 }
0x1b78   :  { %v1937_v8 = vrot.slane %v1928_v59, %v4447_v34 }
0x1b79   :  { %v1931_v63 = vpop.xlane.xlu0 %1930 }
0x1b7a   :  { %v1941_v57 = vrot.slane %v1931_v63, %v4447_v34 }
0x1b7c   :  { %v1942_v38 = vsel %vm360_vm1, %v1941_v57, %v1937_v8  ;;  %v3452_v57 = vadd.s32 4294967280, %v4443_v32 }
0x1b7d   :  { %v1944_v43 = vsel %vm363_vm2, %v1942_v38, -inf  ;;  %v3441_v38 = vadd.s32 4294967288, %v4443_v32 }
0x1b7e   :  { %1945 = vmax.xlane.f32.xlu0 %v1944_v43  ;;  %v3455_v43 = vsub.s32 %v3452_v57, %v4409_v11 }
0x1c07   :  { %v1946_v9 = vpop.xlane.xlu0 %1945 }
0x1c08   :  { %v1951_v45 = vrot.slane %v1946_v9, %v4422_v16  ;;  %v1955_v13 = vrot.slane %v1946_v9, %v4456_v41  ;;  %v3444_v9 = vsub.s32 %v3441_v38, %v4409_v11 }
0x1c0a   :  { %v1958_v48 = vsub.f32 %v1928_v59, %v1951_v45  ;;  %v1959_v1 = vsub.f32 %v1931_v63, %v1955_v13  ;;  %v3474_v45 = vadd.s32 4294967264, %v4443_v32  ;;  %v3449_v13 = vrot.slane %v4628_v35, %v3444_v9 }
0x1c0c   :  { %v1960_v52 = vmul.f32 1.442695, %v1958_v48  ;;  %v1962_v60 = vmul.f32 1.442695, %v1959_v1  ;;  %v3460_v48 = vrot.slane %v4713_v31, %v3455_v43  ;;  %v3456_v1 = vrot.slane %v4715_v33, %v3455_v43 }
0x1c0e   :  { %3997 = vpow2.f32 %v1960_v52  ;;  %v3438_v52 = vrot.slane %v4497_v18, %v4447_v34  ;;  %v3461_v31 = vsel %vm360_vm1, %v3460_v48, %v3456_v1  ;;  %v4956_v1 = vld [vmem:[#allocation6 + $0x10] sm:$0xff] }
0x1c0f   :  { %3999 = vpow2.f32 %v1962_v60  ;;  %v3445_v60 = vrot.slane %v4623_v28, %v3444_v9 }
0x1c11   :  { %v3450_v35 = vsel %vm360_vm1, %v3449_v13, %v3445_v60  ;;  %v4964_v60 = vld [vmem:[#allocation6] sm:$0xff] }
0x1c1b   :  { %v3998_v2 = vpop.eup %3997 }
0x1c1c   :  { %v4000_v15 = vpop.eup %3999  ;;  %1967 = vperm.xlu1 %3905, %v3998_v2  }
0x1c1d   :  { %1970 = vperm.xlu0 %3912, %v4000_v15  }
0x1c20   :  { %3913 = vset.pattern.permute.xlu1 %v4279_v61 }
0x1c97   :  { %v1968_v17 = vpop.permute.xlu1 %1967 }
0x1c98   :  { %v1971_v19 = vpop.permute.xlu0 %1970  ;;  %v1975_v22 = vrot.slane %v1968_v17, %v4447_v34  ;;  %v3434_v17 = vrot.slane %v4492_v10, %v4447_v34 }
0x1c99   :  { %v1979_v47 = vrot.slane %v1971_v19, %v4447_v34 }
0x1c9a   :  { %v3439_v18 = vsel %vm360_vm1, %v3438_v52, %v3434_v17  ;;  %v4960_v52 = vld [vmem:[#allocation6 + $0x8] sm:$0xff] }
0x1c9b   :  { %v1980_v24 = vsel %vm360_vm1, %v1979_v47, %v1975_v22  ;;  %v3519_v22 = vsel %vm3518_vm4, %v3439_v18, %v3450_v35  ;;  %v4979_v35 = vld [vmem:[%s5310_s9] ss:$0 sm:$0xff] }
0x1c9c   :  { %v1982_v55 = vsel %vm363_vm2, %v1980_v24, 0.0 }
0x1c9d   :  { %1983 = vadd.xlane.f32.xlu1 %v1982_v55 }
0x1cae   :  { %267 = vperm.xlu1 %3913, %v4913_v25  }
0x1cb2   :  { %3914 = vset.pattern.permute.xlu1 %v5318_v40 }
0x1d26   :  { %v1984_v27 = vpop.xlane.xlu1 %1983 }
0x1d27   :  { %4001 = vrcp.f32 %v1984_v27 }
0x1d34   :  { %v4002_v7 = vpop.eup %4001 }
0x1d35   :  { %v1986_v56 = vmul.f32 %v4002_v7, %v1984_v27  ;;  %v3521_v27 = vsel %vm3520_vm5, %v3519_v22, %v3461_v31 }
0x1d37   :  { %v1987_v44 = vsub.f32 2.0, %v1986_v56 }
0x1d39   :  { %v1988_v58 = vmul.f32 %v4002_v7, %v1987_v44  ;;  %v3523_v7 = vsel %vm3522_vm6, %v3521_v27, %v4814_v30  ;;  %v4950_v30 = vld [vmem:[#allocation6 + $0x18] sm:$0xff] }
0x1d3b   :  { %v1993_v39 = vrot.slane %v1988_v58, %v4422_v16  ;;  %v1997_v63 = vrot.slane %v1988_v58, %v4456_v41 }
0x1d3d   :  { %v2000_v59 = vmul.f32 %v3998_v2, %v1993_v39  ;;  %v2001_v8 = vmul.f32 %v4000_v15, %v1997_v63  ;;  %v3477_v15 = vsub.s32 %v3474_v45, %v4409_v11 }
0x1d3f   :  { %2004 = vperm.xlu0 %3912, %v2000_v59  }
0x1d43   :  { %2009 = vperm.xlu0 %3912, %v2001_v8  }
0x1dba   :  { %v2005_v2 = vpop.permute.xlu0 %2004 }
0x1dbb   :  { %v2012_v61 = vmul.f32 %v4805_v29, %v2005_v2  ;;  %v3478_v47 = vrot.slane %v2005_v2, %v3477_v15  ;;  %v4967_v2 = vld [vmem:[#allocation9 + $0x38] sm:$0xff] }
0x1dbd   :  { %v2014_v33 = vsel %vm146_vm0, %v2012_v61, 0.0  ;;  %v4973_v61 = vld [vmem:[%s5307_s6] ss:$0 sm:$0xff] }
0x1dbe   :  { %v2015_v28 = vrot.slane %v2014_v33, 4  ;;  %v2010_v19 = vpop.permute.xlu0 %2009 }
0x1dbf   :  { %v2013_v24 = vmul.f32 %v4809_v42, %v2010_v19  ;;  %v3482_v55 = vrot.slane %v2010_v19, %v3477_v15  ;;  %v268_v15 = vpop.permute.xlu1 %267 }
0x1dc0   :  { %v2016_v10 = vadd.f32 %v2015_v28, %v2014_v33  ;;  %v270_v17 = vmul.f32 %v4973_v61, %v268_v15 }
0x1dc1   :  { %v2021_v56 = vsel %vm146_vm0, %v2013_v24, 0.0  ;;  %v3483_v44 = vsel %vm360_vm1, %v3482_v55, %v3478_v47 }
0x1dc2   :  { %v2017_v58 = vrot.slane %v2016_v10, 2  ;;  %v2022_v39 = vrot.slane %v2021_v56, 4  ;;  %v4943_v59 = vsel %vm146_vm0, %v3523_v7, %v3483_v44  ;;  %v271_v31 = vadd.f32 %v4979_v35, %v270_v17 }
0x1dc4   :  { %v2018_v63 = vadd.f32 %v2017_v58, %v2016_v10  ;;  %v2023_v8 = vadd.f32 %v2022_v39, %v2021_v56  ;;  %v2028_v33 = vadd.f32 %v4876_v0, %v271_v31 }
0x1dc6   :  { %v2024_v57 = vrot.slane %v2023_v8, 2  ;;  %v2019_v38 = vrot.slane %v2018_v63, 1 }
0x1dc8   :  { %v2025_v43 = vadd.f32 %v2024_v57, %v2023_v8  ;;  %v2020_v45 = vadd.f32 %v2019_v38, %v2018_v63  ;;  %v4993_v63 = vld [vmem:[#allocation9 + $0x30] sm:$0xff]  ;;  %v5000_v8 = vld [vmem:[#allocation9 + $0x20] sm:$0xff]  ;;  %v5003_v57 = vld [vmem:[#allocation9 + $0x18] sm:$0xff] }
0x1dc9   :  { %v5006_v38 = vld [vmem:[#allocation9 + $0x10] sm:$0xff] }
0x1dca   :  { %v2026_v9 = vrot.slane %v2025_v43, 1 }
0x1dcc   :  { %v2027_v13 = vadd.f32 %v2026_v9, %v2025_v43  ;;  %v5009_v43 = vld [vmem:[#allocation9 + $0x8] sm:$0xff]  ;;  %v5012_v9 = vld [vmem:[#allocation9] sm:$0xff] }
0x1dce   :  { %v4946_v48 = vsel %vm360_vm1, %v2027_v13, %v2020_v45 }
0x1dcf   :  { %3811 = vmatmul.mubr.msk.f32.vlgmr.msra.gmra.mxu1 %vm146_vm0, %v4946_v48 }
0x1dd0   :  { %3814 = vmatpush3.msra.mxu1 %v4950_v30  ;;  %3821 = vmatprep.mubr.msk.f32.mxu1 %vm4272_vm3, %v5320_v4 }
0x1dd1   :  { %3815 = vmatprep.subr.mxu1 %v5320_v4 }
0x1dd2   :  { %3816 = vmatpush3.msra.mxu1 %v4956_v1 }
0x1dd3   :  { %3817 = vmatprep.subr.mxu1 %v5320_v4 }
0x1dd4   :  { %3818 = vmatpush3.msra.mxu1 %v4960_v52 }
0x1dd5   :  { %3819 = vmatprep.subr.mxu1 %v5320_v4 }
0x1dd6   :  { %3820 = vmatpush3.msra.mxu1 %v4964_v60 }
0x1dd7   :  { %2553 = vmatprep.subr.mxu1 %v4967_v2 }
0x1e8f   :  { %v2100_v18 = vpop.f32.mrf.mxu1 }
0x1e90   :  { %v2104_v28 = vadd.f32 %v2100_v18, %v2028_v33 }
0x1e91   :  { %v3812_v19 = vpop.f32.mrf.mxu1 }
0x1e92   :  { %4003 = vtanh.f32 %v2104_v28  ;;  %v3604_v47 = vmul.f32 -1.442695, %v2104_v28 }
0x1e94   :  { %4005 = vpow2.f32 %v3604_v47 }
0x1e9f   :  { %v4004_v22 = vpop.eup %4003 }
0x1ea0   :  { %2114 = vrot.lane.b32.xlu0 %v4004_v22, %s4273_s27 }
0x1ea1   :  { %v4006_v24 = vpop.eup %4005 }
0x1ea2   :  { %v2108_v55 = vadd.f32 1.0, %v4006_v24 }
0x1ea4   :  { %4007 = vrcp.f32 %v2108_v55 }
0x1eb1   :  { %v4008_v27 = vpop.eup %4007 }
0x1eb2   :  { %v2112_v56 = vmul.f32 %v4008_v27, %v4837_v5  ;;  %v4997_v5 = vld [vmem:[#allocation9 + $0x28] sm:$0xff] }
0x1f12   :  { %v2115_v10 = vpop.permute.xlu0 %2114 }
0x1f13   :  { %v2117_v7 = vmul.f32 %v4008_v27, %v2115_v10 }
0x1f15   :  { %2119 = vrot.lane.b32.xlu0 %v2117_v7, %s4274_s29 }
0x1f87   :  { %v2120_v0 = vpop.permute.xlu0 %2119 }
0x1f88   :  { %v4986_v44 = vadd.f32 %v2120_v0, %v2112_v56 }
0x1f8a   :  { %4009 = vtanh.f32 %v4986_v44  ;;  %2206 = vrot.lane.b32.xlu1 %v4986_v44, %s4275_s7 }
0x1f97   :  { %v4010_v58 = vpop.eup %4009 }
0x1f98   :  { %2125 = vrot.lane.b32.xlu0 %v4010_v58, %s4273_s27 }
0x1ffc   :  { %v2207_v39 = vpop.permute.xlu1 %2206 }
0x1ffd   :  { %3822 = vmatmul.mubr.msk.f32.vlgmr.msra.gmra.mxu1 %vm146_vm0, %v2207_v39 }
0x1ffe   :  { %2554 = vmatpush1.msra.mxu1 %v4993_v63  ;;  %2593 = vmatprep.mubr.f32.mxu1 %v5320_v4 }
0x1fff   :  { %2555 = vmatprep.subr.mxu1 %v4997_v5 }
0x2000   :  { %2556 = vmatpush1.msra.mxu1 %v5000_v8 }
0x2001   :  { %2557 = vmatprep.subr.mxu1 %v5003_v57 }
0x2002   :  { %2558 = vmatpush1.msra.mxu1 %v5006_v38 }
0x2003   :  { %2559 = vmatprep.subr.mxu1 %v5009_v43 }
0x2004   :  { %2560 = vmatpush1.msra.mxu1 %v5012_v9 }
0x2005   :  { %3846 = vmatprep.subr.mxu1 %v5320_v4 }
0x200a   :  { %v2126_v45 = vpop.permute.xlu0 %2125 }
0x200b   :  { %v2128_v13 = vmul.f32 %v4008_v27, %v2126_v45 }
0x200d   :  { %2130 = vrot.lane.b32.xlu0 %v2128_v13, %s4274_s29 }
0x207f   :  { %v5017_v15 = vpop.permute.xlu0 %2130 }
0x2080   :  { %3605 = vmatmul.mubr.msk.f32.vlgmr.msra.gmra.mxu0 %vm146_vm0, %v5017_v15 }
0x2081   :  { %3825 = vmatpush3.msra.mxu0 %v4848_v53  ;;  %3832 = vmatprep.mubr.msk.f32.mxu0 %vm4272_vm3, %v5320_v4 }
0x2082   :  { %3826 = vmatprep.subr.mxu0 %v5320_v4 }
0x2083   :  { %3827 = vmatpush3.msra.mxu0 %v4854_v49 }
0x2084   :  { %3828 = vmatprep.subr.mxu0 %v5320_v4 }
0x2085   :  { %3829 = vmatpush3.msra.mxu0 %v4859_v51 }
0x2086   :  { %3830 = vmatprep.subr.mxu0 %v5320_v4 }
0x2087   :  { %3831 = vmatpush3.msra.mxu0 %v4865_v62 }
0x2088   :  { %3835 = vmatprep.subr.mxu0 %v5320_v4 }
0x20bd   :  { %v2276_v17 = vpop.f32.mrf.mxu1 }
0x20bf   :  { %v3823_v31 = vpop.f32.mrf.mxu1 }
0x2140   :  { %v5031_v33 = vpop.f32.mrf.mxu0 }
0x2142   :  { %v2202_v18 = vpop.f32.mrf.mxu0 }
0x2143   :  { %v2280_v28 = vadd.f32 %v2276_v17, %v2202_v18 }
0x2145   :  { %v2281_v19 = vadd.f32 %v4881_v14, %v2280_v28 }
0x2147   :  { %v2289_v22 = vrot.slane %v2281_v19, %v4412_v12 }
0x2149   :  { %v2290_v47 = vcombine.high %v2289_v22, %v2289_v22  ;;  %v2297_v24 = vrot.slane %v2289_v22, %v4412_v12 }
0x214b   :  { %v2304_v55 = vrot.slane %v2290_v47, %v4412_v12  ;;  %v2308_v27 = vrot.slane %v2297_v24, %v4422_v16 }
0x214d   :  { %v2312_v10 = vrot.slane %v2304_v55, %v4422_v16  ;;  %v2315_v7 = vadd.f32 %v2308_v27, %v4431_v23 }
0x214f   :  { %v2316_v56 = vadd.f32 %v4428_v21, %v2312_v10  ;;  %4011 = vtanh.f32 %v2315_v7 }
0x2151   :  { %4013 = vtanh.f32 %v2316_v56 }
0x215c   :  { %v4012_v0 = vpop.eup %4011 }
0x215d   :  { %v2319_v58 = vmul.f32 %v4894_v36, %v4012_v0 }
0x215e   :  { %v4014_v39 = vpop.eup %4013 }
0x215f   :  { %v2321_v45 = vsel %vm146_vm0, %v2319_v58, 0.0  ;;  %v2320_v13 = vmul.f32 %v4894_v36, %v4014_v39 }
0x2160   :  { %2322 = vadd.xlane.f32.xlu0 %v2321_v45 }
0x2161   :  { %v2324_v17 = vsel %vm146_vm0, %v2320_v13, 0.0 }
0x2162   :  { %2325 = vadd.xlane.f32.xlu1 %v2324_v17 }
0x21e9   :  { %v2323_v31 = vpop.xlane.xlu0 %2322 }
0x21ea   :  { %v2332_v28 = vrot.slane %v2323_v31, %v4447_v34 }
0x21eb   :  { %v2326_v18 = vpop.xlane.xlu1 %2325 }
0x21ec   :  { %v2336_v19 = vrot.slane %v2326_v18, %v4447_v34 }
0x21ee   :  { %v2337_v22 = vsel %vm360_vm1, %v2336_v19, %v2332_v28 }
0x21ef   :  { %v2339_v47 = vsel %vm363_vm2, %v2337_v22, -inf }
0x21f0   :  { %2340 = vmax.xlane.f32.xlu0 %v2339_v47 }
0x2279   :  { %v2341_v24 = vpop.xlane.xlu0 %2340 }
0x227a   :  { %v2346_v55 = vrot.slane %v2341_v24, %v4422_v16  ;;  %v2350_v27 = vrot.slane %v2341_v24, %v4456_v41 }
0x227c   :  { %v2353_v10 = vsub.f32 %v2323_v31, %v2346_v55  ;;  %v2354_v7 = vsub.f32 %v2326_v18, %v2350_v27 }
0x227e   :  { %v2355_v56 = vmul.f32 1.442695, %v2353_v10  ;;  %v2357_v0 = vmul.f32 1.442695, %v2354_v7 }
0x2280   :  { %4015 = vpow2.f32 %v2355_v56 }
0x2281   :  { %4017 = vpow2.f32 %v2357_v0  ;;  %v4280_v0 = vmov 5  }
0x228d   :  { %v4016_v58 = vpop.eup %4015 }
0x228e   :  { %v4018_v39 = vpop.eup %4017  ;;  %2362 = vperm.xlu0 %3912, %v4016_v58  }
0x228f   :  { %2365 = vperm.xlu1 %3914, %v4018_v39  }
0x2309   :  { %v2363_v45 = vpop.permute.xlu0 %2362 }
0x230a   :  { %v2366_v13 = vpop.permute.xlu1 %2365  ;;  %v2370_v17 = vrot.slane %v2363_v45, %v4447_v34  ;;  %v3485_v45 = vadd.s32 4294967256, %v4443_v32 }
0x230b   :  { %v2374_v28 = vrot.slane %v2366_v13, %v4447_v34 }
0x230d   :  { %v2375_v19 = vsel %vm360_vm1, %v2374_v28, %v2370_v17  ;;  %v3488_v17 = vsub.s32 %v3485_v45, %v4409_v11 }
0x230e   :  { %v2377_v22 = vsel %vm363_vm2, %v2375_v19, 0.0 }
0x230f   :  { %2378 = vadd.xlane.f32.xlu1 %v2377_v22 }
0x2398   :  { %v2379_v31 = vpop.xlane.xlu1 %2378 }
0x2399   :  { %4019 = vrcp.f32 %v2379_v31 }
0x23a6   :  { %v4020_v18 = vpop.eup %4019 }
0x23a7   :  { %v2381_v47 = vmul.f32 %v4020_v18, %v2379_v31 }
0x23a9   :  { %v2382_v24 = vsub.f32 2.0, %v2381_v47 }
0x23ab   :  { %v2383_v55 = vmul.f32 %v4020_v18, %v2382_v24 }
0x23ad   :  { %v2388_v27 = vrot.slane %v2383_v55, %v4422_v16  ;;  %v2392_v7 = vrot.slane %v2383_v55, %v4456_v41 }
0x23af   :  { %v2395_v10 = vmul.f32 %v4016_v58, %v2388_v27  ;;  %v2396_v56 = vmul.f32 %v4018_v39, %v2392_v7 }
0x23b1   :  { %2399 = vperm.xlu0 %3912, %v2395_v10  }
0x23b5   :  { %2404 = vperm.xlu0 %3912, %v2396_v56  }
0x23b9   :  { %3915 = vset.pattern.permute.xlu0 %v4280_v0 }
0x23ba   :  { %273 = vperm.xlu0 %3915, %v4913_v25  }
0x23be   :  { %3916 = vset.pattern.permute.xlu0 %v5318_v40 }
0x242c   :  { %v2400_v13 = vpop.permute.xlu0 %2399 }
0x242d   :  { %v2407_v28 = vmul.f32 %v4805_v29, %v2400_v13  ;;  %v3489_v31 = vrot.slane %v2400_v13, %v3488_v17 }
0x242f   :  { %v2409_v58 = vsel %vm146_vm0, %v2407_v28, 0.0 }
0x2430   :  { %v2410_v19 = vrot.slane %v2409_v58, 4  ;;  %v2405_v22 = vpop.permute.xlu0 %2404 }
0x2431   :  { %v2408_v39 = vmul.f32 %v4809_v42, %v2405_v22  ;;  %v3493_v18 = vrot.slane %v2405_v22, %v3488_v17 }
0x2432   :  { %v2411_v47 = vadd.f32 %v2410_v19, %v2409_v58  ;;  %v5326_v58 = vmov 0.0  }
0x2433   :  { %v2416_v24 = vsel %vm146_vm0, %v2408_v39, 0.0  ;;  %v3494_v55 = vsel %vm360_vm1, %v3493_v18, %v3489_v31 }
0x2434   :  { %v2412_v27 = vrot.slane %v2411_v47, 2  ;;  %v2417_v10 = vrot.slane %v2416_v24, 4  ;;  %v5067_v7 = vsel %vm3525_vm7, %v4943_v59, %v3494_v55 }
0x2436   :  { %v2413_v56 = vadd.f32 %v2412_v27, %v2411_v47  ;;  %v2418_v0 = vadd.f32 %v2417_v10, %v2416_v24 }
0x2438   :  { %v2419_v45 = vrot.slane %v2418_v0, 2  ;;  %v2414_v28 = vrot.slane %v2413_v56, 1 }
0x243a   :  { %v2420_v40 = vadd.f32 %v2419_v45, %v2418_v0  ;;  %v2415_v4 = vadd.f32 %v2414_v28, %v2413_v56 }
0x243c   :  { %v2421_v13 = vrot.slane %v2420_v40, 1 }
0x243e   :  { %v2422_v46 = vadd.f32 %v2421_v13, %v2420_v40  ;;  %v274_v40 = vpop.permute.xlu0 %273 }
0x2440   :  { %v5070_v17 = vsel %vm360_vm1, %v2422_v46, %v2415_v4  ;;  %v276_v4 = vmul.f32 %v4973_v61, %v274_v40 }
0x2441   :  { %3833 = vmatmul.mubr.msk.f32.vlgmr.msra.gmra.mxu0 %vm146_vm0, %v5070_v17 }
0x2442   :  { %3836 = vmatpush3.msra.mxu0 %v4950_v30  ;;  %3843 = vmatprep.mubr.msk.f32.mxu0 %vm4272_vm3, %v5326_v58  ;;  %v277_v46 = vadd.f32 %v4979_v35, %v276_v4 }
0x2443   :  { %3837 = vmatprep.subr.mxu0 %v5326_v58 }
0x2444   :  { %3838 = vmatpush3.msra.mxu0 %v4956_v1  ;;  %v2423_v59 = vadd.f32 %v5031_v33, %v277_v46 }
0x2445   :  { %3839 = vmatprep.subr.mxu0 %v5326_v58 }
0x2446   :  { %3840 = vmatpush3.msra.mxu0 %v4960_v52 }
0x2447   :  { %3841 = vmatprep.subr.mxu0 %v5326_v58 }
0x2448   :  { %3842 = vmatpush3.msra.mxu0 %v4964_v60 }
0x2449   :  { %2948 = vmatprep.subr.mxu0 %v4967_v2 }
0x2501   :  { %v2495_v19 = vpop.f32.mrf.mxu0 }
0x2502   :  { %v2499_v22 = vadd.f32 %v2495_v19, %v2423_v59 }
0x2503   :  { %v3834_v31 = vpop.f32.mrf.mxu0 }
0x2504   :  { %4021 = vtanh.f32 %v2499_v22  ;;  %v3608_v18 = vmul.f32 -1.442695, %v2499_v22 }
0x2506   :  { %4023 = vpow2.f32 %v3608_v18 }
0x2511   :  { %v4022_v39 = vpop.eup %4021 }
0x2512   :  { %2509 = vrot.lane.b32.xlu0 %v4022_v39, %s4273_s27 }
0x2513   :  { %v4024_v47 = vpop.eup %4023 }
0x2514   :  { %v2503_v24 = vadd.f32 1.0, %v4024_v47 }
0x2516   :  { %4025 = vrcp.f32 %v2503_v24 }
0x2523   :  { %v4026_v2 = vpop.eup %4025 }
0x2524   :  { %v2507_v10 = vmul.f32 %v4026_v2, %v4986_v44 }
0x2584   :  { %v2510_v55 = vpop.permute.xlu0 %2509 }
0x2585   :  { %v2512_v27 = vmul.f32 %v4026_v2, %v2510_v55 }
0x2587   :  { %2514 = vrot.lane.b32.xlu0 %v2512_v27, %s4274_s29 }
0x25f9   :  { %v2515_v33 = vpop.permute.xlu0 %2514 }
0x25fa   :  { %v5090_v56 = vadd.f32 %v2515_v33, %v2507_v10 }
0x25fc   :  { %4027 = vtanh.f32 %v5090_v56 }
0x2609   :  { %v4028_v0 = vpop.eup %4027 }
0x260a   :  { %2520 = vrot.lane.b32.xlu0 %v4028_v0, %s4273_s27 }
0x267c   :  { %v2521_v45 = vpop.permute.xlu0 %2520 }
0x267d   :  { %v5094_v28 = vmul.f32 %v4026_v2, %v2521_v45 }
0x267f   :  { %2525 = vrot.lane.b32.xlu0 %v5094_v28, %s4274_s29 }
0x2683   :  { %2601 = vrot.lane.b32.xlu0 %v5090_v56, %s4275_s7 }
0x26f1   :  { %v2526_v13 = vpop.permute.xlu0 %2525 }
0x26f2   :  { %3609 = vmatmul.mubr.msk.f32.vlgmr.msra.gmra.mxu1 %vm146_vm0, %v2526_v13 }
0x26f3   :  { %3847 = vmatpush3.msra.mxu1 %v4848_v53  ;;  %3854 = vmatprep.mubr.msk.f32.mxu1 %vm4272_vm3, %v5326_v58 }
0x26f4   :  { %3848 = vmatprep.subr.mxu1 %v5326_v58 }
0x26f5   :  { %v2602_v44 = vpop.permute.xlu0 %2601  ;;  %3849 = vmatpush3.msra.mxu1 %v4854_v49 }
0x26f6   :  { %3844 = vmatmul.mubr.msk.f32.vlgmr.msra.gmra.mxu0 %vm146_vm0, %v2602_v44  ;;  %3850 = vmatprep.subr.mxu1 %v5326_v58 }
0x26f7   :  { %3851 = vmatpush3.msra.mxu1 %v4859_v51  ;;  %2949 = vmatpush1.msra.mxu0 %v4993_v63 }
0x26f8   :  { %3852 = vmatprep.subr.mxu1 %v5326_v58  ;;  %2950 = vmatprep.subr.mxu0 %v4997_v5 }
0x26f9   :  { %3853 = vmatpush3.msra.mxu1 %v4865_v62  ;;  %2951 = vmatpush1.msra.mxu0 %v5000_v8 }
0x26fa   :  { %3857 = vmatprep.subr.mxu1 %v5326_v58  ;;  %2952 = vmatprep.subr.mxu0 %v5003_v57 }
0x26fb   :  { %2953 = vmatpush1.msra.mxu0 %v5006_v38  ;;  %2988 = vmatprep.mubr.f32.mxu0 %v5326_v58 }
0x26fc   :  { %2954 = vmatprep.subr.mxu0 %v5009_v43 }
0x26fd   :  { %2955 = vmatpush1.msra.mxu0 %v5012_v9 }
0x26fe   :  { %3868 = vmatprep.subr.mxu0 %v5326_v58 }
0x27b2   :  { %v5121_v63 = vpop.f32.mrf.mxu1 }
0x27b4   :  { %v2597_v5 = vpop.f32.mrf.mxu1 }
0x27b6   :  { %v2671_v40 = vpop.f32.mrf.mxu0 }
0x27b7   :  { %v2675_v4 = vadd.f32 %v2671_v40, %v2597_v5 }
0x27b8   :  { %v3845_v8 = vpop.f32.mrf.mxu0 }
0x27b9   :  { %v2676_v46 = vadd.f32 %v4881_v14, %v2675_v4 }
0x27bb   :  { %v2684_v57 = vrot.slane %v2676_v46, %v4412_v12 }
0x27bd   :  { %v2685_v59 = vcombine.high %v2684_v57, %v2684_v57  ;;  %v2692_v38 = vrot.slane %v2684_v57, %v4412_v12 }
0x27bf   :  { %v2699_v19 = vrot.slane %v2685_v59, %v4412_v12  ;;  %v2703_v43 = vrot.slane %v2692_v38, %v4422_v16 }
0x27c1   :  { %v2707_v9 = vrot.slane %v2699_v19, %v4422_v16  ;;  %v2710_v22 = vadd.f32 %v2703_v43, %v4431_v23 }
0x27c3   :  { %v2711_v31 = vadd.f32 %v4428_v21, %v2707_v9  ;;  %4029 = vtanh.f32 %v2710_v22 }
0x27c5   :  { %4031 = vtanh.f32 %v2711_v31 }
0x27d0   :  { %v4030_v39 = vpop.eup %4029 }
0x27d1   :  { %v2714_v18 = vmul.f32 %v4894_v36, %v4030_v39 }
0x27d2   :  { %v4032_v47 = vpop.eup %4031 }
0x27d3   :  { %v2716_v24 = vsel %vm146_vm0, %v2714_v18, 0.0  ;;  %v2715_v2 = vmul.f32 %v4894_v36, %v4032_v47 }
0x27d4   :  { %2717 = vadd.xlane.f32.xlu1 %v2716_v24 }
0x27d5   :  { %v2719_v55 = vsel %vm146_vm0, %v2715_v2, 0.0 }
0x27d6   :  { %2720 = vadd.xlane.f32.xlu0 %v2719_v55 }
0x285d   :  { %v2718_v27 = vpop.xlane.xlu1 %2717 }
0x285e   :  { %v2727_v33 = vrot.slane %v2718_v27, %v4447_v34 }
0x285f   :  { %v2721_v10 = vpop.xlane.xlu0 %2720 }
0x2860   :  { %v2731_v0 = vrot.slane %v2721_v10, %v4447_v34 }
0x2862   :  { %v2732_v45 = vsel %vm360_vm1, %v2731_v0, %v2727_v33 }
0x2863   :  { %v2734_v13 = vsel %vm363_vm2, %v2732_v45, -inf  ;;  %v4281_v45 = vmov 6  }
0x2864   :  { %2735 = vmax.xlane.f32.xlu1 %v2734_v13  ;;  %v5327_v13 = vmov 0  }
0x28ed   :  { %v2736_v44 = vpop.xlane.xlu1 %2735 }
0x28ee   :  { %v2741_v5 = vrot.slane %v2736_v44, %v4422_v16  ;;  %v2745_v40 = vrot.slane %v2736_v44, %v4456_v41  ;;  %v3496_v44 = vadd.s32 4294967248, %v4443_v32 }
0x28f0   :  { %v2748_v4 = vsub.f32 %v2718_v27, %v2741_v5  ;;  %v2749_v8 = vsub.f32 %v2721_v10, %v2745_v40  ;;  %v3499_v5 = vsub.s32 %v3496_v44, %v4409_v11 }
0x28f2   :  { %v2750_v46 = vmul.f32 1.442695, %v2748_v4  ;;  %v2752_v57 = vmul.f32 1.442695, %v2749_v8 }
0x28f4   :  { %4033 = vpow2.f32 %v2750_v46 }
0x28f5   :  { %4035 = vpow2.f32 %v2752_v57 }
0x2901   :  { %v4034_v59 = vpop.eup %4033 }
0x2902   :  { %2757 = vperm.xlu1 %3914, %v4034_v59   ;;  %v4036_v38 = vpop.eup %4035 }
0x2906   :  { %2760 = vperm.xlu1 %3914, %v4036_v38  }
0x297d   :  { %v2758_v19 = vpop.permute.xlu1 %2757 }
0x297e   :  { %v2765_v9 = vrot.slane %v2758_v19, %v4447_v34 }
0x2981   :  { %v2761_v43 = vpop.permute.xlu1 %2760 }
0x2982   :  { %v2769_v22 = vrot.slane %v2761_v43, %v4447_v34 }
0x2984   :  { %v2770_v31 = vsel %vm360_vm1, %v2769_v22, %v2765_v9 }
0x2985   :  { %v2772_v39 = vsel %vm363_vm2, %v2770_v31, 0.0 }
0x2986   :  { %2773 = vadd.xlane.f32.xlu1 %v2772_v39 }
0x2a0f   :  { %v2774_v18 = vpop.xlane.xlu1 %2773 }
0x2a10   :  { %4037 = vrcp.f32 %v2774_v18 }
0x2a1d   :  { %v4038_v47 = vpop.eup %4037 }
0x2a1e   :  { %v2776_v24 = vmul.f32 %v4038_v47, %v2774_v18 }
0x2a20   :  { %v2777_v2 = vsub.f32 2.0, %v2776_v24 }
0x2a22   :  { %v2778_v55 = vmul.f32 %v4038_v47, %v2777_v2 }
0x2a24   :  { %v2783_v27 = vrot.slane %v2778_v55, %v4422_v16  ;;  %v2787_v10 = vrot.slane %v2778_v55, %v4456_v41 }
0x2a26   :  { %v2791_v33 = vmul.f32 %v4036_v38, %v2787_v10  ;;  %v2790_v0 = vmul.f32 %v4034_v59, %v2783_v27 }
0x2a28   :  { %2799 = vperm.xlu1 %3914, %v2791_v33   ;;  %2794 = vperm.xlu0 %3916, %v2790_v0  }
0x2a2c   :  { %3917 = vset.pattern.permute.xlu0 %v4281_v45 }
0x2a2d   :  { %279 = vperm.xlu0 %3917, %v4913_v25  }
0x2a31   :  { %3918 = vset.pattern.permute.xlu0 %v5327_v13 }
0x2aa3   :  { %v2800_v40 = vpop.permute.xlu1 %2799  ;;  %v2795_v4 = vpop.permute.xlu0 %2794 }
0x2aa4   :  { %v2803_v8 = vmul.f32 %v4809_v42, %v2800_v40  ;;  %v3504_v46 = vrot.slane %v2800_v40, %v3499_v5  ;;  %v2802_v57 = vmul.f32 %v4805_v29, %v2795_v4  ;;  %v3500_v59 = vrot.slane %v2795_v4, %v3499_v5 }
0x2aa6   :  { %v2811_v38 = vsel %vm146_vm0, %v2803_v8, 0.0  ;;  %v2804_v19 = vsel %vm146_vm0, %v2802_v57, 0.0  ;;  %v3505_v43 = vsel %vm360_vm1, %v3504_v46, %v3500_v59 }
0x2aa7   :  { %v2812_v9 = vrot.slane %v2811_v38, 4  ;;  %v2805_v22 = vrot.slane %v2804_v19, 4  ;;  %v5157_v31 = vsel %vm3527_vm8, %v5067_v7, %v3505_v43 }
0x2aa8   :  { %v280_v7 = vpop.permute.xlu0 %279 }
0x2aa9   :  { %v2813_v39 = vadd.f32 %v2812_v9, %v2811_v38  ;;  %v2806_v18 = vadd.f32 %v2805_v22, %v2804_v19  ;;  %v282_v0 = vmul.f32 %v4973_v61, %v280_v7 }
0x2aab   :  { %v2814_v47 = vrot.slane %v2813_v39, 2  ;;  %v2807_v24 = vrot.slane %v2806_v18, 2 }
0x2aad   :  { %v2815_v42 = vadd.f32 %v2814_v47, %v2813_v39  ;;  %v2808_v2 = vadd.f32 %v2807_v24, %v2806_v18 }
0x2aaf   :  { %v2816_v55 = vrot.slane %v2815_v42, 1  ;;  %v2809_v29 = vrot.slane %v2808_v2, 1 }
0x2ab1   :  { %v2817_v27 = vadd.f32 %v2816_v55, %v2815_v42  ;;  %v2810_v10 = vadd.f32 %v2809_v29, %v2808_v2 }
0x2ab3   :  { %v5160_v33 = vsel %vm360_vm1, %v2817_v27, %v2810_v10 }
0x2ab4   :  { %3855 = vmatmul.mubr.msk.f32.vlgmr.msra.gmra.mxu1 %vm146_vm0, %v5160_v33 }
0x2ab5   :  { %3858 = vmatpush3.msra.mxu1 %v4950_v30  ;;  %3865 = vmatprep.mubr.msk.f32.mxu1 %vm4272_vm3, %v5326_v58  ;;  %v283_v30 = vadd.f32 %v4979_v35, %v282_v0 }
0x2ab6   :  { %3859 = vmatprep.subr.mxu1 %v5326_v58 }
0x2ab7   :  { %3860 = vmatpush3.msra.mxu1 %v4956_v1  ;;  %v2818_v45 = vadd.f32 %v5121_v63, %v283_v30 }
0x2ab8   :  { %3861 = vmatprep.subr.mxu1 %v5326_v58 }
0x2ab9   :  { %3862 = vmatpush3.msra.mxu1 %v4960_v52 }
0x2aba   :  { %3863 = vmatprep.subr.mxu1 %v5326_v58 }
0x2abb   :  { %3864 = vmatpush3.msra.mxu1 %v4964_v60 }
0x2b74   :  { %v2890_v44 = vpop.f32.mrf.mxu1 }
0x2b75   :  { %v2894_v5 = vadd.f32 %v2890_v44, %v2818_v45 }
0x2b76   :  { %v3856_v40 = vpop.f32.mrf.mxu1 }
0x2b77   :  { %4039 = vtanh.f32 %v2894_v5  ;;  %v3612_v4 = vmul.f32 -1.442695, %v2894_v5 }
0x2b79   :  { %4041 = vpow2.f32 %v3612_v4 }
0x2b84   :  { %v4040_v1 = vpop.eup %4039 }
0x2b85   :  { %2904 = vrot.lane.b32.xlu1 %v4040_v1, %s4273_s27 }
0x2b86   :  { %v4042_v52 = vpop.eup %4041 }
0x2b87   :  { %v2898_v8 = vadd.f32 1.0, %v4042_v52 }
0x2b89   :  { %4043 = vrcp.f32 %v2898_v8 }
0x2b96   :  { %v4044_v60 = vpop.eup %4043 }
0x2b97   :  { %v2902_v59 = vmul.f32 %v4044_v60, %v5090_v56 }
0x2bf7   :  { %v2905_v46 = vpop.permute.xlu1 %2904 }
0x2bf8   :  { %v2907_v57 = vmul.f32 %v4044_v60, %v2905_v46 }
0x2bfa   :  { %2909 = vrot.lane.b32.xlu0 %v2907_v57, %s4274_s29 }
0x2c6c   :  { %v2910_v63 = vpop.permute.xlu0 %2909 }
0x2c6d   :  { %v5179_v38 = vadd.f32 %v2910_v63, %v2902_v59 }
0x2c6f   :  { %4045 = vtanh.f32 %v5179_v38 }
0x2c7c   :  { %v4046_v19 = vpop.eup %4045 }
0x2c7d   :  { %2915 = vrot.lane.b32.xlu1 %v4046_v19, %s4273_s27 }
0x2c81   :  { %2996 = vrot.lane.b32.xlu1 %v5179_v38, %s4275_s7 }
0x2cef   :  { %v2916_v43 = vpop.permute.xlu1 %2915 }
0x2cf0   :  { %v5185_v9 = vmul.f32 %v4044_v60, %v2916_v43 }
0x2cf2   :  { %2920 = vrot.lane.b32.xlu0 %v5185_v9, %s4274_s29 }
0x2cf3   :  { %v2997_v22 = vpop.permute.xlu1 %2996 }
0x2cf4   :  { %3866 = vmatmul.mubr.msk.f32.vlgmr.msra.gmra.mxu1 %vm146_vm0, %v2997_v22 }
0x2d64   :  { %v2921_v56 = vpop.permute.xlu0 %2920 }
0x2d65   :  { %3613 = vmatmul.mubr.msk.f32.vlgmr.msra.gmra.mxu0 %vm146_vm0, %v2921_v56 }
0x2d66   :  { %3869 = vmatpush3.msra.mxu0 %v4848_v53  ;;  %3876 = vmatprep.mubr.msk.f32.mxu0 %vm4272_vm3, %v5326_v58 }
0x2d67   :  { %3870 = vmatprep.subr.mxu0 %v5326_v58 }
0x2d68   :  { %3871 = vmatpush3.msra.mxu0 %v4854_v49 }
0x2d69   :  { %3872 = vmatprep.subr.mxu0 %v5326_v58 }
0x2d6a   :  { %3873 = vmatpush3.msra.mxu0 %v4859_v51 }
0x2d6b   :  { %3874 = vmatprep.subr.mxu0 %v5326_v58 }
0x2d6c   :  { %3875 = vmatpush3.msra.mxu0 %v4865_v62 }
0x2db4   :  { %v3066_v39 = vpop.f32.mrf.mxu1 }
0x2db6   :  { %v3867_v18 = vpop.f32.mrf.mxu1 }
0x2e25   :  { %v5200_v47 = vpop.f32.mrf.mxu0 }
0x2e27   :  { %v2992_v53 = vpop.f32.mrf.mxu0 }
0x2e28   :  { %v3070_v24 = vadd.f32 %v3066_v39, %v2992_v53 }
0x2e2a   :  { %v3071_v42 = vadd.f32 %v4881_v14, %v3070_v24 }
0x2e2c   :  { %v3079_v2 = vrot.slane %v3071_v42, %v4412_v12 }
0x2e2e   :  { %v3080_v55 = vcombine.high %v3079_v2, %v3079_v2  ;;  %v3087_v49 = vrot.slane %v3079_v2, %v4412_v12 }
0x2e30   :  { %v3094_v29 = vrot.slane %v3080_v55, %v4412_v12  ;;  %v3098_v51 = vrot.slane %v3087_v49, %v4422_v16 }
0x2e32   :  { %v3102_v58 = vrot.slane %v3094_v29, %v4422_v16  ;;  %v3105_v62 = vadd.f32 %v3098_v51, %v4431_v23 }
0x2e34   :  { %v3106_v27 = vadd.f32 %v4428_v21, %v3102_v58  ;;  %4047 = vtanh.f32 %v3105_v62  ;;  %v3507_v58 = vadd.s32 4294967240, %v4443_v32 }
0x2e36   :  { %4049 = vtanh.f32 %v3106_v27  ;;  %v3510_v27 = vsub.s32 %v3507_v58, %v4409_v11 }
0x2e41   :  { %v4048_v10 = vpop.eup %4047 }
0x2e42   :  { %v3109_v14 = vmul.f32 %v4894_v36, %v4048_v10  ;;  %v4088_v10 = vld [vmem:[#allocation3] sm:$0xff] }
0x2e43   :  { %v4050_v7 = vpop.eup %4049 }
0x2e44   :  { %v3111_v0 = vsel %vm146_vm0, %v3109_v14, 0.0  ;;  %v3110_v30 = vmul.f32 %v4894_v36, %v4050_v7 }
0x2e45   :  { %3112 = vadd.xlane.f32.xlu0 %v3111_v0 }
0x2e46   :  { %v3114_v12 = vsel %vm146_vm0, %v3110_v30, 0.0  ;;  %v4089_v30 = vld [vmem:[#allocation3 + $0x8] sm:$0xff] }
0x2e47   :  { %3115 = vadd.xlane.f32.xlu1 %v3114_v12 }
0x2ece   :  { %v3113_v45 = vpop.xlane.xlu0 %3112 }
0x2ecf   :  { %v3122_v23 = vrot.slane %v3113_v45, %v4447_v34 }
0x2ed0   :  { %v3116_v44 = vpop.xlane.xlu1 %3115 }
0x2ed1   :  { %v3126_v21 = vrot.slane %v3116_v44, %v4447_v34 }
0x2ed3   :  { %v3127_v5 = vsel %vm360_vm1, %v3126_v21, %v3122_v23 }
0x2ed4   :  { %v3129_v40 = vsel %vm363_vm2, %v3127_v5, -inf }
0x2ed5   :  { %3130 = vmax.xlane.f32.xlu0 %v3129_v40 }
0x2f5e   :  { %v3131_v1 = vpop.xlane.xlu0 %3130 }
0x2f5f   :  { %v3136_v4 = vrot.slane %v3131_v1, %v4422_v16  ;;  %v3140_v36 = vrot.slane %v3131_v1, %v4456_v41 }
0x2f61   :  { %v3143_v52 = vsub.f32 %v3113_v45, %v3136_v4  ;;  %v3144_v8 = vsub.f32 %v3116_v44, %v3140_v36 }
0x2f63   :  { %v3145_v60 = vmul.f32 1.442695, %v3143_v52  ;;  %v3147_v46 = vmul.f32 1.442695, %v3144_v8 }
0x2f65   :  { %4051 = vpow2.f32 %v3145_v60  ;;  %v3618_v60 = vld [vmem:[%s5312_s11] ss:$0 sm:$0xff] }
0x2f66   :  { %4053 = vpow2.f32 %v3147_v46 }
0x2f72   :  { %v4052_v57 = vpop.eup %4051 }
0x2f73   :  { %v4054_v59 = vpop.eup %4053  ;;  %3152 = vperm.xlu0 %3918, %v4052_v57  }
0x2f74   :  { %3155 = vperm.xlu1 %3914, %v4054_v59  }
0x2fee   :  { %v3153_v63 = vpop.permute.xlu0 %3152 }
0x2fef   :  { %v3156_v19 = vpop.permute.xlu1 %3155  ;;  %v3160_v43 = vrot.slane %v3153_v63, %v4447_v34 }
0x2ff0   :  { %v3164_v22 = vrot.slane %v3156_v19, %v4447_v34  ;;  %v4282_v34 = vmov 7  }
0x2ff2   :  { %v3165_v56 = vsel %vm360_vm1, %v3164_v22, %v3160_v43 }
0x2ff3   :  { %v3167_v39 = vsel %vm363_vm2, %v3165_v56, 0.0 }
0x2ff4   :  { %3168 = vadd.xlane.f32.xlu1 %v3167_v39 }
0x307d   :  { %v3169_v18 = vpop.xlane.xlu1 %3168 }
0x307e   :  { %4055 = vrcp.f32 %v3169_v18 }
0x308b   :  { %v4056_v53 = vpop.eup %4055 }
0x308c   :  { %v3171_v24 = vmul.f32 %v4056_v53, %v3169_v18 }
0x308e   :  { %v3172_v42 = vsub.f32 2.0, %v3171_v24 }
0x3090   :  { %v3173_v2 = vmul.f32 %v4056_v53, %v3172_v42 }
0x3092   :  { %v3178_v55 = vrot.slane %v3173_v2, %v4422_v16  ;;  %v3182_v49 = vrot.slane %v3173_v2, %v4456_v41 }
0x3094   :  { %v3185_v29 = vmul.f32 %v4052_v57, %v3178_v55  ;;  %v3186_v51 = vmul.f32 %v4054_v59, %v3182_v49 }
0x3096   :  { %3189 = vperm.xlu0 %3918, %v3185_v29  }
0x309a   :  { %3194 = vperm.xlu0 %3918, %v3186_v51  }
0x309e   :  { %3919 = vset.pattern.permute.xlu0 %v4282_v34 }
0x309f   :  { %285 = vperm.xlu0 %3919, %v4913_v25  }
0x30a3   :  { %3920 = vset.pattern.permute.xlu0 %v5327_v13 }
0x3111   :  { %v3190_v62 = vpop.permute.xlu0 %3189 }
0x3112   :  { %v3197_v14 = vmul.f32 %v4088_v10, %v3190_v62  ;;  %v3511_v0 = vrot.slane %v3190_v62, %v3510_v27 }
0x3114   :  { %v3199_v16 = vsel %vm146_vm0, %v3197_v14, 0.0 }
0x3115   :  { %v3200_v41 = vrot.slane %v3199_v16, 4  ;;  %v3195_v7 = vpop.permute.xlu0 %3194 }
0x3116   :  { %v3198_v12 = vmul.f32 %v4089_v30, %v3195_v7  ;;  %v3515_v45 = vrot.slane %v3195_v7, %v3510_v27 }
0x3117   :  { %v3201_v44 = vadd.f32 %v3200_v41, %v3199_v16 }
0x3118   :  { %v3206_v25 = vsel %vm146_vm0, %v3198_v12, 0.0  ;;  %v3516_v32 = vsel %vm360_vm1, %v3515_v45, %v3511_v0 }
0x3119   :  { %v3202_v13 = vrot.slane %v3201_v44, 2  ;;  %v3207_v23 = vrot.slane %v3206_v25, 4  ;;  %v3530_v11 = vsel %vm3529_vm9, %v5157_v31, %v3516_v32  ;;  %v5328_v32 = vld [vmem:[#allocation21_spill] sm:$0xff] }
0x311a   :  { %3532 = vst.msk [vmem:[#allocation15] sm:$0x3] %vm3531_vm10, %v3530_v11  ;;  %v286_v19 = vpop.permute.xlu0 %285 }
0x311b   :  { %v3203_v21 = vadd.f32 %v3202_v13, %v3201_v44  ;;  %v3208_v5 = vadd.f32 %v3207_v23, %v3206_v25  ;;  %v288_v43 = vmul.f32 %v4973_v61, %v286_v19  ;;  %v3617_v61 = vld [vmem:[%s5311_s10] ss:$0 sm:$0xff]  ;;  %s4283_s10 = smov [#allocation12]  }
0x311c   :  { %s3541_s8 = sshll.u32 %s4283_s10, 4  ;;  %s3542_s8 = int_to_ptr.vmem [resolvable:$true] %s3541_s8 }
0x311d   :  { %v3209_v40 = vrot.slane %v3208_v5, 2  ;;  %v3204_v1 = vrot.slane %v3203_v21, 1  ;;  %v289_v22 = vadd.f32 %v4979_v35, %v288_v43  ;;  %s4190_s12 = scalar_lea.vmem %s3542_s8, 64  ;;  %p4195_p12 = scmp.lt.s32.totalorder %s3542_s8, %s3542_s8 }
0x311e   :  { %p4191_p11 = scmp.ne.s32.totalorder %s3542_s8, %s4190_s12  ;;  %p4196_p13 = scmp.lt.s32.totalorder %s4190_s12, %s4190_s12 }
0x311f   :  { %v3210_v4 = vadd.f32 %v3209_v40, %v3208_v5  ;;  %v3205_v52 = vadd.f32 %v3204_v1, %v3203_v21  ;;  %v3213_v56 = vadd.f32 %v5200_v47, %v289_v22 }
0x3120   :  { %p4197_p0 = por %p4196_p13, %p4195_p12 }
0x3121   :  { %v3211_v36 = vrot.slane %v3210_v4, 1  ;;  %v3331_v59 = vmul.f32 %v3618_v60, %v3205_v52 }
0x3122   :  { %p4198_p1 = pnand %p4197_p0, %p4191_p11 }
0x3123   :  { %v3212_v8 = vadd.f32 %v3211_v36, %v3210_v4 }
0x3125   :  { %v3216_v46 = vsel %vm360_vm1, %v3212_v8, %v3205_v52  ;;  %v3332_v57 = vmul.f32 %v3618_v60, %v3212_v8 }
0x3126   :  { %3877 = vmatmul.mubr.msk.f32.vlgmr.msra.gmra.mxu0 %vm146_vm0, %v3216_v46 }
0x3127   :  { %v3335_v31 = vrot.slane %v3332_v57, 7 }
0x3129   :  { %v3336_v63 = vsel %vm360_vm1, %v3335_v31, %v3331_v59 }
0x31e6   :  { %v3285_v39 = vpop.f32.mrf.mxu0 }
0x31e7   :  { %v3289_v18 = vadd.f32 %v3285_v39, %v3213_v56 }
0x31e8   :  { %v3878_v53 = vpop.f32.mrf.mxu0 }
0x31e9   :  { %4057 = vtanh.f32 %v3289_v18  ;;  %v3616_v42 = vmul.f32 -1.442695, %v3289_v18 }
0x31eb   :  { %4059 = vpow2.f32 %v3616_v42 }
0x31f6   :  { %v4058_v24 = vpop.eup %4057 }
0x31f7   :  { %3299 = vrot.lane.b32.xlu1 %v4058_v24, %s4273_s27 }
0x31f8   :  { %v4060_v2 = vpop.eup %4059 }
0x31f9   :  { %v3293_v55 = vadd.f32 1.0, %v4060_v2 }
0x31fb   :  { %4061 = vrcp.f32 %v3293_v55 }
0x3208   :  { %v4062_v49 = vpop.eup %4061 }
0x3209   :  { %v3297_v35 = vmul.f32 %v4062_v49, %v5179_v38 }
0x3269   :  { %v3300_v29 = vpop.permute.xlu1 %3299 }
0x326a   :  { %v3302_v51 = vmul.f32 %v4062_v49, %v3300_v29 }
0x326c   :  { %3304 = vrot.lane.b32.xlu0 %v3302_v51, %s4274_s29 }
0x3270   :  { %3320 = vrot.lane.b32.xlu0 %v3617_v61, %s4275_s7 }
0x32de   :  { %v3305_v47 = vpop.permute.xlu0 %3304 }
0x32df   :  { %v3307_v34 = vadd.f32 %v3305_v47, %v3297_v35 }
0x32e1   :  { %4063 = vtanh.f32 %v3307_v34 }
0x32e2   :  { %v3321_v62 = vpop.permute.xlu0 %3320 }
0x32ee   :  { %v4064_v58 = vpop.eup %4063 }
0x32ef   :  { %3310 = vrot.lane.b32.xlu0 %v4064_v58, %s4273_s27 }
0x32f3   :  { %3337 = vrot.lane.b32.xlu0 %v3336_v63, %s4275_s7 }
0x3361   :  { %v3311_v27 = vpop.permute.xlu0 %3310 }
0x3362   :  { %v3313_v10 = vmul.f32 %v4062_v49, %v3311_v27 }
0x3364   :  { %v3323_v14 = vmul.f32 %v3321_v62, %v3313_v10 }
0x3365   :  { %v3338_v16 = vpop.permute.xlu0 %3337 }
0x3366   :  { %v3340_v41 = vadd.f32 %v3338_v16, %v3323_v14 }
0x3368   :  { %3342 = vrot.lane.b32.xlu1 %v3340_v41, %s4274_s29 }
0x336c   :  { %3394 = vrot.lane.b32.xlu1 %v4634_v54, %s4274_s29 }
0x3370   :  { %3404 = vrot.lane.b32.xlu1 %v5070_v17, %s4274_s29 }
0x3374   :  { %3360 = vrot.lane.b32.xlu1 %v4658_v50, %s4273_s27 }
0x3378   :  { %3367 = vrot.lane.b32.xlu1 %v5094_v28, %s4273_s27 }
0x337c   :  { %3397 = vrot.lane.b32.xlu1 %v4724_v6, %s4273_s27 }
0x3380   :  { %3407 = vrot.lane.b32.xlu1 %v5160_v33, %s4273_s27 }
0x3384   :  { %3363 = vrot.lane.b32.xlu1 %v4750_v20, %s4275_s7 }
0x3388   :  { %3370 = vrot.lane.b32.xlu1 %v5185_v9, %s4275_s7 }
0x338c   :  { %3410 = vrot.lane.b32.xlu1 %v3216_v46, %s4275_s7 }
0x33da   :  { %v3343_v54 = vpop.permute.xlu1 %3342 }
0x33db   :  { %v3346_v50 = vsel %vm3345_vm11, %v3343_v54, 0.0 }
0x33dc   :  { %3347 = vadd.xlane.f32.xlu0 %v3346_v50 }
0x33de   :  { %v3395_v17 = vpop.permute.xlu1 %3394 }
0x33df   :  { %v3413_v6 = vsel %vm146_vm0, %v4503_v37, %v3395_v17 }
0x33e2   :  { %v3405_v28 = vpop.permute.xlu1 %3404 }
0x33e3   :  { %v3416_v9 = vsel %vm146_vm0, %v4946_v48, %v3405_v28 }
0x33e6   :  { %v3361_v38 = vpop.permute.xlu1 %3360 }
0x33e7   :  { %v3373_v45 = vsel %vm146_vm0, %v4581_v26, %v3361_v38 }
0x33ea   :  { %v3368_v7 = vpop.permute.xlu1 %3367 }
0x33eb   :  { %v3378_v37 = vsel %vm146_vm0, %v5017_v15, %v3368_v7 }
0x33ee   :  { %v3398_v33 = vpop.permute.xlu1 %3397 }
0x33ef   :  { %v3414_v20 = vsel %vm3374_vm12, %v3413_v6, %v3398_v33 }
0x33f2   :  { %3400 = vrot.lane.b32.xlu0 %v4817_v3, %s4275_s7  ;;  %v3408_v0 = vpop.permute.xlu1 %3407 }
0x33f3   :  { %v3417_v30 = vsel %vm3374_vm12, %v3416_v9, %v3408_v0 }
0x33f6   :  { %v3364_v12 = vpop.permute.xlu1 %3363 }
0x33f7   :  { %v3375_v44 = vsel %vm3374_vm12, %v3373_v45, %v3364_v12 }
0x33f8   :  { %v3377_v3 = vsel %vm3376_vm13, %v3375_v44, %v5328_v32 }
0x33fa   :  { %v3371_v25 = vpop.permute.xlu1 %3370 }
0x33fb   :  { %v3379_v48 = vsel %vm3374_vm12, %v3378_v37, %v3371_v25 }
0x33fc   :  { %v3380_v13 = vsel %vm3376_vm13, %v3379_v48, %v3313_v10 }
0x33fd   :  { %v3383_v23 = vcombine.low %v3377_v3, %v3380_v13 }
0x33ff   :  { %3620 = vst.sshfl [vmem:[#allocation12] sm:$0x33 pattern:$0x76325410] %v3383_v23 }
0x3400   :  { %4201 = shalt.err (!%p4198_p1)
}
0x3401   :  { %3544 = dma.vmem_to_hbm [thread:$0]  %s3542_s8, 64, %s5315_s14, [#allocation5]   ;;  %v3619_v26 = vld [vmem:[#allocation2] ss:$0 sm:$0xff]  ;;  %vm3357_vm14 = vcmask 1024   ;;  %v3411_v21 = vpop.permute.xlu1 %3410 }
0x3402   :  { %s4284_s25 = smov [#allocation13]   ;;  %s4285_s24 = smov [#allocation15]   ;;  %v3418_v40 = vsel %vm3376_vm13, %v3417_v30, %v3411_v21 }
0x3403   :  { %s3551_s2 = sshll.u32 %s4284_s25, 4  ;;  %s3561_s27 = sshll.u32 %s4285_s24, 4  ;;  %s3552_s2 = int_to_ptr.vmem [resolvable:$true] %s3551_s2  ;;  %s3562_s27 = int_to_ptr.vmem [resolvable:$true] %s3561_s27 }
0x3404   :  { %s4210_s14 = scalar_lea.vmem %s3552_s2, 64  ;;  %p4215_p3 = scmp.lt.s32.totalorder %s3552_s2, %s3552_s2 }
0x3405   :  { %p4211_p2 = scmp.ne.s32.totalorder %s3552_s2, %s4210_s14  ;;  %p4216_p4 = scmp.lt.s32.totalorder %s4210_s14, %s4210_s14 }
0x3407   :  { %p4217_p5 = por %p4216_p4, %p4215_p3 }
0x3409   :  { %p4218_p6 = pnand %p4217_p5, %p4211_p2 }
0x3465   :  { %v3348_v15 = vpop.xlane.xlu0 %3347 }
0x3466   :  { %v3356_v11 = vadd.f32 %v3619_v26, %v3348_v15 }
0x3468   :  { %3358 = vst.msk [vmem:[%s5314_s13] sm:$0x3] %vm3357_vm14, %v3356_v11 }
0x3469   :  { %v3401_v5 = vpop.permute.xlu0 %3400 }
0x346a   :  { %v3415_v1 = vsel %vm3376_vm13, %v3414_v20, %v3401_v5 }
0x346b   :  { %v3421_v4 = vcombine.low %v3415_v1, %v3418_v40 }
0x346d   :  { %3621 = vst.sshfl [vmem:[#allocation13] sm:$0x33 pattern:$0x76325410] %v3421_v4 }
0x346e   :  { %4221 = shalt.err (!%p4218_p6)
}
0x346f   :  { %3554 = dma.vmem_to_hbm [thread:$0]  %s3552_s2, 64, %s5316_s15, [#allocation14]  }
0x3470   :  { %s4230_s7 = scalar_lea.vmem %s3562_s27, 32  ;;  %p4235_p8 = scmp.lt.s32.totalorder %s3562_s27, %s3562_s27 }
0x3471   :  { %p4231_p7 = scmp.ne.s32.totalorder %s3562_s27, %s4230_s7  ;;  %p4236_p9 = scmp.lt.s32.totalorder %s4230_s7, %s4230_s7 }
0x3473   :  { %p4237_p10 = por %p4236_p9, %p4235_p8 }
0x3475   :  { %p4238_p11 = pnand %p4237_p10, %p4231_p7 }
0x3477   :  { %4241 = shalt.err (!%p4238_p11)
}
0x3478   :  { %3564 = dma.vmem_to_hbm [thread:$0]  %s3562_s27, 32, %s5317_s16, [#allocation14]  }
0x3479   :  { %4256 = dma.done.wait [#allocation5], 64  }
0x347a   :  { %4257 = vsyncadd [#allocation5], 4294967232 }
0x347b   :  { %4258 = dma.done.wait [#allocation14], 96  }
0x347c   :  { %4259 = vsyncadd [#allocation14], 4294967200 }
0x347d   :  { %3576 = vsyncpa [#allocation4], 1 }
0x347e   :  { %3577 = vsyncpa [#allocation7], 1 }
0x347f   :  { %3578 = vsyncpa [#allocation10], 1 }
0x3480   :  { %3579 = vsyncpa [#allocation5], 1 }
0x3481   :  { %3580 = vsyncpa [#allocation14], 1 }

</bundles_post_ra>
